<compile_context>
chip_gen: v7x
topology: tpu7x:2x2x1
jax: 0.10.0
libtpu: 0.0.40
codegen_flags: <defaults>
</compile_context>

<pallas_src>
import functools

import jax
import jax.numpy as jnp
from jax.experimental import pallas as pl
from jax.experimental.pallas import tpu as pltpu

EPS = 1e-5
DEC0_TILE = 1024                      # lane tile for the 512x6144 projection
_VMEM_LIMIT = 32 * 1024 * 1024        # <= v7x 64 MiB physical VMEM


# ----------------------------- Pallas kernels ------------------------------

def _head_kernel(a_ref, x_ref,
                 e0_mw, e0_mb, e0_gw, e0_gb,
                 e1_mw, e1_mb, e1_gw, e1_gb,
                 e2_mw, e2_mb, e2_gw, e2_gb,
                 lin_w, lin_b, d1_w, d1_b,
                 o_x0, o_x1, o_x2, o_x3, o_pool, o_d1):
    """Fused forward up to decoder1; all activations stay resident in VMEM.

    Eval-mode BatchNorm is pre-folded into each weight/bias, so every layer is
    just (dot + bias [+ ReLU]); GCNConv is a dense A_hat matmul.
    """
    f32 = jnp.float32
    a = a_ref[...]

    def encoder(xin, mw, mb, gw, gb):
        h = jnp.dot(xin, mw[...], preferred_element_type=f32) + mb[...]
        h = jnp.maximum(h, 0.0)                       # Linear + BN(folded) + ReLU
        g = jnp.dot(h, gw[...], preferred_element_type=f32)
        g = jnp.dot(a, g, preferred_element_type=f32) + gb[...]
        return jnp.maximum(g, 0.0)                    # GCN + BN(folded) + ReLU

    x0 = encoder(x_ref[...], e0_mw, e0_mb, e0_gw, e0_gb)
    x1 = encoder(x0, e1_mw, e1_mb, e1_gw, e1_gb)
    x2 = encoder(x1, e2_mw, e2_mb, e2_gw, e2_gb)
    o_x0[...] = x0
    o_x1[...] = x1
    o_x2[...] = x2

    # 'linear' decoder on concat([x0, x1, x2]) realized as a row-split matmul
    # (identical math, avoids an in-kernel lane-dim concatenate).
    w = lin_w[...]
    x3 = (jnp.dot(x0, w[0:32, :], preferred_element_type=f32)
          + jnp.dot(x1, w[32:96, :], preferred_element_type=f32)
          + jnp.dot(x2, w[96:160, :], preferred_element_type=f32)
          + lin_b[...])
    x3 = jnp.maximum(x3, 0.0)
    o_x3[...] = x3

    # global_mean_pool for the single-graph (batch=None) path, fused in:
    # one row-reduction on an already-resident tile.
    pooled = jnp.mean(x3, axis=0, keepdims=True)
    o_pool[...] = pooled

    d1 = jnp.dot(pooled, d1_w[...], preferred_element_type=f32) + d1_b[...]
    o_d1[...] = jnp.maximum(d1, 0.0)


def _dec0_kernel(h_ref, w_ref, b_ref, o_ref):
    # decoder0: (1, 512) @ (512, 6144), weight streamed as bf16 lane tiles.
    h = h_ref[...].astype(jnp.bfloat16)
    y = jnp.dot(h, w_ref[...], preferred_element_type=jnp.float32)
    o_ref[...] = y + b_ref[...]


# ------------------------------ pallas_call glue ----------------------------

def _full_spec(shape):
    nd = len(shape)
    return pl.BlockSpec(shape, lambda i, _nd=nd: (0,) * _nd)


def fused_head(a_hat, x, params):
    n = x.shape[0]
    e0, e1, e2 = params["encoder0"], params["encoder1"], params["encoder2"]
    lin, d1 = params["linear"], params["decoder1"]
    inputs = [
        a_hat, x,
        e0["mlp_w"], e0["mlp_b"].reshape(1, -1), e0["gcn_w"], e0["gcn_b"].reshape(1, -1),
        e1["mlp_w"], e1["mlp_b"].reshape(1, -1), e1["gcn_w"], e1["gcn_b"].reshape(1, -1),
        e2["mlp_w"], e2["mlp_b"].reshape(1, -1), e2["gcn_w"], e2["gcn_b"].reshape(1, -1),
        lin["w"], lin["b"].reshape(1, -1),
        d1["w"], d1["b"].reshape(1, -1),
    ]
    out_shape = (
        jax.ShapeDtypeStruct((n, 32), jnp.float32),   # encoder0
        jax.ShapeDtypeStruct((n, 64), jnp.float32),   # encoder1
        jax.ShapeDtypeStruct((n, 64), jnp.float32),   # encoder2
        jax.ShapeDtypeStruct((n, 128), jnp.float32),  # encoder3
        jax.ShapeDtypeStruct((1, 128), jnp.float32),  # gb_pool
        jax.ShapeDtypeStruct((1, 512), jnp.float32),  # decoder1
    )
    return pl.pallas_call(
        _head_kernel,
        out_shape=out_shape,
        grid=(1,),
        in_specs=[_full_spec(a.shape) for a in inputs],
        out_specs=tuple(_full_spec(s.shape) for s in out_shape),
        compiler_params=pltpu.CompilerParams(
            dimension_semantics=("arbitrary",),
            vmem_limit_bytes=_VMEM_LIMIT),
    )(*inputs)


def decoder0_apply(h, w_bf16, b):
    k, n_out = w_bf16.shape
    assert n_out % DEC0_TILE == 0
    return pl.pallas_call(
        _dec0_kernel,
        out_shape=jax.ShapeDtypeStruct((1, n_out), jnp.float32),
        grid=(n_out // DEC0_TILE,),
        in_specs=[pl.BlockSpec((1, k), lambda j: (0, 0)),
                  pl.BlockSpec((k, DEC0_TILE), lambda j: (0, j)),
                  pl.BlockSpec((1, DEC0_TILE), lambda j: (0, j))],
        out_specs=pl.BlockSpec((1, DEC0_TILE), lambda j: (0, j)),
        compiler_params=pltpu.CompilerParams(
            # output tiles are independent -> shard across v7x's 2 TensorCores
            dimension_semantics=("parallel",),
            vmem_limit_bytes=_VMEM_LIMIT),
    )(h, w_bf16, b.reshape(1, -1))


# --------------------------- parameter construction -------------------------

def _init_linear(key, cin, cout):
    k1, k2 = jax.random.split(key)
    lim = 1.0 / jnp.sqrt(jnp.float32(cin))
    w = jax.random.uniform(k1, (cin, cout), jnp.float32, -lim, lim)
    b = jax.random.uniform(k2, (cout,), jnp.float32, -lim, lim)
    return w, b


def _init_bn_folded(key, c):
    # eval-mode BN -> per-channel scale/shift: y = x*scale + shift
    k1, k2, k3, k4 = jax.random.split(key, 4)
    gamma = 1.0 + 0.1 * jax.random.normal(k1, (c,), jnp.float32)
    beta = 0.1 * jax.random.normal(k2, (c,), jnp.float32)
    mean = 0.1 * jax.random.normal(k3, (c,), jnp.float32)
    var = jnp.abs(jax.random.normal(k4, (c,), jnp.float32)) + 0.5
    scale = gamma * jax.lax.rsqrt(var + EPS)
    shift = beta - mean * scale
    return scale, shift


def _fold_bn(w, b, scale, shift):
    # (x @ W + b) * s + t  ==  x @ (W*s) + (b*s + t)   (column-wise s)
    return w * scale[None, :], b * scale + shift


def _init_encoder(key, cin, cout):
    k1, k2, k3, k4, k5 = jax.random.split(key, 5)
    mlp_w, mlp_b = _init_linear(k1, cin, cout)
    mlp_w, mlp_b = _fold_bn(mlp_w, mlp_b, *_init_bn_folded(k2, cout))
    gcn_w, _ = _init_linear(k3, cout, cout)
    gcn_b = 0.1 * jax.random.normal(k4, (cout,), jnp.float32)
    gcn_w, gcn_b = _fold_bn(gcn_w, gcn_b, *_init_bn_folded(k5, cout))
    return dict(mlp_w=mlp_w, mlp_b=mlp_b, gcn_w=gcn_w, gcn_b=gcn_b)


def _init_decoder(key, cin, cout, act, weight_dtype=jnp.float32):
    k1, k2 = jax.random.split(key)
    w, b = _init_linear(k1, cin, cout)
    if act:
        w, b = _fold_bn(w, b, *_init_bn_folded(k2, cout))
    return dict(w=w.astype(weight_dtype), b=b)


def init_base_cnet_params(key, in_channels):
    k0, k1, k2, k3, k4, k5 = jax.random.split(key, 6)
    return dict(
        encoder0=_init_encoder(k0, in_channels, 32),
        encoder1=_init_encoder(k1, 32, 64),
        encoder2=_init_encoder(k2, 64, 64),
        linear=_init_decoder(k3, 32 + 64 + 64, 128, act=True),
        decoder1=_init_decoder(k4, 128, 512, act=True),
        # decoder0 weight stored/streamed as bf16: layer is pure HBM BW (M=1).
        decoder0=_init_decoder(k5, 512, 2048 * 3, act=False,
                               weight_dtype=jnp.bfloat16),
    )


# ------------------------------ forward pass --------------------------------

def normalized_adjacency(edge_index, num_nodes):
    """Dense A_hat = D^-1/2 (A + I) D^-1/2 (GCNConv add_self_loops+normalize)."""
    src, dst = edge_index[0], edge_index[1]
    a = jnp.zeros((num_nodes, num_nodes), jnp.float32).at[dst, src].add(1.0)
    a = a + jnp.eye(num_nodes, dtype=jnp.float32)
    deg = jnp.sum(a, axis=1)
    dinv = jax.lax.rsqrt(jnp.maximum(deg, 1e-12))
    return dinv[:, None] * a * dinv[None, :]


def base_cnet_forward(params, x, edge_index, batch=None):
    # TODO(synk): multi-graph segmented mean pool (batch != None) not implemented;
    # the module's default path (batch=None -> single graph) is reproduced.
    n = x.shape[0]
    a_hat = normalized_adjacency(edge_index, n)

    x0, x1, x2, x3, xpool, xd1 = fused_head(a_hat, x, params)
    xg = decoder0_apply(xd1, params["decoder0"]["w"], params["decoder0"]["b"])

    embeddings = {
        "encoder0": x0,
        "encoder1": x1,
        "encoder2": x2,
        "encoder2.5": jnp.concatenate([x0, x1, x2], axis=1),
        "encoder3": x3,
        "gb_pool": xpool,
        "decoder1": xd1,
        "decoder0": xg,
    }
    return xg, embeddings


# ----------------------------- pure-JAX reference ----------------------------

def _reference_forward(params, x, a_hat):
    def enc(p, h):
        h = jnp.maximum(h @ p["mlp_w"] + p["mlp_b"], 0.0)
        return jnp.maximum(a_hat @ (h @ p["gcn_w"]) + p["gcn_b"], 0.0)
    x0 = enc(params["encoder0"], x)
    x1 = enc(params["encoder1"], x0)
    x2 = enc(params["encoder2"], x1)
    cat = jnp.concatenate([x0, x1, x2], axis=1)
    x3 = jnp.maximum(cat @ params["linear"]["w"] + params["linear"]["b"], 0.0)
    xp = jnp.mean(x3, axis=0, keepdims=True)
    d1 = jnp.maximum(xp @ params["decoder1"]["w"] + params["decoder1"]["b"], 0.0)
    d0 = d1 @ params["decoder0"]["w"].astype(jnp.float32) + params["decoder0"]["b"]
    return d0


# ---------------------------------- main -------------------------------------

if __name__ == "__main__":
    key = jax.random.PRNGKey(0)
    k_x, k_p = jax.random.split(key)

    n_nodes, in_channels = 16, 4
    x = jax.random.normal(k_x, (n_nodes, in_channels), jnp.float32)

    # bidirectional ring graph: edge_index [2, 2*N]
    idx = jnp.arange(n_nodes, dtype=jnp.int32)
    nxt = (idx + 1) % n_nodes
    edge_index = jnp.stack([jnp.concatenate([idx, nxt]),
                            jnp.concatenate([nxt, idx])])

    params = init_base_cnet_params(k_p, in_channels)

    fwd = jax.jit(functools.partial(base_cnet_forward, params))
    xg, embeddings = fwd(x, edge_index)
    xg = jax.block_until_ready(xg)

    assert xg.shape == (1, 2048 * 3)
    assert embeddings["encoder0"].shape == (n_nodes, 32)
    assert embeddings["encoder1"].shape == (n_nodes, 64)
    assert embeddings["encoder2"].shape == (n_nodes, 64)
    assert embeddings["encoder2.5"].shape == (n_nodes, 160)
    assert embeddings["encoder3"].shape == (n_nodes, 128)
    assert embeddings["gb_pool"].shape == (1, 128)
    assert embeddings["decoder1"].shape == (1, 512)
    assert bool(jnp.all(jnp.isfinite(xg)))

    # loose tolerance: decoder0 runs with bf16 weights/activations on the MXU
    ref = _reference_forward(params, x, normalized_adjacency(edge_index, n_nodes))
    assert bool(jnp.allclose(xg, ref, rtol=2e-2, atol=2e-2))

    print("KERNEL_OK")
</pallas_src>

<mosaic_0001>
module attributes {stable_mosaic.version = 11 : i64} {
  func.func private @main(%arg0: i32) attributes {dimension_semantics = [#tpu.dimension_semantics<core_parallel>], iteration_bounds = array<i64: 2>, tpu.core_type = #tpu.core_type<sc_scalar_subcore>, window_params = []} {
    return
  }
}

module attributes {stable_mosaic.version = 11 : i64} {
  func.func private @main(%arg0: i32) attributes {dimension_semantics = [#tpu.dimension_semantics<core_parallel>], iteration_bounds = array<i64: 2>, tpu.core_type = #tpu.core_type<sc_scalar_subcore>, window_params = []} {
    return
  }
}

module attributes {stable_mosaic.version = 11 : i64} {
  func.func @_dec0_kernel(%arg0: i32, %arg1: memref<1x512xf32, #tpu.memory_space<vmem>>, %arg2: memref<512x1024xbf16, #tpu.memory_space<vmem>>, %arg3: memref<1x1024xf32, #tpu.memory_space<vmem>>, %arg4: memref<1x1024xf32, #tpu.memory_space<vmem>>) attributes {dimension_semantics = [#tpu.dimension_semantics<parallel>], iteration_bounds = array<i64: 6>, scalar_prefetch = 0 : i64, scratch_operands = 0 : i64, tpu.core_type = #tpu.core_type<tc>, window_params = [{pipeline_mode = #tpu.pipeline_mode<synchronous>, transform_indices = @transform_0, window_bounds = array<i64: 1, 512>}, {transform_indices = @transform_1, window_bounds = array<i64: 512, 1024>}, {transform_indices = @transform_2, window_bounds = array<i64: 1, 1024>}, {transform_indices = @transform_3, window_bounds = array<i64: 1, 1024>}]} {
    %c0 = arith.constant 0 : index
    %c0_0 = arith.constant 0 : index
    %0 = vector.load %arg1[%c0, %c0_0] : memref<1x512xf32, #tpu.memory_space<vmem>>, vector<1x512xf32>
    %1 = arith.truncf %0 : vector<1x512xf32> to vector<1x512xbf16>
    %c0_1 = arith.constant 0 : index
    %c0_2 = arith.constant 0 : index
    %2 = vector.load %arg2[%c0_1, %c0_2] : memref<512x1024xbf16, #tpu.memory_space<vmem>>, vector<512x1024xbf16>
    %cst = arith.constant dense<0.000000e+00> : vector<1x1024xf32>
    %3 = tpu.matmul %1, %2, %cst {dimension_numbers = #tpu.dot_dimension_numbers<[1], [0], [0], [1], [0, 0, 1, 1], [], []>} : vector<1x512xbf16>, vector<512x1024xbf16>, vector<1x1024xf32> -> vector<1x1024xf32>
    %c0_3 = arith.constant 0 : index
    %c0_4 = arith.constant 0 : index
    %4 = vector.load %arg3[%c0_3, %c0_4] : memref<1x1024xf32, #tpu.memory_space<vmem>>, vector<1x1024xf32>
    %5 = arith.addf %3, %4 : vector<1x1024xf32>
    %c0_5 = arith.constant 0 : index
    %c0_6 = arith.constant 0 : index
    %6 = vector.load %arg4[%c0_5, %c0_6] : memref<1x1024xf32, #tpu.memory_space<vmem>>, vector<1x1024xf32>
    tpu.vector_store %arg4[%c0_5, %c0_6], %5 {strides = array<i32>} : memref<1x1024xf32, #tpu.memory_space<vmem>>, vector<1x1024xf32>,
    return
  }
  func.func @transform_0(%arg0: i32) -> (i32, i32) {
    %c0_i32 = arith.constant 0 : i32
    %c0_i32_0 = arith.constant 0 : i32
    %c0_i32_1 = arith.constant 0 : i32
    return %c0_i32, %c0_i32_0 : i32, i32
  }
  func.func @transform_1(%arg0: i32) -> (i32, i32) {
    %c0_i32 = arith.constant 0 : i32
    %c0_i32_0 = arith.constant 0 : i32
    return %c0_i32, %arg0 : i32, i32
  }
  func.func @transform_2(%arg0: i32) -> (i32, i32) {
    %c0_i32 = arith.constant 0 : i32
    %c0_i32_0 = arith.constant 0 : i32
    return %c0_i32, %arg0 : i32, i32
  }
  func.func @transform_3(%arg0: i32) -> (i32, i32) {
    %c0_i32 = arith.constant 0 : i32
    %c0_i32_0 = arith.constant 0 : i32
    return %c0_i32, %arg0 : i32, i32
  }
}

module attributes {stable_mosaic.version = 11 : i64} {
  func.func @_head_kernel(%arg0: i32, %arg1: memref<16x16xf32, #tpu.memory_space<vmem>>, %arg2: memref<16x4xf32, #tpu.memory_space<vmem>>, %arg3: memref<4x32xf32, #tpu.memory_space<vmem>>, %arg4: memref<1x32xf32, #tpu.memory_space<vmem>>, %arg5: memref<32x32xf32, #tpu.memory_space<vmem>>, %arg6: memref<1x32xf32, #tpu.memory_space<vmem>>, %arg7: memref<32x64xf32, #tpu.memory_space<vmem>>, %arg8: memref<1x64xf32, #tpu.memory_space<vmem>>, %arg9: memref<64x64xf32, #tpu.memory_space<vmem>>, %arg10: memref<1x64xf32, #tpu.memory_space<vmem>>, %arg11: memref<64x64xf32, #tpu.memory_space<vmem>>, %arg12: memref<1x64xf32, #tpu.memory_space<vmem>>, %arg13: memref<64x64xf32, #tpu.memory_space<vmem>>, %arg14: memref<1x64xf32, #tpu.memory_space<vmem>>, %arg15: memref<160x128xf32, #tpu.memory_space<vmem>>, %arg16: memref<1x128xf32, #tpu.memory_space<vmem>>, %arg17: memref<128x512xf32, #tpu.memory_space<vmem>>, %arg18: memref<1x512xf32, #tpu.memory_space<vmem>>, %arg19: memref<16x32xf32, #tpu.memory_space<vmem>>, %arg20: memref<16x64xf32, #tpu.memory_space<vmem>>, %arg21: memref<16x64xf32, #tpu.memory_space<vmem>>, %arg22: memref<16x128xf32, #tpu.memory_space<vmem>>, %arg23: memref<1x128xf32, #tpu.memory_space<vmem>>, %arg24: memref<1x512xf32, #tpu.memory_space<vmem>>) attributes {dimension_semantics = [#tpu.dimension_semantics<arbitrary>], iteration_bounds = array<i64: 1>, scalar_prefetch = 0 : i64, scratch_operands = 0 : i64, tpu.core_type = #tpu.core_type<tc>, window_params = [{pipeline_mode = #tpu.pipeline_mode<synchronous>, transform_indices = @transform_0, window_bounds = array<i64: 16, 16>}, {pipeline_mode = #tpu.pipeline_mode<synchronous>, transform_indices = @transform_1, window_bounds = array<i64: 16, 4>}, {pipeline_mode = #tpu.pipeline_mode<synchronous>, transform_indices = @transform_2, window_bounds = array<i64: 4, 32>}, {pipeline_mode = #tpu.pipeline_mode<synchronous>, transform_indices = @transform_3, window_bounds = array<i64: 1, 32>}, {pipeline_mode = #tpu.pipeline_mode<synchronous>, transform_indices = @transform_4, window_bounds = array<i64: 32, 32>}, {pipeline_mode = #tpu.pipeline_mode<synchronous>, transform_indices = @transform_5, window_bounds = array<i64: 1, 32>}, {pipeline_mode = #tpu.pipeline_mode<synchronous>, transform_indices = @transform_6, window_bounds = array<i64: 32, 64>}, {pipeline_mode = #tpu.pipeline_mode<synchronous>, transform_indices = @transform_7, window_bounds = array<i64: 1, 64>}, {pipeline_mode = #tpu.pipeline_mode<synchronous>, transform_indices = @transform_8, window_bounds = array<i64: 64, 64>}, {pipeline_mode = #tpu.pipeline_mode<synchronous>, transform_indices = @transform_9, window_bounds = array<i64: 1, 64>}, {pipeline_mode = #tpu.pipeline_mode<synchronous>, transform_indices = @transform_10, window_bounds = array<i64: 64, 64>}, {pipeline_mode = #tpu.pipeline_mode<synchronous>, transform_indices = @transform_11, window_bounds = array<i64: 1, 64>}, {pipeline_mode = #tpu.pipeline_mode<synchronous>, transform_indices = @transform_12, window_bounds = array<i64: 64, 64>}, {pipeline_mode = #tpu.pipeline_mode<synchronous>, transform_indices = @transform_13, window_bounds = array<i64: 1, 64>}, {pipeline_mode = #tpu.pipeline_mode<synchronous>, transform_indices = @transform_14, window_bounds = array<i64: 160, 128>}, {pipeline_mode = #tpu.pipeline_mode<synchronous>, transform_indices = @transform_15, window_bounds = array<i64: 1, 128>}, {pipeline_mode = #tpu.pipeline_mode<synchronous>, transform_indices = @transform_16, window_bounds = array<i64: 128, 512>}, {pipeline_mode = #tpu.pipeline_mode<synchronous>, transform_indices = @transform_17, window_bounds = array<i64: 1, 512>}, {pipeline_mode = #tpu.pipeline_mode<synchronous>, transform_indices = @transform_18, window_bounds = array<i64: 16, 32>}, {pipeline_mode = #tpu.pipeline_mode<synchronous>, transform_indices = @transform_19, window_bounds = array<i64: 16, 64>}, {pipeline_mode = #tpu.pipeline_mode<synchronous>, transform_indices = @transform_20, window_bounds = array<i64: 16, 64>}, {pipeline_mode = #tpu.pipeline_mode<synchronous>, transform_indices = @transform_21, window_bounds = array<i64: 16, 128>}, {pipeline_mode = #tpu.pipeline_mode<synchronous>, transform_indices = @transform_22, window_bounds = array<i64: 1, 128>}, {pipeline_mode = #tpu.pipeline_mode<synchronous>, transform_indices = @transform_23, window_bounds = array<i64: 1, 512>}]} {
    %c0 = arith.constant 0 : index
    %c0_0 = arith.constant 0 : index
    %0 = vector.load %arg1[%c0, %c0_0] : memref<16x16xf32, #tpu.memory_space<vmem>>, vector<16x16xf32>
    %c0_1 = arith.constant 0 : index
    %c0_2 = arith.constant 0 : index
    %1 = vector.load %arg2[%c0_1, %c0_2] : memref<16x4xf32, #tpu.memory_space<vmem>>, vector<16x4xf32>
    %c0_3 = arith.constant 0 : index
    %c0_4 = arith.constant 0 : index
    %2 = vector.load %arg3[%c0_3, %c0_4] : memref<4x32xf32, #tpu.memory_space<vmem>>, vector<4x32xf32>
    %cst = arith.constant dense<0.000000e+00> : vector<16x32xf32>
    %3 = tpu.matmul %1, %2, %cst {dimension_numbers = #tpu.dot_dimension_numbers<[1], [0], [0], [1], [0, 0, 1, 1], [], []>} : vector<16x4xf32>, vector<4x32xf32>, vector<16x32xf32> -> vector<16x32xf32>
    %c0_5 = arith.constant 0 : index
    %c0_6 = arith.constant 0 : index
    %4 = vector.load %arg4[%c0_5, %c0_6] : memref<1x32xf32, #tpu.memory_space<vmem>>, vector<1x32xf32>
    %5 = vector.broadcast %4 : vector<1x32xf32> to vector<16x32xf32>
    %6 = arith.addf %3, %5 : vector<16x32xf32>
    %cst_7 = arith.constant 0.000000e+00 : f32
    %7 = vector.broadcast %cst_7 : f32 to vector<16x32xf32>
    %8 = arith.maximumf %6, %7 : vector<16x32xf32>
    %c0_8 = arith.constant 0 : index
    %c0_9 = arith.constant 0 : index
    %9 = vector.load %arg5[%c0_8, %c0_9] : memref<32x32xf32, #tpu.memory_space<vmem>>, vector<32x32xf32>
    %cst_10 = arith.constant dense<0.000000e+00> : vector<16x32xf32>
    %10 = tpu.matmul %8, %9, %cst_10 {dimension_numbers = #tpu.dot_dimension_numbers<[1], [0], [0], [1], [0, 0, 1, 1], [], []>} : vector<16x32xf32>, vector<32x32xf32>, vector<16x32xf32> -> vector<16x32xf32>
    %cst_11 = arith.constant dense<0.000000e+00> : vector<16x32xf32>
    %11 = tpu.matmul %0, %10, %cst_11 {dimension_numbers = #tpu.dot_dimension_numbers<[1], [0], [0], [1], [0, 0, 1, 1], [], []>} : vector<16x16xf32>, vector<16x32xf32>, vector<16x32xf32> -> vector<16x32xf32>
    %c0_12 = arith.constant 0 : index
    %c0_13 = arith.constant 0 : index
    %12 = vector.load %arg6[%c0_12, %c0_13] : memref<1x32xf32, #tpu.memory_space<vmem>>, vector<1x32xf32>
    %13 = vector.broadcast %12 : vector<1x32xf32> to vector<16x32xf32>
    %14 = arith.addf %11, %13 : vector<16x32xf32>
    %cst_14 = arith.constant 0.000000e+00 : f32
    %15 = vector.broadcast %cst_14 : f32 to vector<16x32xf32>
    %16 = arith.maximumf %14, %15 : vector<16x32xf32>
    %c0_15 = arith.constant 0 : index
    %c0_16 = arith.constant 0 : index
    %17 = vector.load %arg7[%c0_15, %c0_16] : memref<32x64xf32, #tpu.memory_space<vmem>>, vector<32x64xf32>
    %cst_17 = arith.constant dense<0.000000e+00> : vector<16x64xf32>
    %18 = tpu.matmul %16, %17, %cst_17 {dimension_numbers = #tpu.dot_dimension_numbers<[1], [0], [0], [1], [0, 0, 1, 1], [], []>} : vector<16x32xf32>, vector<32x64xf32>, vector<16x64xf32> -> vector<16x64xf32>
    %c0_18 = arith.constant 0 : index
    %c0_19 = arith.constant 0 : index
    %19 = vector.load %arg8[%c0_18, %c0_19] : memref<1x64xf32, #tpu.memory_space<vmem>>, vector<1x64xf32>
    %20 = vector.broadcast %19 : vector<1x64xf32> to vector<16x64xf32>
    %21 = arith.addf %18, %20 : vector<16x64xf32>
    %cst_20 = arith.constant 0.000000e+00 : f32
    %22 = vector.broadcast %cst_20 : f32 to vector<16x64xf32>
    %23 = arith.maximumf %21, %22 : vector<16x64xf32>
    %c0_21 = arith.constant 0 : index
    %c0_22 = arith.constant 0 : index
    %24 = vector.load %arg9[%c0_21, %c0_22] : memref<64x64xf32, #tpu.memory_space<vmem>>, vector<64x64xf32>
    %cst_23 = arith.constant dense<0.000000e+00> : vector<16x64xf32>
    %25 = tpu.matmul %23, %24, %cst_23 {dimension_numbers = #tpu.dot_dimension_numbers<[1], [0], [0], [1], [0, 0, 1, 1], [], []>} : vector<16x64xf32>, vector<64x64xf32>, vector<16x64xf32> -> vector<16x64xf32>
    %cst_24 = arith.constant dense<0.000000e+00> : vector<16x64xf32>
    %26 = tpu.matmul %0, %25, %cst_24 {dimension_numbers = #tpu.dot_dimension_numbers<[1], [0], [0], [1], [0, 0, 1, 1], [], []>} : vector<16x16xf32>, vector<16x64xf32>, vector<16x64xf32> -> vector<16x64xf32>
    %c0_25 = arith.constant 0 : index
    %c0_26 = arith.constant 0 : index
    %27 = vector.load %arg10[%c0_25, %c0_26] : memref<1x64xf32, #tpu.memory_space<vmem>>, vector<1x64xf32>
    %28 = vector.broadcast %27 : vector<1x64xf32> to vector<16x64xf32>
    %29 = arith.addf %26, %28 : vector<16x64xf32>
    %cst_27 = arith.constant 0.000000e+00 : f32
    %30 = vector.broadcast %cst_27 : f32 to vector<16x64xf32>
    %31 = arith.maximumf %29, %30 : vector<16x64xf32>
    %c0_28 = arith.constant 0 : index
    %c0_29 = arith.constant 0 : index
    %32 = vector.load %arg11[%c0_28, %c0_29] : memref<64x64xf32, #tpu.memory_space<vmem>>, vector<64x64xf32>
    %cst_30 = arith.constant dense<0.000000e+00> : vector<16x64xf32>
    %33 = tpu.matmul %31, %32, %cst_30 {dimension_numbers = #tpu.dot_dimension_numbers<[1], [0], [0], [1], [0, 0, 1, 1], [], []>} : vector<16x64xf32>, vector<64x64xf32>, vector<16x64xf32> -> vector<16x64xf32>
    %c0_31 = arith.constant 0 : index
    %c0_32 = arith.constant 0 : index
    %34 = vector.load %arg12[%c0_31, %c0_32] : memref<1x64xf32, #tpu.memory_space<vmem>>, vector<1x64xf32>
    %35 = vector.broadcast %34 : vector<1x64xf32> to vector<16x64xf32>
    %36 = arith.addf %33, %35 : vector<16x64xf32>
    %cst_33 = arith.constant 0.000000e+00 : f32
    %37 = vector.broadcast %cst_33 : f32 to vector<16x64xf32>
    %38 = arith.maximumf %36, %37 : vector<16x64xf32>
    %c0_34 = arith.constant 0 : index
    %c0_35 = arith.constant 0 : index
    %39 = vector.load %arg13[%c0_34, %c0_35] : memref<64x64xf32, #tpu.memory_space<vmem>>, vector<64x64xf32>
    %cst_36 = arith.constant dense<0.000000e+00> : vector<16x64xf32>
    %40 = tpu.matmul %38, %39, %cst_36 {dimension_numbers = #tpu.dot_dimension_numbers<[1], [0], [0], [1], [0, 0, 1, 1], [], []>} : vector<16x64xf32>, vector<64x64xf32>, vector<16x64xf32> -> vector<16x64xf32>
    %cst_37 = arith.constant dense<0.000000e+00> : vector<16x64xf32>
    %41 = tpu.matmul %0, %40, %cst_37 {dimension_numbers = #tpu.dot_dimension_numbers<[1], [0], [0], [1], [0, 0, 1, 1], [], []>} : vector<16x16xf32>, vector<16x64xf32>, vector<16x64xf32> -> vector<16x64xf32>
    %c0_38 = arith.constant 0 : index
    %c0_39 = arith.constant 0 : index
    %42 = vector.load %arg14[%c0_38, %c0_39] : memref<1x64xf32, #tpu.memory_space<vmem>>, vector<1x64xf32>
    %43 = vector.broadcast %42 : vector<1x64xf32> to vector<16x64xf32>
    %44 = arith.addf %41, %43 : vector<16x64xf32>
    %cst_40 = arith.constant 0.000000e+00 : f32
    %45 = vector.broadcast %cst_40 : f32 to vector<16x64xf32>
    %46 = arith.maximumf %44, %45 : vector<16x64xf32>
    %c0_41 = arith.constant 0 : index
    %c0_42 = arith.constant 0 : index
    %47 = vector.load %arg19[%c0_41, %c0_42] : memref<16x32xf32, #tpu.memory_space<vmem>>, vector<16x32xf32>
    tpu.vector_store %arg19[%c0_41, %c0_42], %16 {strides = array<i32>} : memref<16x32xf32, #tpu.memory_space<vmem>>, vector<16x32xf32>,
    %c0_43 = arith.constant 0 : index
    %c0_44 = arith.constant 0 : index
    %48 = vector.load %arg20[%c0_43, %c0_44] : memref<16x64xf32, #tpu.memory_space<vmem>>, vector<16x64xf32>
    tpu.vector_store %arg20[%c0_43, %c0_44], %31 {strides = array<i32>} : memref<16x64xf32, #tpu.memory_space<vmem>>, vector<16x64xf32>,
    %c0_45 = arith.constant 0 : index
    %c0_46 = arith.constant 0 : index
    %49 = vector.load %arg21[%c0_45, %c0_46] : memref<16x64xf32, #tpu.memory_space<vmem>>, vector<16x64xf32>
    tpu.vector_store %arg21[%c0_45, %c0_46], %46 {strides = array<i32>} : memref<16x64xf32, #tpu.memory_space<vmem>>, vector<16x64xf32>,
    %c0_47 = arith.constant 0 : index
    %c0_48 = arith.constant 0 : index
    %50 = vector.load %arg15[%c0_47, %c0_48] : memref<160x128xf32, #tpu.memory_space<vmem>>, vector<160x128xf32>
    %51 = vector.extract_strided_slice %50 {offsets = [0, 0], sizes = [32, 128], strides = [1, 1]} : vector<160x128xf32> to vector<32x128xf32>
    %cst_49 = arith.constant dense<0.000000e+00> : vector<16x128xf32>
    %52 = tpu.matmul %16, %51, %cst_49 {dimension_numbers = #tpu.dot_dimension_numbers<[1], [0], [0], [1], [0, 0, 1, 1], [], []>} : vector<16x32xf32>, vector<32x128xf32>, vector<16x128xf32> -> vector<16x128xf32>
    %53 = vector.extract_strided_slice %50 {offsets = [32, 0], sizes = [64, 128], strides = [1, 1]} : vector<160x128xf32> to vector<64x128xf32>
    %cst_50 = arith.constant dense<0.000000e+00> : vector<16x128xf32>
    %54 = tpu.matmul %31, %53, %cst_50 {dimension_numbers = #tpu.dot_dimension_numbers<[1], [0], [0], [1], [0, 0, 1, 1], [], []>} : vector<16x64xf32>, vector<64x128xf32>, vector<16x128xf32> -> vector<16x128xf32>
    %55 = arith.addf %52, %54 : vector<16x128xf32>
    %56 = vector.extract_strided_slice %50 {offsets = [96, 0], sizes = [64, 128], strides = [1, 1]} : vector<160x128xf32> to vector<64x128xf32>
    %cst_51 = arith.constant dense<0.000000e+00> : vector<16x128xf32>
    %57 = tpu.matmul %46, %56, %cst_51 {dimension_numbers = #tpu.dot_dimension_numbers<[1], [0], [0], [1], [0, 0, 1, 1], [], []>} : vector<16x64xf32>, vector<64x128xf32>, vector<16x128xf32> -> vector<16x128xf32>
    %58 = arith.addf %55, %57 : vector<16x128xf32>
    %c0_52 = arith.constant 0 : index
    %c0_53 = arith.constant 0 : index
    %59 = vector.load %arg16[%c0_52, %c0_53] : memref<1x128xf32, #tpu.memory_space<vmem>>, vector<1x128xf32>
    %60 = vector.broadcast %59 : vector<1x128xf32> to vector<16x128xf32>
    %61 = arith.addf %58, %60 : vector<16x128xf32>
    %cst_54 = arith.constant 0.000000e+00 : f32
    %62 = vector.broadcast %cst_54 : f32 to vector<16x128xf32>
    %63 = arith.maximumf %61, %62 : vector<16x128xf32>
    %c0_55 = arith.constant 0 : index
    %c0_56 = arith.constant 0 : index
    %64 = vector.load %arg22[%c0_55, %c0_56] : memref<16x128xf32, #tpu.memory_space<vmem>>, vector<16x128xf32>
    tpu.vector_store %arg22[%c0_55, %c0_56], %63 {strides = array<i32>} : memref<16x128xf32, #tpu.memory_space<vmem>>, vector<16x128xf32>,
    %cst_57 = arith.constant dense<0.000000e+00> : vector<128xf32>
    %65 = vector.multi_reduction <add>, %63, %cst_57 [0] : vector<16x128xf32> to vector<128xf32>
    %66 = vector.shape_cast %65 : vector<128xf32> to vector<1x128xf32>
    %cst_58 = arith.constant 1.600000e+01 : f32
    %67 = vector.broadcast %cst_58 : f32 to vector<1x128xf32>
    %68 = arith.divf %66, %67 : vector<1x128xf32>
    %c0_59 = arith.constant 0 : index
    %c0_60 = arith.constant 0 : index
    %69 = vector.load %arg23[%c0_59, %c0_60] : memref<1x128xf32, #tpu.memory_space<vmem>>, vector<1x128xf32>
    tpu.vector_store %arg23[%c0_59, %c0_60], %68 {strides = array<i32>} : memref<1x128xf32, #tpu.memory_space<vmem>>, vector<1x128xf32>,
    %c0_61 = arith.constant 0 : index
    %c0_62 = arith.constant 0 : index
    %70 = vector.load %arg17[%c0_61, %c0_62] : memref<128x512xf32, #tpu.memory_space<vmem>>, vector<128x512xf32>
    %cst_63 = arith.constant dense<0.000000e+00> : vector<1x512xf32>
    %71 = tpu.matmul %68, %70, %cst_63 {dimension_numbers = #tpu.dot_dimension_numbers<[1], [0], [0], [1], [0, 0, 1, 1], [], []>} : vector<1x128xf32>, vector<128x512xf32>, vector<1x512xf32> -> vector<1x512xf32>
    %c0_64 = arith.constant 0 : index
    %c0_65 = arith.constant 0 : index
    %72 = vector.load %arg18[%c0_64, %c0_65] : memref<1x512xf32, #tpu.memory_space<vmem>>, vector<1x512xf32>
    %73 = arith.addf %71, %72 : vector<1x512xf32>
    %cst_66 = arith.constant 0.000000e+00 : f32
    %74 = vector.broadcast %cst_66 : f32 to vector<1x512xf32>
    %75 = arith.maximumf %73, %74 : vector<1x512xf32>
    %c0_67 = arith.constant 0 : index
    %c0_68 = arith.constant 0 : index
    %76 = vector.load %arg24[%c0_67, %c0_68] : memref<1x512xf32, #tpu.memory_space<vmem>>, vector<1x512xf32>
    tpu.vector_store %arg24[%c0_67, %c0_68], %75 {strides = array<i32>} : memref<1x512xf32, #tpu.memory_space<vmem>>, vector<1x512xf32>,
    return
  }
  func.func @transform_0(%arg0: i32) -> (i32, i32) {
    %c0_i32 = arith.constant 0 : i32
    %c0_i32_0 = arith.constant 0 : i32
    %c0_i32_1 = arith.constant 0 : i32
    return %c0_i32, %c0_i32_0 : i32, i32
  }
  func.func @transform_1(%arg0: i32) -> (i32, i32) {
    %c0_i32 = arith.constant 0 : i32
    %c0_i32_0 = arith.constant 0 : i32
    %c0_i32_1 = arith.constant 0 : i32
    return %c0_i32, %c0_i32_0 : i32, i32
  }
  func.func @transform_2(%arg0: i32) -> (i32, i32) {
    %c0_i32 = arith.constant 0 : i32
    %c0_i32_0 = arith.constant 0 : i32
    %c0_i32_1 = arith.constant 0 : i32
    return %c0_i32, %c0_i32_0 : i32, i32
  }
  func.func @transform_3(%arg0: i32) -> (i32, i32) {
    %c0_i32 = arith.constant 0 : i32
    %c0_i32_0 = arith.constant 0 : i32
    %c0_i32_1 = arith.constant 0 : i32
    return %c0_i32, %c0_i32_0 : i32, i32
  }
  func.func @transform_4(%arg0: i32) -> (i32, i32) {
    %c0_i32 = arith.constant 0 : i32
    %c0_i32_0 = arith.constant 0 : i32
    %c0_i32_1 = arith.constant 0 : i32
    return %c0_i32, %c0_i32_0 : i32, i32
  }
  func.func @transform_5(%arg0: i32) -> (i32, i32) {
    %c0_i32 = arith.constant 0 : i32
    %c0_i32_0 = arith.constant 0 : i32
    %c0_i32_1 = arith.constant 0 : i32
    return %c0_i32, %c0_i32_0 : i32, i32
  }
  func.func @transform_6(%arg0: i32) -> (i32, i32) {
    %c0_i32 = arith.constant 0 : i32
    %c0_i32_0 = arith.constant 0 : i32
    %c0_i32_1 = arith.constant 0 : i32
    return %c0_i32, %c0_i32_0 : i32, i32
  }
  func.func @transform_7(%arg0: i32) -> (i32, i32) {
    %c0_i32 = arith.constant 0 : i32
    %c0_i32_0 = arith.constant 0 : i32
    %c0_i32_1 = arith.constant 0 : i32
    return %c0_i32, %c0_i32_0 : i32, i32
  }
  func.func @transform_8(%arg0: i32) -> (i32, i32) {
    %c0_i32 = arith.constant 0 : i32
    %c0_i32_0 = arith.constant 0 : i32
    %c0_i32_1 = arith.constant 0 : i32
    return %c0_i32, %c0_i32_0 : i32, i32
  }
  func.func @transform_9(%arg0: i32) -> (i32, i32) {
    %c0_i32 = arith.constant 0 : i32
    %c0_i32_0 = arith.constant 0 : i32
    %c0_i32_1 = arith.constant 0 : i32
    return %c0_i32, %c0_i32_0 : i32, i32
  }
  func.func @transform_10(%arg0: i32) -> (i32, i32) {
    %c0_i32 = arith.constant 0 : i32
    %c0_i32_0 = arith.constant 0 : i32
    %c0_i32_1 = arith.constant 0 : i32
    return %c0_i32, %c0_i32_0 : i32, i32
  }
  func.func @transform_11(%arg0: i32) -> (i32, i32) {
    %c0_i32 = arith.constant 0 : i32
    %c0_i32_0 = arith.constant 0 : i32
    %c0_i32_1 = arith.constant 0 : i32
    return %c0_i32, %c0_i32_0 : i32, i32
  }
  func.func @transform_12(%arg0: i32) -> (i32, i32) {
    %c0_i32 = arith.constant 0 : i32
    %c0_i32_0 = arith.constant 0 : i32
    %c0_i32_1 = arith.constant 0 : i32
    return %c0_i32, %c0_i32_0 : i32, i32
  }
  func.func @transform_13(%arg0: i32) -> (i32, i32) {
    %c0_i32 = arith.constant 0 : i32
    %c0_i32_0 = arith.constant 0 : i32
    %c0_i32_1 = arith.constant 0 : i32
    return %c0_i32, %c0_i32_0 : i32, i32
  }
  func.func @transform_14(%arg0: i32) -> (i32, i32) {
    %c0_i32 = arith.constant 0 : i32
    %c0_i32_0 = arith.constant 0 : i32
    %c0_i32_1 = arith.constant 0 : i32
    return %c0_i32, %c0_i32_0 : i32, i32
  }
  func.func @transform_15(%arg0: i32) -> (i32, i32) {
    %c0_i32 = arith.constant 0 : i32
    %c0_i32_0 = arith.constant 0 : i32
    %c0_i32_1 = arith.constant 0 : i32
    return %c0_i32, %c0_i32_0 : i32, i32
  }
  func.func @transform_16(%arg0: i32) -> (i32, i32) {
    %c0_i32 = arith.constant 0 : i32
    %c0_i32_0 = arith.constant 0 : i32
    %c0_i32_1 = arith.constant 0 : i32
    return %c0_i32, %c0_i32_0 : i32, i32
  }
  func.func @transform_17(%arg0: i32) -> (i32, i32) {
    %c0_i32 = arith.constant 0 : i32
    %c0_i32_0 = arith.constant 0 : i32
    %c0_i32_1 = arith.constant 0 : i32
    return %c0_i32, %c0_i32_0 : i32, i32
  }
  func.func @transform_18(%arg0: i32) -> (i32, i32) {
    %c0_i32 = arith.constant 0 : i32
    %c0_i32_0 = arith.constant 0 : i32
    %c0_i32_1 = arith.constant 0 : i32
    return %c0_i32, %c0_i32_0 : i32, i32
  }
  func.func @transform_19(%arg0: i32) -> (i32, i32) {
    %c0_i32 = arith.constant 0 : i32
    %c0_i32_0 = arith.constant 0 : i32
    %c0_i32_1 = arith.constant 0 : i32
    return %c0_i32, %c0_i32_0 : i32, i32
  }
  func.func @transform_20(%arg0: i32) -> (i32, i32) {
    %c0_i32 = arith.constant 0 : i32
    %c0_i32_0 = arith.constant 0 : i32
    %c0_i32_1 = arith.constant 0 : i32
    return %c0_i32, %c0_i32_0 : i32, i32
  }
  func.func @transform_21(%arg0: i32) -> (i32, i32) {
    %c0_i32 = arith.constant 0 : i32
    %c0_i32_0 = arith.constant 0 : i32
    %c0_i32_1 = arith.constant 0 : i32
    return %c0_i32, %c0_i32_0 : i32, i32
  }
  func.func @transform_22(%arg0: i32) -> (i32, i32) {
    %c0_i32 = arith.constant 0 : i32
    %c0_i32_0 = arith.constant 0 : i32
    %c0_i32_1 = arith.constant 0 : i32
    return %c0_i32, %c0_i32_0 : i32, i32
  }
  func.func @transform_23(%arg0: i32) -> (i32, i32) {
    %c0_i32 = arith.constant 0 : i32
    %c0_i32_0 = arith.constant 0 : i32
    %c0_i32_1 = arith.constant 0 : i32
    return %c0_i32, %c0_i32_0 : i32, i32
  }
}

</mosaic_0001>

<bundles_post_ra>
// kernel: base_cnet_forward.2
= control target key start
LH: loop header
LB: loop body
LE: loop exit
PB: predicated region body
PF: predicated region fallthrough
CT: control target
= control target key end

     0   :  { %s2598_s0 = inlined_call_operand.vmem [shape: f32[16,16], index: 0, kind: input, shape index: {}]   ;;  %s2599_s1 = inlined_call_operand.vmem [shape: f32[16,4], index: 1, kind: input, shape index: {}]   ;;  %s2600_s2 = inlined_call_operand.vmem [shape: f32[4,32], index: 2, kind: input, shape index: {}]   ;;  %s2601_s3 = inlined_call_operand.vmem [shape: f32[1,32], index: 3, kind: input, shape index: {}]   ;;  %s2602_s4 = inlined_call_operand.vmem [shape: f32[32,32], index: 4, kind: input, shape index: {}]   ;;  %s2603_s5 = inlined_call_operand.vmem [shape: f32[1,32], index: 5, kind: input, shape index: {}]   ;;  %s2604_s6 = inlined_call_operand.vmem [shape: f32[32,64], index: 6, kind: input, shape index: {}]   ;;  %s2605_s7 = inlined_call_operand.vmem [shape: f32[1,64], index: 7, kind: input, shape index: {}]   ;;  %s2606_s8 = inlined_call_operand.vmem [shape: f32[64,64], index: 8, kind: input, shape index: {}]   ;;  %s2607_s9 = inlined_call_operand.vmem [shape: f32[1,64], index: 9, kind: input, shape index: {}]   ;;  %s2608_s10 = inlined_call_operand.vmem [shape: f32[64,64], index: 10, kind: input, shape index: {}]   ;;  %s2609_s11 = inlined_call_operand.vmem [shape: f32[1,64], index: 11, kind: input, shape index: {}]   ;;  %s2610_s12 = inlined_call_operand.vmem [shape: f32[64,64], index: 12, kind: input, shape index: {}]   ;;  %s2611_s13 = inlined_call_operand.vmem [shape: f32[1,64], index: 13, kind: input, shape index: {}]   ;;  %s2612_s14 = inlined_call_operand.vmem [shape: f32[160,128], index: 14, kind: input, shape index: {}]   ;;  %s2613_s15 = inlined_call_operand.vmem [shape: f32[1,128], index: 15, kind: input, shape index: {}]   ;;  %s2614_s16 = inlined_call_operand.vmem [shape: f32[128,512], index: 16, kind: input, shape index: {}]   ;;  %s2615_s17 = inlined_call_operand.vmem [shape: f32[1,512], index: 17, kind: input, shape index: {}]   ;;  %s2616_s18 = inlined_call_operand.vmem [shape: f32[16,32], index: 18, kind: output, shape index: {0}]   ;;  %s2617_s19 = inlined_call_operand.vmem [shape: f32[16,64], index: 19, kind: output, shape index: {1}]   ;;  %s2618_s20 = inlined_call_operand.vmem [shape: f32[16,64], index: 20, kind: output, shape index: {2}]   ;;  %s2619_s21 = inlined_call_operand.hbm [shape: f32[16,128], index: 21, kind: output, shape index: {3}]   ;;  %s2620_s22 = inlined_call_operand.hbm [shape: f32[1,128], index: 22, kind: output, shape index: {4}]   ;;  %s2621_s23 = inlined_call_operand.vmem [shape: f32[1,512], index: 23, kind: output, shape index: {5}]  }
   0x1   :  { %2626 = sst [smem:[#allocation8_spill]] %s2598_s0 }
   0x2   :  { %2627 = sst [smem:[#allocation9_spill]] %s2599_s1 }
   0x3   :  { %2628 = sst [smem:[#allocation10_spill]] %s2600_s2 }
   0x4   :  { %2629 = sst [smem:[#allocation11_spill]] %s2601_s3 }
   0x5   :  { %2630 = sst [smem:[#allocation12_spill]] %s2602_s4 }
   0x6   :  { %2631 = sst [smem:[#allocation13_spill]] %s2603_s5 }
   0x7   :  { %2632 = sst [smem:[#allocation14_spill]] %s2604_s6 }
   0x8   :  { %2633 = sst [smem:[#allocation15_spill]] %s2605_s7 }
   0x9   :  { %29 = vsyncpa [#allocation3], 0  ;;  %s2634_s24 = sld [smem:[#allocation10_spill]]  ;;  %vm86_vm0 = vcmask 1043456   ;;  %s2635_s1 = sld [smem:[#allocation9_spill]]  ;;  %vm79_vm1 = vcmask 31744  }
   0xa   :  { %s2636_s7 = sld [smem:[#allocation12_spill]] }
   0xf   :  { %v71_v0 = vld [vmem:[%s2634_s24] sm:$0xf]  ;;  %v70_v2 = vld [vmem:[%s2635_s1 + $0x8] sm:$0xff] }
  0x10   :  { %v69_v1 = vld [vmem:[%s2635_s1] sm:$0xff]  ;;  %1592 = vmatprep.subr.msk.mxu1 %vm86_vm0, %v71_v0  ;;  %v168_v4 = vld [vmem:[%s2636_s7 + $0x8] sm:$0xff] }
  0x11   :  { %1594 = vmatprep.mubr.msk.f32.mxu1 %vm79_vm1, %v69_v1  ;;  %v167_v3 = vld [vmem:[%s2636_s7] sm:$0xff] }
  0x12   :  { %30 = vsyncpa [#allocation5], 0  ;;  %1593 = vmatpush3.msk.msra.mxu1 %vm86_vm0, %v71_v0  ;;  %v1746_v5 = vpack.c.bf16 %v168_v4, %v167_v3  ;;  %v169_v6 = vld [vmem:[%s2636_s7 + $0x10] sm:$0xff]  ;;  %v170_v7 = vld [vmem:[%s2636_s7 + $0x18] sm:$0xff]  ;;  %s2637_s5 = sld [smem:[#allocation11_spill]]  ;;  %vm171_vm2 = vcmask 261120  }
  0x13   :  { %1595 = vmatmul.mubr.msk.f32.vlgmr.msra.gmra.mrb[0].mxu1 %vm79_vm1, %v70_v2  ;;  %v1750_v8 = vpack.c.bf16 %v170_v7, %v169_v6  ;;  %s2638_s2 = sld [smem:[#allocation8_spill]]  ;;  %vm260_vm3 = vcmask 130048   ;;  %s2639_s7 = sld [smem:[#allocation14_spill]]  ;;  %v438_v27 = vld [vmem:[%s2606_s8] sm:$0xff]  ;;  %v439_v28 = vld [vmem:[%s2606_s8 + $0x8] sm:$0xff]  ;;  %v440_v35 = vld [vmem:[%s2606_s8 + $0x10] sm:$0xff] }
  0x14   :  { %1747 = vmatprep.subr.bf16.mxu1 %v1746_v5  ;;  %v1766_v29 = vpack.c.bf16 %v439_v28, %v438_v27  ;;  %s2640_s28 = sld [smem:[#allocation13_spill]]  ;;  %v441_v36 = vld [vmem:[%s2606_s8 + $0x18] sm:$0xff]  ;;  %v442_v40 = vld [vmem:[%s2606_s8 + $0x20] sm:$0xff]  ;;  %v443_v41 = vld [vmem:[%s2606_s8 + $0x28] sm:$0xff]  ;;  %s2641_s3 = sld [smem:[#allocation15_spill]]  ;;  %vm446_vm4 = vcmask 523264  }
  0x15   :  { %1749 = vmatpush3.bf16.msra.mxu1 %v1746_v5  ;;  %v1770_v39 = vpack.c.bf16 %v441_v36, %v440_v35  ;;  %v1774_v42 = vpack.c.bf16 %v443_v41, %v442_v40  ;;  %v444_v43 = vld [vmem:[%s2606_s8 + $0x30] sm:$0xff]  ;;  %v445_v44 = vld [vmem:[%s2606_s8 + $0x38] sm:$0xff]  ;;  %v612_v53 = vld [vmem:[%s2608_s10] sm:$0xff] }
  0x16   :  { %1751 = vmatprep.subr.bf16.mxu1 %v1750_v8  ;;  %v1778_v45 = vpack.c.bf16 %v445_v44, %v444_v43  ;;  %v613_v54 = vld [vmem:[%s2608_s10 + $0x8] sm:$0xff]  ;;  %v614_v59 = vld [vmem:[%s2608_s10 + $0x10] sm:$0xff]  ;;  %v615_v60 = vld [vmem:[%s2608_s10 + $0x18] sm:$0xff] }
  0x17   :  { %v1786_v58 = vpack.c.bf16 %v613_v54, %v612_v53  ;;  %v1790_v61 = vpack.c.bf16 %v615_v60, %v614_v59  ;;  %v616_v62 = vld [vmem:[%s2608_s10 + $0x20] sm:$0xff]  ;;  %v617_v63 = vld [vmem:[%s2608_s10 + $0x28] sm:$0xff]  ;;  %v618_v1 = vld [vmem:[%s2608_s10 + $0x30] sm:$0xff] }
  0x18   :  { %v1477_v9 = vld [vmem:[%s2637_s5] ss:$0 sm:$0xff]  ;;  %v1794_v0 = vpack.c.bf16 %v617_v63, %v616_v62  ;;  %v619_v2 = vld [vmem:[%s2608_s10 + $0x38] sm:$0xff]  ;;  %v711_v5 = vld [vmem:[%s2610_s12 + $0x8] sm:$0xff]  ;;  %s1986_s10 = smov [#allocation4]  }
  0x19   :  { %1753 = vmatpush3.bf16.msra.mxu1 %v1750_v8  ;;  %v2139_v16 = vld [vmem:[%s2638_s2] sm:$0xff]  ;;  %v345_v18 = vld [vmem:[%s2639_s7 + $0x8] sm:$0xff]  ;;  %v346_v24 = vld [vmem:[%s2639_s7 + $0x10] sm:$0xff]  ;;  %v1798_v3 = vpack.c.bf16 %v619_v2, %v618_v1  ;;  %s1455_s1 = sshll.u32 %s1986_s10, 4  ;;  %s2560_s1 = int_to_ptr.vmem [resolvable:$true] %s1455_s1 }
  0x1a   :  { %1612 = vmatprep.mubr.msk.f32.mxu0 %vm260_vm3, %v2139_v16  ;;  %v344_v17 = vld [vmem:[%s2639_s7] sm:$0xff]  ;;  %v2152_v23 = vld [vmem:[%s2638_s2 + $0x8] sm:$0xff]  ;;  %v347_v25 = vld [vmem:[%s2639_s7 + $0x18] sm:$0xff] }
  0x1b   :  { %v1758_v22 = vpack.c.bf16 %v345_v18, %v344_v17  ;;  %v1762_v26 = vpack.c.bf16 %v347_v25, %v346_v24  ;;  %v1483_v30 = vld [vmem:[%s2640_s28] ss:$0 sm:$0xff]  ;;  %v712_v6 = vld [vmem:[%s2610_s12 + $0x10] sm:$0xff]  ;;  %v713_v8 = vld [vmem:[%s2610_s12 + $0x18] sm:$0xff] }
  0x1c   :  { %v1486_v46 = vld [vmem:[%s2641_s3] ss:$0 sm:$0xff]  ;;  %v896_v40 = vld [vmem:[%s2612_s14 + $0x38] sm:$0xff]  ;;  %v898_v43 = vld [vmem:[%s2612_s14 + $0x48] sm:$0xff] }
  0x1d   :  { %v710_v4 = vld [vmem:[%s2610_s12] sm:$0xff]  ;;  %v902_v54 = vld [vmem:[%s2612_s14 + $0x68] sm:$0xff]  ;;  %v908_v62 = vld [vmem:[%s2612_s14 + $0x98] sm:$0xff] }
  0x1e   :  { %v1802_v7 = vpack.c.bf16 %v711_v5, %v710_v4  ;;  %v1494_v25 = vld [vmem:[%s2609_s11] ss:$0 sm:$0xff]  ;;  %v1174_v4 = vld [vmem:[%s2614_s16 + $0x48] sm:$0xff]  ;;  %s1985_s11 = smov [#allocation2]  }
  0x1f   :  { %v901_v53 = vld [vmem:[%s2612_s14 + $0x60] sm:$0xff]  ;;  %v1178_v5 = vld [vmem:[%s2614_s16 + $0x68] sm:$0xff]  ;;  %s1442_s5 = sshll.u32 %s1985_s11, 4  ;;  %s1443_s5 = int_to_ptr.vmem [resolvable:$true] %s1442_s5 }
  0x20   :  { %1803 = vmatprep.subr.bf16.mxu1 %v1802_v7  ;;  %v905_v59 = vld [vmem:[%s2612_s14 + $0x80] sm:$0xff]  ;;  %s1936_s26 = scalar_lea.vmem %s1443_s5, 256  ;;  %p1941_p1 = scmp.lt.s32.totalorder %s1443_s5, %s1443_s5 }
  0x21   :  { %v1165_v1 = vld [vmem:[%s2614_s16] sm:$0xff]  ;;  %p1937_p0 = scmp.ne.s32.totalorder %s1443_s5, %s1936_s26  ;;  %p1942_p2 = scmp.lt.s32.totalorder %s1936_s26, %s1936_s26 }
  0x23   :  { %p1943_p3 = por %p1942_p2, %p1941_p1 }
  0x25   :  { %p1944_p4 = pnand %p1943_p3, %p1937_p0 }
  0xe6   :  { %v1596_v10 = vpop.f32.mrb[0].mxu1 }
  0xe7   :  { %v162_v11 = vadd.f32 %v1596_v10, %v1477_v9  ;;  %v156_v12 = vpop.f32.mrb[1].mxu1  ;;  %v714_v10 = vld [vmem:[%s2610_s12 + $0x20] sm:$0xff] }
  0xe8   :  { %v157_v13 = vadd.f32 %v1477_v9, %v156_v12  ;;  %v1806_v9 = vpack.c.bf16 %v713_v8, %v712_v6  ;;  %v1173_v8 = vld [vmem:[%s2614_s16 + $0x40] sm:$0xff] }
  0xe9   :  { %v166_v15 = vmax.f32 %v162_v11, 0.0  ;;  %v715_v11 = vld [vmem:[%s2610_s12 + $0x28] sm:$0xff] }
  0xea   :  { %v165_v14 = vmax.f32 %v157_v13, 0.0  ;;  %v1810_v12 = vpack.c.bf16 %v715_v11, %v714_v10  ;;  %v1491_v13 = vld [vmem:[%s2607_s9] ss:$0 sm:$0xff]  ;;  %v1182_v10 = vld [vmem:[%s2614_s16 + $0x88] sm:$0xff] }
  0xeb   :  { %v1186_v11 = vld [vmem:[%s2614_s16 + $0xa8] sm:$0xff] }
  0xec   :  { %1605 = vmatprep.mubr.msk.f32.mxu1 %vm171_vm2, %v165_v14 }
  0xed   :  { %1606 = vmatmul.mubr.msk.f32.vlgmr.msra.gmra.mrb[2].mxu1 %vm171_vm2, %v166_v15 }
  0xee   :  { %1805 = vmatpush3.bf16.msra.mxu1 %v1802_v7  ;;  %v1866_v7 = vpack.c.bf16 %v1178_v5, %v1174_v4 }
  0xef   :  { %1807 = vmatprep.subr.bf16.mxu1 %v1806_v9 }
  0xf2   :  { %1809 = vmatpush3.bf16.msra.mxu1 %v1806_v9  ;;  %v1177_v9 = vld [vmem:[%s2614_s16 + $0x60] sm:$0xff] }
  0xf3   :  { %1811 = vmatprep.subr.bf16.mxu1 %v1810_v12 }
  0xf6   :  { %1813 = vmatpush3.bf16.msra.mxu1 %v1810_v12  ;;  %v1868_v12 = vpack.c.bf16 %v1177_v9, %v1173_v8  ;;  %v1171_v8 = vld [vmem:[%s2614_s16 + $0x30] sm:$0xff]  ;;  %v1176_v9 = vld [vmem:[%s2614_s16 + $0x58] sm:$0xff] }
 0x1c0   :  { %v1607_v19 = vpop.f32.mrb[2].mxu1 }
 0x1c1   :  { %v244_v20 = vpop.f32.mrb[3].mxu1 }
 0x1c2   :  { %v1754_v21 = vpack.c.bf16 %v1607_v19, %v244_v20 }
 0x1c4   :  { %1755 = vmatprep.subr.bf16.mxu0 %v1754_v21 }
 0x1c5   :  { %1757 = vmatpush3.bf16.msra.mxu0 %v1754_v21  ;;  %v716_v21 = vld [vmem:[%s2610_s12 + $0x30] sm:$0xff] }
 0x1c6   :  { %1759 = vmatprep.subr.bf16.mxu0 %v1758_v22 }
 0x1c8   :  { %1613 = vmatmul.mubr.msk.f32.vlgmr.msra.gmra.mrb[0].mxu0 %vm260_vm3, %v2152_v23 }
 0x1c9   :  { %1761 = vmatpush3.bf16.msra.mxu0 %v1758_v22  ;;  %v717_v22 = vld [vmem:[%s2610_s12 + $0x38] sm:$0xff] }
 0x1ca   :  { %1763 = vmatprep.subr.bf16.mxu0 %v1762_v26  ;;  %v1814_v24 = vpack.c.bf16 %v717_v22, %v716_v21 }
 0x1cc   :  { %1815 = vmatprep.subr.bf16.mxu1 %v1814_v24 }
 0x1cd   :  { %1765 = vmatpush3.bf16.msra.mxu0 %v1762_v26  ;;  %1817 = vmatpush3.bf16.msra.mxu1 %v1814_v24 }
 0x1ce   :  { %1767 = vmatprep.subr.bf16.mxu0 %v1766_v29 }
 0x29b   :  { %v1614_v31 = vpop.f32.mrb[0].mxu0 }
 0x29c   :  { %v339_v32 = vadd.f32 %v1614_v31, %v1483_v30  ;;  %v333_v33 = vpop.f32.mrb[1].mxu0  ;;  %v893_v31 = vld [vmem:[%s2612_s14 + $0x20] sm:$0xff] }
 0x29d   :  { %v334_v34 = vadd.f32 %v1483_v30, %v333_v33 }
 0x29e   :  { %v2177_v37 = vmax.f32 %v339_v32, 0.0  ;;  %v894_v32 = vld [vmem:[%s2612_s14 + $0x28] sm:$0xff] }
 0x29f   :  { %v2179_v38 = vmax.f32 %v334_v34, 0.0  ;;  %v1822_v36 = vpack.c.bf16 %v894_v32, %v893_v31  ;;  %v1198_v31 = vld [vmem:[%s2614_s16 + $0x108] sm:$0xff] }
 0x2a0   :  { %884 = vst.msk [vmem:[%s2616_s18 + $0x8] sm:$0xff] %vm171_vm2, %v2177_v37  ;;  %v1202_v32 = vld [vmem:[%s2614_s16 + $0x128] sm:$0xff] }
 0x2a1   :  { %883 = vst.msk [vmem:[%s2616_s18] sm:$0xff] %vm171_vm2, %v2179_v38  ;;  %1623 = vmatprep.mubr.msk.f32.mxu0 %vm171_vm2, %v2179_v38 }
 0x2a2   :  { %1624 = vmatmul.mubr.msk.f32.vlgmr.msra.gmra.mrb[2].mxu0 %vm171_vm2, %v2177_v37 }
 0x2a3   :  { %1769 = vmatpush3.bf16.msra.mxu0 %v1766_v29 }
 0x2a4   :  { %1771 = vmatprep.subr.bf16.mxu0 %v1770_v39 }
 0x2a7   :  { %1773 = vmatpush3.bf16.msra.mxu0 %v1770_v39  ;;  %v895_v39 = vld [vmem:[%s2612_s14 + $0x30] sm:$0xff] }
 0x2a8   :  { %1775 = vmatprep.subr.bf16.mxu0 %v1774_v42  ;;  %v1826_v41 = vpack.c.bf16 %v896_v40, %v895_v39  ;;  %v1206_v39 = vld [vmem:[%s2614_s16 + $0x148] sm:$0xff] }
 0x2a9   :  { %v1210_v40 = vld [vmem:[%s2614_s16 + $0x168] sm:$0xff] }
 0x2ab   :  { %1777 = vmatpush3.bf16.msra.mxu0 %v1774_v42  ;;  %v897_v42 = vld [vmem:[%s2612_s14 + $0x40] sm:$0xff] }
 0x2ac   :  { %1779 = vmatprep.subr.bf16.mxu0 %v1778_v45  ;;  %v1830_v44 = vpack.c.bf16 %v898_v43, %v897_v42  ;;  %v1205_v42 = vld [vmem:[%s2614_s16 + $0x140] sm:$0xff] }
 0x2ad   :  { %v1209_v43 = vld [vmem:[%s2614_s16 + $0x160] sm:$0xff] }
 0x2af   :  { %1781 = vmatpush3.bf16.msra.mxu0 %v1778_v45  ;;  %v899_v45 = vld [vmem:[%s2612_s14 + $0x50] sm:$0xff] }
 0x375   :  { %v1625_v47 = vpop.f32.mrb[2].mxu0 }
 0x376   :  { %v433_v48 = vadd.f32 %v1625_v47, %v1486_v46  ;;  %v427_v49 = vpop.f32.mrb[3].mxu0 }
 0x377   :  { %v428_v50 = vadd.f32 %v1486_v46, %v427_v49  ;;  %v900_v46 = vld [vmem:[%s2612_s14 + $0x58] sm:$0xff] }
 0x378   :  { %v437_v52 = vmax.f32 %v433_v48, 0.0  ;;  %v1834_v47 = vpack.c.bf16 %v900_v46, %v899_v45  ;;  %v890_v48 = vld [vmem:[%s2612_s14 + $0x8] sm:$0xff] }
 0x379   :  { %v436_v51 = vmax.f32 %v428_v50, 0.0  ;;  %v891_v50 = vld [vmem:[%s2612_s14 + $0x10] sm:$0xff]  ;;  %v1214_v45 = vld [vmem:[%s2614_s16 + $0x188] sm:$0xff] }
 0x37a   :  { %v1218_v46 = vld [vmem:[%s2614_s16 + $0x1a8] sm:$0xff] }
 0x37b   :  { %1642 = vmatprep.mubr.msk.f32.mxu0 %vm446_vm4, %v436_v51  ;;  %v892_v51 = vld [vmem:[%s2612_s14 + $0x18] sm:$0xff] }
 0x37c   :  { %1643 = vmatmul.mubr.msk.f32.vlgmr.msra.gmra.mrb[4].mxu0 %vm446_vm4, %v437_v52  ;;  %v1842_v52 = vpack.c.bf16 %v892_v51, %v891_v50  ;;  %v1222_v50 = vld [vmem:[%s2614_s16 + $0x1c8] sm:$0xff] }
 0x37d   :  { %1649 = vmatprep.mubr.msk.f32.mxu0 %vm260_vm3, %v2139_v16  ;;  %v1226_v51 = vld [vmem:[%s2614_s16 + $0x1e8] sm:$0xff] }
 0x44f   :  { %v1644_v55 = vpop.f32.mrb[4].mxu0 }
 0x450   :  { %v519_v56 = vpop.f32.mrb[5].mxu0 }
 0x451   :  { %v1782_v57 = vpack.c.bf16 %v1644_v55, %v519_v56  ;;  %v1846_v55 = vpack.c.bf16 %v902_v54, %v901_v53  ;;  %v903_v56 = vld [vmem:[%s2612_s14 + $0x70] sm:$0xff]  ;;  %v1221_v53 = vld [vmem:[%s2614_s16 + $0x1c0] sm:$0xff] }
 0x452   :  { %v1225_v54 = vld [vmem:[%s2614_s16 + $0x1e0] sm:$0xff] }
 0x453   :  { %1783 = vmatprep.subr.bf16.mxu0 %v1782_v57 }
 0x454   :  { %1785 = vmatpush3.bf16.msra.mxu0 %v1782_v57  ;;  %v904_v57 = vld [vmem:[%s2612_s14 + $0x78] sm:$0xff] }
 0x455   :  { %1787 = vmatprep.subr.bf16.mxu0 %v1786_v58 }
 0x457   :  { %1650 = vmatmul.mubr.msk.f32.vlgmr.msra.gmra.mrb[6].mxu0 %vm260_vm3, %v2152_v23 }
 0x458   :  { %1789 = vmatpush3.bf16.msra.mxu0 %v1786_v58  ;;  %v1850_v58 = vpack.c.bf16 %v904_v57, %v903_v56  ;;  %v1168_v56 = vld [vmem:[%s2614_s16 + $0x18] sm:$0xff] }
 0x459   :  { %1791 = vmatprep.subr.bf16.mxu0 %v1790_v61  ;;  %v1172_v57 = vld [vmem:[%s2614_s16 + $0x38] sm:$0xff] }
 0x45c   :  { %1793 = vmatpush3.bf16.msra.mxu0 %v1790_v61  ;;  %v907_v61 = vld [vmem:[%s2612_s14 + $0x90] sm:$0xff] }
 0x45d   :  { %1795 = vmatprep.subr.bf16.mxu0 %v1794_v0  ;;  %v1858_v63 = vpack.c.bf16 %v908_v62, %v907_v61 }
 0x460   :  { %1797 = vmatpush3.bf16.msra.mxu0 %v1794_v0  ;;  %v1170_v0 = vld [vmem:[%s2614_s16 + $0x28] sm:$0xff] }
 0x461   :  { %1799 = vmatprep.subr.bf16.mxu0 %v1798_v3 }
 0x464   :  { %1801 = vmatpush3.bf16.msra.mxu0 %v1798_v3  ;;  %v1169_v3 = vld [vmem:[%s2614_s16 + $0x20] sm:$0xff] }
 0x465   :  { %v1864_v6 = vpack.c.bf16 %v1169_v3, %v1165_v1 }
 0x52a   :  { %v1651_v14 = vpop.f32.mrb[6].mxu0 }
 0x52b   :  { %v607_v15 = vadd.f32 %v1651_v14, %v1491_v13  ;;  %v601_v17 = vpop.f32.mrb[7].mxu0  ;;  %v1181_v14 = vld [vmem:[%s2614_s16 + $0x80] sm:$0xff] }
 0x52c   :  { %v602_v18 = vadd.f32 %v1491_v13, %v601_v17  ;;  %v1870_v13 = vpack.c.bf16 %v1186_v11, %v1182_v10  ;;  %v1180_v10 = vld [vmem:[%s2614_s16 + $0x78] sm:$0xff] }
 0x52d   :  { %v611_v19 = vmax.f32 %v607_v15, 0.0  ;;  %v1185_v15 = vld [vmem:[%s2614_s16 + $0xa0] sm:$0xff] }
 0x52e   :  { %v610_v20 = vmax.f32 %v602_v18, 0.0  ;;  %v1872_v17 = vpack.c.bf16 %v1185_v15, %v1181_v14  ;;  %v1499_v18 = vld [vmem:[%s2611_s13] ss:$0 sm:$0xff]  ;;  %v1898_v14 = vpack.c.bf16 %v1180_v10, %v1176_v9  ;;  %v1175_v15 = vld [vmem:[%s2614_s16 + $0x50] sm:$0xff] }
 0x52f   :  { %886 = vst.msk [vmem:[%s2617_s19 + $0x8] sm:$0xff] %vm446_vm4, %v611_v19 }
 0x530   :  { %885 = vst.msk [vmem:[%s2617_s19] sm:$0xff] %vm446_vm4, %v610_v20  ;;  %1668 = vmatprep.mubr.msk.f32.mxu0 %vm446_vm4, %v610_v20 }
 0x531   :  { %1669 = vmatmul.mubr.msk.f32.vlgmr.msra.gmra.mrb[8].mxu0 %vm446_vm4, %v611_v19 }
 0x532   :  { %1694 = vmatprep.mubr.msk.f32.mxu0 %vm260_vm3, %v2139_v16 }
 0x604   :  { %v1670_v26 = vpop.f32.mrb[8].mxu0 }
 0x605   :  { %v705_v27 = vadd.f32 %v1670_v26, %v1494_v25  ;;  %v699_v28 = vpop.f32.mrb[9].mxu0  ;;  %v1190_v26 = vld [vmem:[%s2614_s16 + $0xc8] sm:$0xff] }
 0x606   :  { %v700_v29 = vadd.f32 %v1494_v25, %v699_v28 }
 0x607   :  { %v709_v30 = vmax.f32 %v705_v27, 0.0  ;;  %v1194_v27 = vld [vmem:[%s2614_s16 + $0xe8] sm:$0xff] }
 0x608   :  { %v708_v16 = vmax.f32 %v700_v29, 0.0  ;;  %v1874_v28 = vpack.c.bf16 %v1194_v27, %v1190_v26  ;;  %v1189_v29 = vld [vmem:[%s2614_s16 + $0xc0] sm:$0xff]  ;;  %v1196_v26 = vld [vmem:[%s2614_s16 + $0xf8] sm:$0xff] }
 0x60a   :  { %1687 = vmatprep.mubr.msk.f32.mxu1 %vm446_vm4, %v708_v16  ;;  %v1193_v16 = vld [vmem:[%s2614_s16 + $0xe0] sm:$0xff] }
 0x60b   :  { %1688 = vmatmul.mubr.msk.f32.vlgmr.msra.gmra.mrb[4].mxu1 %vm446_vm4, %v709_v30  ;;  %v1876_v30 = vpack.c.bf16 %v1193_v16, %v1189_v29  ;;  %v1191_v29 = vld [vmem:[%s2614_s16 + $0xd0] sm:$0xff] }
 0x60c   :  { %v1195_v16 = vld [vmem:[%s2614_s16 + $0xf0] sm:$0xff] }
 0x6de   :  { %v1689_v33 = vpop.f32.mrb[4].mxu1 }
 0x6df   :  { %v790_v34 = vpop.f32.mrb[5].mxu1 }
 0x6e0   :  { %v1818_v35 = vpack.c.bf16 %v1689_v33, %v790_v34  ;;  %v1878_v33 = vpack.c.bf16 %v1202_v32, %v1198_v31  ;;  %v1197_v34 = vld [vmem:[%s2614_s16 + $0x100] sm:$0xff]  ;;  %v1204_v31 = vld [vmem:[%s2614_s16 + $0x138] sm:$0xff]  ;;  %v1908_v32 = vpack.c.bf16 %v1195_v16, %v1191_v29 }
 0x6e2   :  { %1819 = vmatprep.subr.bf16.mxu0 %v1818_v35 }
 0x6e3   :  { %1821 = vmatpush3.bf16.msra.mxu0 %v1818_v35  ;;  %v1201_v35 = vld [vmem:[%s2614_s16 + $0x120] sm:$0xff] }
 0x6e4   :  { %1823 = vmatprep.subr.bf16.mxu0 %v1822_v36 }
 0x6e6   :  { %1695 = vmatmul.mubr.msk.f32.vlgmr.msra.gmra.mrb[10].mxu0 %vm260_vm3, %v2152_v23  ;;  %v889_v23 = vld [vmem:[%s2612_s14] sm:$0xff] }
 0x6e7   :  { %1825 = vmatpush3.bf16.msra.mxu0 %v1822_v36  ;;  %1713 = vmatprep.mubr.msk.f32.mxu0 %vm446_vm4, %v610_v20  ;;  %v1838_v49 = vpack.c.bf16 %v890_v48, %v889_v23  ;;  %v1880_v36 = vpack.c.bf16 %v1201_v35, %v1197_v34  ;;  %v1213_v23 = vld [vmem:[%s2614_s16 + $0x180] sm:$0xff]  ;;  %v1199_v34 = vld [vmem:[%s2614_s16 + $0x110] sm:$0xff] }
 0x6e8   :  { %1827 = vmatprep.subr.bf16.mxu0 %v1826_v41  ;;  %v1217_v48 = vld [vmem:[%s2614_s16 + $0x1a0] sm:$0xff]  ;;  %v1203_v35 = vld [vmem:[%s2614_s16 + $0x130] sm:$0xff] }
 0x6eb   :  { %1829 = vmatpush3.bf16.msra.mxu0 %v1826_v41  ;;  %v1882_v41 = vpack.c.bf16 %v1210_v40, %v1206_v39  ;;  %v1212_v39 = vld [vmem:[%s2614_s16 + $0x178] sm:$0xff]  ;;  %v1912_v40 = vpack.c.bf16 %v1203_v35, %v1199_v34 }
 0x6ec   :  { %1831 = vmatprep.subr.bf16.mxu0 %v1830_v44 }
 0x6ef   :  { %1833 = vmatpush3.bf16.msra.mxu0 %v1830_v44  ;;  %v1884_v44 = vpack.c.bf16 %v1209_v43, %v1205_v42  ;;  %v1207_v42 = vld [vmem:[%s2614_s16 + $0x150] sm:$0xff] }
 0x6f0   :  { %1835 = vmatprep.subr.bf16.mxu0 %v1834_v47  ;;  %v1211_v43 = vld [vmem:[%s2614_s16 + $0x170] sm:$0xff] }
 0x6f3   :  { %1837 = vmatpush3.bf16.msra.mxu0 %v1834_v47  ;;  %v1886_v47 = vpack.c.bf16 %v1218_v46, %v1214_v45  ;;  %v1220_v45 = vld [vmem:[%s2614_s16 + $0x1b8] sm:$0xff]  ;;  %v1916_v46 = vpack.c.bf16 %v1211_v43, %v1207_v42 }
 0x6f4   :  { %1839 = vmatprep.subr.bf16.mxu0 %v1838_v49 }
 0x6f6   :  { %1714 = vmatmul.mubr.msk.f32.vlgmr.msra.gmra.mrb[12].mxu0 %vm446_vm4, %v611_v19 }
 0x6f7   :  { %1841 = vmatpush3.bf16.msra.mxu0 %v1838_v49  ;;  %1724 = vmatprep.mubr.msk.f32.mxu0 %vm171_vm2, %v2179_v38  ;;  %v906_v38 = vld [vmem:[%s2612_s14 + $0x88] sm:$0xff]  ;;  %v1888_v49 = vpack.c.bf16 %v1217_v48, %v1213_v23  ;;  %v1215_v23 = vld [vmem:[%s2614_s16 + $0x190] sm:$0xff] }
 0x6f8   :  { %1843 = vmatprep.subr.bf16.mxu0 %v1842_v52  ;;  %v1854_v60 = vpack.c.bf16 %v906_v38, %v905_v59  ;;  %v1894_v59 = vpack.c.bf16 %v1172_v57, %v1168_v56  ;;  %v1508_v38 = vld [vmem:[%s2613_s15] ss:$0 sm:$0xff]  ;;  %v1219_v48 = vld [vmem:[%s2614_s16 + $0x1b0] sm:$0xff] }
 0x6fb   :  { %1845 = vmatpush3.bf16.msra.mxu0 %v1842_v52  ;;  %v1890_v52 = vpack.c.bf16 %v1226_v51, %v1222_v50  ;;  %v1228_v50 = vld [vmem:[%s2614_s16 + $0x1f8] sm:$0xff]  ;;  %v1920_v51 = vpack.c.bf16 %v1219_v48, %v1215_v23 }
 0x6fc   :  { %1847 = vmatprep.subr.bf16.mxu0 %v1846_v55 }
 0x6fe   :  { %1725 = vmatmul.mubr.msk.f32.vlgmr.msra.gmra.mrb[12].mxu0 %vm171_vm2, %v2177_v37  ;;  %v1166_v37 = vld [vmem:[%s2614_s16 + $0x8] sm:$0xff] }
 0x6ff   :  { %1849 = vmatpush3.bf16.msra.mxu0 %v1846_v55  ;;  %v1862_v2 = vpack.c.bf16 %v1170_v0, %v1166_v37  ;;  %v1892_v55 = vpack.c.bf16 %v1225_v54, %v1221_v53  ;;  %v1223_v53 = vld [vmem:[%s2614_s16 + $0x1d0] sm:$0xff] }
 0x700   :  { %1851 = vmatprep.subr.bf16.mxu0 %v1850_v58  ;;  %v1227_v54 = vld [vmem:[%s2614_s16 + $0x1f0] sm:$0xff] }
 0x701   :  { %1863 = vmatprep.subr.bf16.mxu1 %v1862_v2 }
 0x702   :  { %1865 = vmatpush1.bf16.msra.mxu1 %v1864_v6 }
 0x703   :  { %1853 = vmatpush3.bf16.msra.mxu0 %v1850_v58  ;;  %1867 = vmatprep.subr.bf16.mxu1 %v1866_v7  ;;  %v1984_v58 = vmov 0.0   ;;  %v1167_v7 = vld [vmem:[%s2614_s16 + $0x10] sm:$0xff] }
 0x704   :  { %1855 = vmatprep.subr.bf16.mxu0 %v1854_v60  ;;  %1315 = vmatprep.mubr.f32.mxu1 %v1984_v58 }
 0x706   :  { %1869 = vmatpush1.bf16.msra.mxu1 %v1868_v12  ;;  %v1896_v12 = vpack.c.bf16 %v1171_v8, %v1167_v7 }
 0x707   :  { %1857 = vmatpush3.bf16.msra.mxu0 %v1854_v60  ;;  %1871 = vmatprep.subr.bf16.mxu1 %v1870_v13 }
 0x708   :  { %1859 = vmatprep.subr.bf16.mxu0 %v1858_v63 }
 0x70a   :  { %1873 = vmatpush1.bf16.msra.mxu1 %v1872_v17  ;;  %v1179_v17 = vld [vmem:[%s2614_s16 + $0x70] sm:$0xff] }
 0x70b   :  { %1861 = vmatpush3.bf16.msra.mxu0 %v1858_v63  ;;  %1875 = vmatprep.subr.bf16.mxu1 %v1874_v28 }
 0x70e   :  { %1877 = vmatpush1.bf16.msra.mxu1 %v1876_v30  ;;  %v1200_v30 = vld [vmem:[%s2614_s16 + $0x118] sm:$0xff] }
 0x70f   :  { %1879 = vmatprep.subr.bf16.mxu1 %v1878_v33  ;;  %v1910_v33 = vpack.c.bf16 %v1204_v31, %v1200_v30 }
 0x712   :  { %1881 = vmatpush1.bf16.msra.mxu1 %v1880_v36  ;;  %v1208_v36 = vld [vmem:[%s2614_s16 + $0x158] sm:$0xff] }
 0x713   :  { %1883 = vmatprep.subr.bf16.mxu1 %v1882_v41  ;;  %v1914_v41 = vpack.c.bf16 %v1212_v39, %v1208_v36 }
 0x716   :  { %1885 = vmatpush1.bf16.msra.mxu1 %v1884_v44  ;;  %v1216_v44 = vld [vmem:[%s2614_s16 + $0x198] sm:$0xff] }
 0x717   :  { %1887 = vmatprep.subr.bf16.mxu1 %v1886_v47  ;;  %v1918_v47 = vpack.c.bf16 %v1220_v45, %v1216_v44 }
 0x71a   :  { %1889 = vmatpush1.bf16.msra.mxu1 %v1888_v49  ;;  %v1224_v49 = vld [vmem:[%s2614_s16 + $0x1d8] sm:$0xff] }
 0x71b   :  { %1891 = vmatprep.subr.bf16.mxu1 %v1890_v52  ;;  %v1922_v52 = vpack.c.bf16 %v1228_v50, %v1224_v49 }
 0x71e   :  { %1893 = vmatpush1.bf16.msra.mxu1 %v1892_v55  ;;  %v1924_v55 = vpack.c.bf16 %v1227_v54, %v1223_v53 }
 0x71f   :  { %1895 = vmatprep.subr.bf16.mxu1 %v1894_v59 }
 0x7b9   :  { %v1696_v19 = vpop.f32.mrb[10].mxu0 }
 0x7ba   :  { %v878_v20 = vadd.f32 %v1696_v19, %v1499_v18  ;;  %v872_v21 = vpop.f32.mrb[11].mxu0  ;;  %v1188_v19 = vld [vmem:[%s2614_s16 + $0xb8] sm:$0xff] }
 0x7bb   :  { %v873_v22 = vadd.f32 %v1499_v18, %v872_v21  ;;  %v1184_v18 = vld [vmem:[%s2614_s16 + $0x98] sm:$0xff] }
 0x7bc   :  { %v882_v24 = vmax.f32 %v878_v20, 0.0  ;;  %v1900_v20 = vpack.c.bf16 %v1179_v17, %v1175_v15  ;;  %v1902_v21 = vpack.c.bf16 %v1188_v19, %v1184_v18 }
 0x7bd   :  { %v881_v25 = vmax.f32 %v873_v22, 0.0  ;;  %v1183_v22 = vld [vmem:[%s2614_s16 + $0x90] sm:$0xff] }
 0x7be   :  { %888 = vst.msk [vmem:[%s2618_s20 + $0x8] sm:$0xff] %vm446_vm4, %v882_v24 }
 0x7bf   :  { %887 = vst.msk [vmem:[%s2618_s20] sm:$0xff] %vm446_vm4, %v881_v25  ;;  %1743 = vmatprep.mubr.msk.f32.mxu0 %vm446_vm4, %v881_v25  ;;  %v1192_v25 = vld [vmem:[%s2614_s16 + $0xd8] sm:$0xff] }
 0x7c0   :  { %1744 = vmatmul.mubr.msk.f32.vlgmr.msra.gmra.mrb[12].mxu0 %vm446_vm4, %v882_v24  ;;  %v1187_v24 = vld [vmem:[%s2614_s16 + $0xb0] sm:$0xff]  ;;  %v1906_v28 = vpack.c.bf16 %v1196_v26, %v1192_v25 }
 0x7c1   :  { %v1904_v27 = vpack.c.bf16 %v1187_v24, %v1183_v22 }
 0x893   :  { %v1745_v60 = vpop.f32.mrb[12].mxu0 }
 0x894   :  { %v1150_v61 = vadd.f32 %v1745_v60, %v1508_v38  ;;  %v1131_v62 = vpop.f32.mrb[13].mxu0 }
 0x895   :  { %v1149_v63 = vadd.f32 %v1508_v38, %v1131_v62 }
 0x896   :  { %v1152_v37 = vmax.f32 %v1150_v61, 0.0 }
 0x897   :  { %v1151_v0 = vmax.f32 %v1149_v63, 0.0 }
 0x898   :  { %1154 = vst [vmem:[#allocation2 + $0x8] sm:$0xff] %v1152_v37 }
 0x899   :  { %1153 = vst [vmem:[#allocation2] sm:$0xff] %v1151_v0  ;;  %v1155_v1 = vadd.f32 %v1152_v37, %v1151_v0 }
 0x89b   :  { %v1156_v2 = vrot.slane %v1155_v1, 4 }
 0x89d   :  { %v1157_v3 = vadd.f32 %v1156_v2, %v1155_v1 }
 0x89f   :  { %v1158_v4 = vrot.slane %v1157_v3, 2 }
 0x8a1   :  { %v1159_v5 = vadd.f32 %v1158_v4, %v1157_v3 }
 0x8a3   :  { %v1160_v6 = vrot.slane %v1159_v5, 1 }
 0x8a5   :  { %v1161_v11 = vadd.f32 %v1160_v6, %v1159_v5 }
 0x8a7   :  { %v1163_v13 = vmul.f32 0.0625, %v1161_v11 }
 0x8a9   :  { %1316 = vmatmul.mubr.f32.vlgmr.msra.gmra.mrb[6].mxu1 %v1163_v13  ;;  %1164 = vst [vmem:[#allocation4] sm:$0x1] %v1163_v13 }
 0x8aa   :  { %1897 = vmatpush1.bf16.msra.mxu1 %v1896_v12  ;;  %1386 = vmatprep.mubr.f32.mxu1 %v1984_v58 }
 0x8ab   :  { %1899 = vmatprep.subr.bf16.mxu1 %v1898_v14 }
 0x8ae   :  { %1901 = vmatpush1.bf16.msra.mxu1 %v1900_v20 }
 0x8af   :  { %1903 = vmatprep.subr.bf16.mxu1 %v1902_v21 }
 0x8b2   :  { %1905 = vmatpush1.bf16.msra.mxu1 %v1904_v27 }
 0x8b3   :  { %1907 = vmatprep.subr.bf16.mxu1 %v1906_v28 }
 0x8b6   :  { %1909 = vmatpush1.bf16.msra.mxu1 %v1908_v32 }
 0x8b7   :  { %1911 = vmatprep.subr.bf16.mxu1 %v1910_v33 }
 0x8ba   :  { %1913 = vmatpush1.bf16.msra.mxu1 %v1912_v40 }
 0x8bb   :  { %1915 = vmatprep.subr.bf16.mxu1 %v1914_v41 }
 0x8be   :  { %1917 = vmatpush1.bf16.msra.mxu1 %v1916_v46 }
 0x8bf   :  { %1919 = vmatprep.subr.bf16.mxu1 %v1918_v47 }
 0x8c2   :  { %1921 = vmatpush1.bf16.msra.mxu1 %v1920_v51 }
 0x8c3   :  { %1923 = vmatprep.subr.bf16.mxu1 %v1922_v52 }
 0x8c6   :  { %1925 = vmatpush1.bf16.msra.mxu1 %v1924_v55 }
 0x8c9   :  { %1387 = vmatmul.mubr.f32.vlgmr.msra.gmra.mrb[8].mxu1 %v1163_v13 }
 0x8ca   :  { %1947 = shalt.err (!%p1944_p4)
}
 0x8cb   :  { %s1948_s2 = scalar_lea.hbm %s2619_s21, 256 }
 0x8cc   :  { %p1949_p5 = scmp.ne.s32.totalorder %s2619_s21, %s1948_s2  ;;  %p1952_p6 = scmp.lt.u32.totalorder %s1948_s2, %s2619_s21 }
 0x8ce   :  { %p1954_p7 = pnand %p1952_p6, %p1949_p5 }
 0x8d0   :  { %1957 = shalt.err (!%p1954_p7)
}
 0x8d1   :  { %s1987_s7 = smov 128   ;;  %s1988_s29 = smov 8  }
 0x8d2   :  { %1448 = dma.vmem_to_hbm [thread:$0]  %s1443_s5, 256, %s2619_s21, [#allocation3], %s1987_s7, %s1987_s7, %s1988_s29  }
 0x8d3   :  { %s1958_s8 = scalar_lea.vmem %s2560_s1, 16  ;;  %s1962_s0 = scalar_lea.vmem %s2560_s1, 32 }
 0x8d4   :  { %p1959_p8 = scmp.ne.s32.totalorder %s2560_s1, %s1958_s8  ;;  %p1963_p9 = scmp.lt.s32.totalorder %s2560_s1, %s2560_s1 }
 0x8d5   :  { %p1964_p10 = scmp.lt.s32.totalorder %s1962_s0, %s1958_s8 }
 0x8d7   :  { %p1965_p11 = por %p1964_p10, %p1963_p9 }
 0x8d9   :  { %p1966_p12 = pnand %p1965_p11, %p1959_p8 }
 0x8db   :  { %1969 = shalt.err (!%p1966_p12)
}
 0x8dc   :  { %s1970_s30 = scalar_lea.hbm %s2620_s22, 16 }
 0x8dd   :  { %p1971_p13 = scmp.ne.s32.totalorder %s2620_s22, %s1970_s30  ;;  %p1974_p0 = scmp.lt.u32.totalorder %s1970_s30, %s2620_s22 }
 0x8df   :  { %p1976_p1 = pnand %p1974_p0, %p1971_p13 }
 0x8e1   :  { %1979 = shalt.err (!%p1976_p1)
}
 0x8e2   :  { %1458 = dma.vmem_to_hbm [thread:$0]  %s2560_s1, 16, %s2620_s22, [#allocation5]   ;;  %v1231_v56 = vlaneseq  ;;  %v1229_v59 = vld [vmem:[%s2615_s17] sm:$0xf]  ;;  %v1989_v6 = vmov 1966171168  }
 0x8e3   :  { %v1404_v7 = vunpack.c.l.s4 %v1989_v6 }
 0x8e4   :  { %v1232_v57 = vshrl.u32 %v1231_v56, 7  ;;  %vm1428_vm5 = vcmp.lt.s32.totalorder %v1231_v56, 512 }
 0x8e5   :  { %v1405_v10 = vunpack.c.0.s8 %v1404_v7 }
 0x8e6   :  { %v1233_v58 = vsub.s32 0, %v1232_v57  ;;  %v1237_v38 = vsub.s32 1, %v1232_v57  ;;  %v1241_v4 = vsub.s32 2, %v1232_v57  ;;  %v1245_v5 = vsub.s32 3, %v1232_v57 }
 0x8e7   :  { %v1408_v17 = vsub.s32 %v1405_v10, %v1232_v57 }
 0x8e8   :  { %v1234_v60 = vrot.slane %v1229_v59, %v1233_v58  ;;  %v1238_v61 = vrot.slane %v1229_v59, %v1237_v38  ;;  %v1242_v8 = vrot.slane %v1229_v59, %v1241_v4  ;;  %v1246_v9 = vrot.slane %v1229_v59, %v1245_v5 }
 0x97c   :  { %v1317_v62 = vpop.f32.mrb[6].mxu1 }
 0x97d   :  { %v1318_v63 = vadd.f32 %v1317_v62, %v1234_v60  ;;  %v1319_v37 = vpop.f32.mrb[7].mxu1 }
 0x97e   :  { %v1320_v0 = vadd.f32 %v1319_v37, %v1238_v61 }
 0x97f   :  { %v1393_v1 = vmax.f32 %v1318_v63, 0.0 }
 0x980   :  { %v1394_v2 = vmax.f32 %v1320_v0, 0.0 }
 0x982   :  { %v1401_v3 = vcombine.low %v1393_v1, %v1394_v2 }
 0x984   :  { %v1409_v20 = vrot.slane %v1401_v3, %v1408_v17 }
 0x99c   :  { %v1388_v11 = vpop.f32.mrb[8].mxu1 }
 0x99d   :  { %v1389_v12 = vadd.f32 %v1388_v11, %v1242_v8  ;;  %v1390_v13 = vpop.f32.mrb[9].mxu1 }
 0x99e   :  { %v1391_v14 = vadd.f32 %v1390_v13, %v1246_v9 }
 0x99f   :  { %v1395_v15 = vmax.f32 %v1389_v12, 0.0 }
 0x9a0   :  { %v1396_v18 = vmax.f32 %v1391_v14, 0.0 }
 0x9a2   :  { %v1402_v19 = vcombine.low %v1395_v15, %v1396_v18 }
 0x9a4   :  { %v1416_v21 = vrot.slane %v1402_v19, %v1408_v17 }
 0x9a6   :  { %v1417_v22 = vcombine.low %v1409_v20, %v1416_v21 }
 0x9a8   :  { %v1424_v24 = vrot.slane %v1417_v22, %v1408_v17 }
 0x9aa   :  { %1430 = vst.msk [vmem:[%s2621_s23] sm:$0xf] %vm1428_vm5, %v1424_v24 }
 0x9ab   :  { %1980 = dma.done.wait [#allocation3], 256  }
 0x9ac   :  { %1981 = vsyncadd [#allocation3], 4294967040 }
 0x9ad   :  { %1982 = dma.done.wait [#allocation5], 16  }
 0x9ae   :  { %1983 = vsyncadd [#allocation5], 4294967280 }
 0x9af   :  { %1475 = vsyncpa [#allocation3], 1 }
 0x9b0   :  { %1476 = vsyncpa [#allocation5], 1 }

// kernel: base_cnet_forward.3
= control target key start
LH: loop header
LB: loop body
LE: loop exit
PB: predicated region body
PF: predicated region fallthrough
CT: control target
= control target key end

     0   :  { %s3140_s12 = smov 0   ;;  %s3142_s13 = smov 0   ;;  %s4033_s0 = inlined_call_operand.vmem [shape: f32[1,512], index: 0, kind: input, shape index: {}]   ;;  %s4034_s1 = inlined_call_operand.vmem [shape: bf16[512,6144], index: 1, kind: input, shape index: {}]   ;;  %s4035_s2 = inlined_call_operand.vmem [shape: f32[1,6144], index: 2, kind: input, shape index: {}]   ;;  %s4036_s3 = inlined_call_operand.vmem [shape: f32[1,6144], index: 3, kind: output, shape index: {}]  }
   0x1   :  { %s3144_s14 = smov 0  }
   0x2 LB: > { %s2776_s15 = sadd.s32 4294967295, %s3117_s14   ;;  %s3157_s16 = sadd.s32 1, %s3117_s14   ;;  %s3117_s14 = sphi %s3144_s14, %s4039_s14   ;;  %s3113_s13 = sphi %s3142_s13, %s4038_s13   ;;  %s3109_s12 = sphi %s3140_s12, %s4037_s12  }
   0x3   : > { %s38_s17 = ssub.s32 %s3117_s14, %s3157_s16  ;;  %s41_s18 = sadd.s32 1, %s3113_s13 }
   0x4   : > { %p39_p0 = scmp.eq.s32.totalorder %s38_s17, 0  ;;  %p48_p1 = scmp.ne.s32.totalorder %s3113_s13, %s3109_s12 }
   0x5   : > { %p49_p2 = scmp.eq.s32.totalorder %s3117_s14, 0  ;;  %p2779_p4 = scmp.ge.s32.totalorder %s3117_s14, 6 }
   0x6   : > { %s3166_s19 = scalar_select %p39_p0, %s3113_s13, %s41_s18  }
   0x7   : > { %p50_p3 = por %p49_p2, %p48_p1  ;;  %129 = sbr.rel (%p2779_p4) target bundleno = 146 (0x92), region = 20 }
   0xe   : > { %132 = sbr.rel (!%p50_p3) target bundleno = 146 (0x92), region = 24  ;;  %s134_s20 = sand.u32 (%p50_p3), 1, %s3113_s13  }
   0xf   : > { %s3045_s21 = sshll.u32 (%p50_p3), %s3117_s14, 5  ;;  %s2780_s22 = sshll.u32 (%p50_p3), %s134_s20, 11 }
  0x10   : > { %s3174_s25 = scalar_lea.vmem (%p50_p3), %s4034_s1, %s3045_s21  ;;  %s3179_s26 = scalar_lea.vmem (%p50_p3), [#allocation2], %s2780_s22 }
  0x11   : > { %v152_v0 = vld [vmem:[%s3174_s25] sm:$0xff] (%p50_p3)  ;;  %v154_v1 = vld [vmem:[%s3174_s25 + $0x8] sm:$0xff] (%p50_p3)  ;;  %v156_v2 = vld [vmem:[%s3174_s25 + $0x10] sm:$0xff] (%p50_p3) }
  0x12   : > { %153 = vst [vmem:[%s3179_s26] sm:$0xff] (%p50_p3), %v152_v0  ;;  %155 = vst [vmem:[%s3179_s26 + $0x8] sm:$0xff] (%p50_p3), %v154_v1  ;;  %v158_v3 = vld [vmem:[%s3174_s25 + $0x18] sm:$0xff] (%p50_p3)  ;;  %v160_v4 = vld [vmem:[%s3174_s25 + $0xc0] sm:$0xff] (%p50_p3) }
  0x13   : > { %157 = vst [vmem:[%s3179_s26 + $0x10] sm:$0xff] (%p50_p3), %v156_v2  ;;  %v162_v5 = vld [vmem:[%s3174_s25 + $0xc8] sm:$0xff] (%p50_p3)  ;;  %159 = vst [vmem:[%s3179_s26 + $0x18] sm:$0xff] (%p50_p3), %v158_v3  ;;  %v164_v6 = vld [vmem:[%s3174_s25 + $0xd0] sm:$0xff] (%p50_p3) }
  0x14   : > { %161 = vst [vmem:[%s3179_s26 + $0x20] sm:$0xff] (%p50_p3), %v160_v4  ;;  %163 = vst [vmem:[%s3179_s26 + $0x28] sm:$0xff] (%p50_p3), %v162_v5  ;;  %v166_v7 = vld [vmem:[%s3174_s25 + $0xd8] sm:$0xff] (%p50_p3)  ;;  %v168_v8 = vld [vmem:[%s3174_s25 + $0x180] sm:$0xff] (%p50_p3) }
  0x15   : > { %165 = vst [vmem:[%s3179_s26 + $0x30] sm:$0xff] %v164_v6  ;;  %167 = vst [vmem:[%s3179_s26 + $0x38] sm:$0xff] %v166_v7  ;;  %v170_v9 = vld [vmem:[%s3174_s25 + $0x188] sm:$0xff]  ;;  %v172_v10 = vld [vmem:[%s3174_s25 + $0x190] sm:$0xff] }
  0x16   : > { %169 = vst [vmem:[%s3179_s26 + $0x40] sm:$0xff] %v168_v8  ;;  %v174_v11 = vld [vmem:[%s3174_s25 + $0x198] sm:$0xff]  ;;  %171 = vst [vmem:[%s3179_s26 + $0x48] sm:$0xff] %v170_v9  ;;  %v176_v12 = vld [vmem:[%s3174_s25 + $0x240] sm:$0xff] }
  0x17   : > { %173 = vst [vmem:[%s3179_s26 + $0x50] sm:$0xff] %v172_v10  ;;  %175 = vst [vmem:[%s3179_s26 + $0x58] sm:$0xff] %v174_v11  ;;  %v178_v13 = vld [vmem:[%s3174_s25 + $0x248] sm:$0xff]  ;;  %v180_v14 = vld [vmem:[%s3174_s25 + $0x250] sm:$0xff] }
  0x18   : > { %177 = vst [vmem:[%s3179_s26 + $0x60] sm:$0xff] %v176_v12  ;;  %179 = vst [vmem:[%s3179_s26 + $0x68] sm:$0xff] %v178_v13  ;;  %v182_v15 = vld [vmem:[%s3174_s25 + $0x258] sm:$0xff]  ;;  %v184_v16 = vld [vmem:[%s3174_s25 + $0x300] sm:$0xff] }
  0x19   : > { %181 = vst [vmem:[%s3179_s26 + $0x70] sm:$0xff] %v180_v14  ;;  %v186_v17 = vld [vmem:[%s3174_s25 + $0x308] sm:$0xff]  ;;  %183 = vst [vmem:[%s3179_s26 + $0x78] sm:$0xff] %v182_v15  ;;  %v188_v18 = vld [vmem:[%s3174_s25 + $0x310] sm:$0xff] }
  0x1a   : > { %185 = vst [vmem:[%s3179_s26 + $0x80] sm:$0xff] %v184_v16  ;;  %187 = vst [vmem:[%s3179_s26 + $0x88] sm:$0xff] %v186_v17  ;;  %v190_v19 = vld [vmem:[%s3174_s25 + $0x318] sm:$0xff]  ;;  %v192_v20 = vld [vmem:[%s3174_s25 + $0x3c0] sm:$0xff] }
  0x1b   : > { %189 = vst [vmem:[%s3179_s26 + $0x90] sm:$0xff] %v188_v18  ;;  %191 = vst [vmem:[%s3179_s26 + $0x98] sm:$0xff] %v190_v19  ;;  %v194_v21 = vld [vmem:[%s3174_s25 + $0x3c8] sm:$0xff]  ;;  %v196_v22 = vld [vmem:[%s3174_s25 + $0x3d0] sm:$0xff] }
  0x1c   : > { %193 = vst [vmem:[%s3179_s26 + $0xa0] sm:$0xff] %v192_v20  ;;  %v198_v23 = vld [vmem:[%s3174_s25 + $0x3d8] sm:$0xff]  ;;  %195 = vst [vmem:[%s3179_s26 + $0xa8] sm:$0xff] %v194_v21  ;;  %v200_v24 = vld [vmem:[%s3174_s25 + $0x480] sm:$0xff] }
  0x1d   : > { %197 = vst [vmem:[%s3179_s26 + $0xb0] sm:$0xff] %v196_v22  ;;  %199 = vst [vmem:[%s3179_s26 + $0xb8] sm:$0xff] %v198_v23  ;;  %v202_v25 = vld [vmem:[%s3174_s25 + $0x488] sm:$0xff]  ;;  %v204_v26 = vld [vmem:[%s3174_s25 + $0x490] sm:$0xff] }
  0x1e   : > { %201 = vst [vmem:[%s3179_s26 + $0xc0] sm:$0xff] %v200_v24  ;;  %203 = vst [vmem:[%s3179_s26 + $0xc8] sm:$0xff] %v202_v25  ;;  %v206_v27 = vld [vmem:[%s3174_s25 + $0x498] sm:$0xff]  ;;  %v208_v28 = vld [vmem:[%s3174_s25 + $0x540] sm:$0xff] }
  0x1f   : > { %205 = vst [vmem:[%s3179_s26 + $0xd0] sm:$0xff] %v204_v26  ;;  %v210_v29 = vld [vmem:[%s3174_s25 + $0x548] sm:$0xff]  ;;  %207 = vst [vmem:[%s3179_s26 + $0xd8] sm:$0xff] %v206_v27  ;;  %v212_v30 = vld [vmem:[%s3174_s25 + $0x550] sm:$0xff] }
  0x20   : > { %209 = vst [vmem:[%s3179_s26 + $0xe0] sm:$0xff] %v208_v28  ;;  %211 = vst [vmem:[%s3179_s26 + $0xe8] sm:$0xff] %v210_v29  ;;  %v214_v31 = vld [vmem:[%s3174_s25 + $0x558] sm:$0xff]  ;;  %v216_v32 = vld [vmem:[%s3174_s25 + $0x600] sm:$0xff] }
  0x21   : > { %213 = vst [vmem:[%s3179_s26 + $0xf0] sm:$0xff] %v212_v30  ;;  %215 = vst [vmem:[%s3179_s26 + $0xf8] sm:$0xff] %v214_v31  ;;  %v218_v33 = vld [vmem:[%s3174_s25 + $0x608] sm:$0xff]  ;;  %v220_v34 = vld [vmem:[%s3174_s25 + $0x610] sm:$0xff] }
  0x22   : > { %217 = vst [vmem:[%s3179_s26 + $0x100] sm:$0xff] %v216_v32  ;;  %v222_v35 = vld [vmem:[%s3174_s25 + $0x618] sm:$0xff]  ;;  %219 = vst [vmem:[%s3179_s26 + $0x108] sm:$0xff] %v218_v33  ;;  %v224_v36 = vld [vmem:[%s3174_s25 + $0x6c0] sm:$0xff] }
  0x23   : > { %221 = vst [vmem:[%s3179_s26 + $0x110] sm:$0xff] %v220_v34  ;;  %223 = vst [vmem:[%s3179_s26 + $0x118] sm:$0xff] %v222_v35  ;;  %v226_v37 = vld [vmem:[%s3174_s25 + $0x6c8] sm:$0xff]  ;;  %v228_v38 = vld [vmem:[%s3174_s25 + $0x6d0] sm:$0xff] }
  0x24   : > { %225 = vst [vmem:[%s3179_s26 + $0x120] sm:$0xff] %v224_v36  ;;  %227 = vst [vmem:[%s3179_s26 + $0x128] sm:$0xff] %v226_v37  ;;  %v230_v39 = vld [vmem:[%s3174_s25 + $0x6d8] sm:$0xff]  ;;  %v232_v40 = vld [vmem:[%s3174_s25 + $0x780] sm:$0xff] }
  0x25   : > { %229 = vst [vmem:[%s3179_s26 + $0x130] sm:$0xff] %v228_v38  ;;  %v234_v41 = vld [vmem:[%s3174_s25 + $0x788] sm:$0xff]  ;;  %231 = vst [vmem:[%s3179_s26 + $0x138] sm:$0xff] %v230_v39  ;;  %v236_v42 = vld [vmem:[%s3174_s25 + $0x790] sm:$0xff] }
  0x26   : > { %233 = vst [vmem:[%s3179_s26 + $0x140] sm:$0xff] %v232_v40  ;;  %235 = vst [vmem:[%s3179_s26 + $0x148] sm:$0xff] %v234_v41  ;;  %v238_v43 = vld [vmem:[%s3174_s25 + $0x798] sm:$0xff]  ;;  %v240_v44 = vld [vmem:[%s3174_s25 + $0x840] sm:$0xff] }
  0x27   : > { %237 = vst [vmem:[%s3179_s26 + $0x150] sm:$0xff] %v236_v42  ;;  %239 = vst [vmem:[%s3179_s26 + $0x158] sm:$0xff] %v238_v43  ;;  %v242_v45 = vld [vmem:[%s3174_s25 + $0x848] sm:$0xff]  ;;  %v244_v46 = vld [vmem:[%s3174_s25 + $0x850] sm:$0xff] }
  0x28   : > { %241 = vst [vmem:[%s3179_s26 + $0x160] sm:$0xff] %v240_v44  ;;  %v246_v47 = vld [vmem:[%s3174_s25 + $0x858] sm:$0xff]  ;;  %243 = vst [vmem:[%s3179_s26 + $0x168] sm:$0xff] %v242_v45  ;;  %v248_v48 = vld [vmem:[%s3174_s25 + $0x900] sm:$0xff] }
  0x29   : > { %245 = vst [vmem:[%s3179_s26 + $0x170] sm:$0xff] %v244_v46  ;;  %247 = vst [vmem:[%s3179_s26 + $0x178] sm:$0xff] %v246_v47  ;;  %v250_v49 = vld [vmem:[%s3174_s25 + $0x908] sm:$0xff]  ;;  %v252_v50 = vld [vmem:[%s3174_s25 + $0x910] sm:$0xff] }
  0x2a   : > { %249 = vst [vmem:[%s3179_s26 + $0x180] sm:$0xff] %v248_v48  ;;  %251 = vst [vmem:[%s3179_s26 + $0x188] sm:$0xff] %v250_v49  ;;  %v254_v51 = vld [vmem:[%s3174_s25 + $0x918] sm:$0xff]  ;;  %v256_v52 = vld [vmem:[%s3174_s25 + $0x9c0] sm:$0xff] }
  0x2b   : > { %253 = vst [vmem:[%s3179_s26 + $0x190] sm:$0xff] %v252_v50  ;;  %v258_v53 = vld [vmem:[%s3174_s25 + $0x9c8] sm:$0xff]  ;;  %255 = vst [vmem:[%s3179_s26 + $0x198] sm:$0xff] %v254_v51  ;;  %v260_v54 = vld [vmem:[%s3174_s25 + $0x9d0] sm:$0xff] }
  0x2c   : > { %257 = vst [vmem:[%s3179_s26 + $0x1a0] sm:$0xff] %v256_v52  ;;  %259 = vst [vmem:[%s3179_s26 + $0x1a8] sm:$0xff] %v258_v53  ;;  %v262_v55 = vld [vmem:[%s3174_s25 + $0x9d8] sm:$0xff]  ;;  %v264_v56 = vld [vmem:[%s3174_s25 + $0xa80] sm:$0xff] }
  0x2d   : > { %261 = vst [vmem:[%s3179_s26 + $0x1b0] sm:$0xff] %v260_v54  ;;  %263 = vst [vmem:[%s3179_s26 + $0x1b8] sm:$0xff] %v262_v55  ;;  %v266_v57 = vld [vmem:[%s3174_s25 + $0xa88] sm:$0xff]  ;;  %v268_v58 = vld [vmem:[%s3174_s25 + $0xa90] sm:$0xff] }
  0x2e   : > { %265 = vst [vmem:[%s3179_s26 + $0x1c0] sm:$0xff] %v264_v56  ;;  %v270_v59 = vld [vmem:[%s3174_s25 + $0xa98] sm:$0xff]  ;;  %267 = vst [vmem:[%s3179_s26 + $0x1c8] sm:$0xff] %v266_v57  ;;  %v272_v60 = vld [vmem:[%s3174_s25 + $0xb40] sm:$0xff] }
  0x2f   : > { %269 = vst [vmem:[%s3179_s26 + $0x1d0] sm:$0xff] %v268_v58  ;;  %271 = vst [vmem:[%s3179_s26 + $0x1d8] sm:$0xff] %v270_v59  ;;  %v274_v61 = vld [vmem:[%s3174_s25 + $0xb48] sm:$0xff]  ;;  %v276_v62 = vld [vmem:[%s3174_s25 + $0xb50] sm:$0xff] }
  0x30   : > { %273 = vst [vmem:[%s3179_s26 + $0x1e0] sm:$0xff] %v272_v60  ;;  %275 = vst [vmem:[%s3179_s26 + $0x1e8] sm:$0xff] %v274_v61  ;;  %v278_v63 = vld [vmem:[%s3174_s25 + $0xb58] sm:$0xff]  ;;  %v280_v0 = vld [vmem:[%s3174_s25 + $0xc00] sm:$0xff] }
  0x31   : > { %277 = vst [vmem:[%s3179_s26 + $0x1f0] sm:$0xff] %v276_v62  ;;  %v282_v1 = vld [vmem:[%s3174_s25 + $0xc08] sm:$0xff]  ;;  %279 = vst [vmem:[%s3179_s26 + $0x1f8] sm:$0xff] %v278_v63  ;;  %v284_v2 = vld [vmem:[%s3174_s25 + $0xc10] sm:$0xff] }
  0x32   : > { %281 = vst [vmem:[%s3179_s26 + $0x200] sm:$0xff] %v280_v0  ;;  %283 = vst [vmem:[%s3179_s26 + $0x208] sm:$0xff] %v282_v1  ;;  %v286_v3 = vld [vmem:[%s3174_s25 + $0xc18] sm:$0xff]  ;;  %v288_v4 = vld [vmem:[%s3174_s25 + $0xcc0] sm:$0xff] }
  0x33   : > { %285 = vst [vmem:[%s3179_s26 + $0x210] sm:$0xff] %v284_v2  ;;  %287 = vst [vmem:[%s3179_s26 + $0x218] sm:$0xff] %v286_v3  ;;  %v290_v5 = vld [vmem:[%s3174_s25 + $0xcc8] sm:$0xff]  ;;  %v292_v6 = vld [vmem:[%s3174_s25 + $0xcd0] sm:$0xff] }
  0x34   : > { %289 = vst [vmem:[%s3179_s26 + $0x220] sm:$0xff] %v288_v4  ;;  %v294_v7 = vld [vmem:[%s3174_s25 + $0xcd8] sm:$0xff]  ;;  %291 = vst [vmem:[%s3179_s26 + $0x228] sm:$0xff] %v290_v5  ;;  %v296_v8 = vld [vmem:[%s3174_s25 + $0xd80] sm:$0xff] }
  0x35   : > { %293 = vst [vmem:[%s3179_s26 + $0x230] sm:$0xff] %v292_v6  ;;  %295 = vst [vmem:[%s3179_s26 + $0x238] sm:$0xff] %v294_v7  ;;  %v298_v9 = vld [vmem:[%s3174_s25 + $0xd88] sm:$0xff]  ;;  %v300_v10 = vld [vmem:[%s3174_s25 + $0xd90] sm:$0xff] }
  0x36   : > { %297 = vst [vmem:[%s3179_s26 + $0x240] sm:$0xff] %v296_v8  ;;  %299 = vst [vmem:[%s3179_s26 + $0x248] sm:$0xff] %v298_v9  ;;  %v302_v11 = vld [vmem:[%s3174_s25 + $0xd98] sm:$0xff]  ;;  %v304_v12 = vld [vmem:[%s3174_s25 + $0xe40] sm:$0xff] }
  0x37   : > { %301 = vst [vmem:[%s3179_s26 + $0x250] sm:$0xff] %v300_v10  ;;  %v306_v13 = vld [vmem:[%s3174_s25 + $0xe48] sm:$0xff]  ;;  %303 = vst [vmem:[%s3179_s26 + $0x258] sm:$0xff] %v302_v11  ;;  %v308_v14 = vld [vmem:[%s3174_s25 + $0xe50] sm:$0xff] }
  0x38   : > { %305 = vst [vmem:[%s3179_s26 + $0x260] sm:$0xff] %v304_v12  ;;  %307 = vst [vmem:[%s3179_s26 + $0x268] sm:$0xff] %v306_v13  ;;  %v310_v15 = vld [vmem:[%s3174_s25 + $0xe58] sm:$0xff]  ;;  %v312_v16 = vld [vmem:[%s3174_s25 + $0xf00] sm:$0xff] }
  0x39   : > { %309 = vst [vmem:[%s3179_s26 + $0x270] sm:$0xff] %v308_v14  ;;  %311 = vst [vmem:[%s3179_s26 + $0x278] sm:$0xff] %v310_v15  ;;  %v314_v17 = vld [vmem:[%s3174_s25 + $0xf08] sm:$0xff]  ;;  %v316_v18 = vld [vmem:[%s3174_s25 + $0xf10] sm:$0xff] }
  0x3a   : > { %313 = vst [vmem:[%s3179_s26 + $0x280] sm:$0xff] %v312_v16  ;;  %v318_v19 = vld [vmem:[%s3174_s25 + $0xf18] sm:$0xff]  ;;  %315 = vst [vmem:[%s3179_s26 + $0x288] sm:$0xff] %v314_v17  ;;  %v320_v20 = vld [vmem:[%s3174_s25 + $0xfc0] sm:$0xff] }
  0x3b   : > { %317 = vst [vmem:[%s3179_s26 + $0x290] sm:$0xff] %v316_v18  ;;  %319 = vst [vmem:[%s3179_s26 + $0x298] sm:$0xff] %v318_v19  ;;  %v322_v21 = vld [vmem:[%s3174_s25 + $0xfc8] sm:$0xff]  ;;  %v324_v22 = vld [vmem:[%s3174_s25 + $0xfd0] sm:$0xff] }
  0x3c   : > { %321 = vst [vmem:[%s3179_s26 + $0x2a0] sm:$0xff] %v320_v20  ;;  %323 = vst [vmem:[%s3179_s26 + $0x2a8] sm:$0xff] %v322_v21  ;;  %v326_v23 = vld [vmem:[%s3174_s25 + $0xfd8] sm:$0xff]  ;;  %v328_v24 = vld [vmem:[%s3174_s25 + $0x1080] sm:$0xff] }
  0x3d   : > { %325 = vst [vmem:[%s3179_s26 + $0x2b0] sm:$0xff] %v324_v22  ;;  %v330_v25 = vld [vmem:[%s3174_s25 + $0x1088] sm:$0xff]  ;;  %327 = vst [vmem:[%s3179_s26 + $0x2b8] sm:$0xff] %v326_v23  ;;  %v332_v26 = vld [vmem:[%s3174_s25 + $0x1090] sm:$0xff] }
  0x3e   : > { %329 = vst [vmem:[%s3179_s26 + $0x2c0] sm:$0xff] %v328_v24  ;;  %331 = vst [vmem:[%s3179_s26 + $0x2c8] sm:$0xff] %v330_v25  ;;  %v334_v27 = vld [vmem:[%s3174_s25 + $0x1098] sm:$0xff]  ;;  %v336_v28 = vld [vmem:[%s3174_s25 + $0x1140] sm:$0xff] }
  0x3f   : > { %333 = vst [vmem:[%s3179_s26 + $0x2d0] sm:$0xff] %v332_v26  ;;  %335 = vst [vmem:[%s3179_s26 + $0x2d8] sm:$0xff] %v334_v27  ;;  %v338_v29 = vld [vmem:[%s3174_s25 + $0x1148] sm:$0xff]  ;;  %v340_v30 = vld [vmem:[%s3174_s25 + $0x1150] sm:$0xff] }
  0x40   : > { %337 = vst [vmem:[%s3179_s26 + $0x2e0] sm:$0xff] %v336_v28  ;;  %v342_v31 = vld [vmem:[%s3174_s25 + $0x1158] sm:$0xff]  ;;  %339 = vst [vmem:[%s3179_s26 + $0x2e8] sm:$0xff] %v338_v29  ;;  %v344_v32 = vld [vmem:[%s3174_s25 + $0x1200] sm:$0xff] }
  0x41   : > { %341 = vst [vmem:[%s3179_s26 + $0x2f0] sm:$0xff] %v340_v30  ;;  %343 = vst [vmem:[%s3179_s26 + $0x2f8] sm:$0xff] %v342_v31  ;;  %v346_v33 = vld [vmem:[%s3174_s25 + $0x1208] sm:$0xff]  ;;  %v348_v34 = vld [vmem:[%s3174_s25 + $0x1210] sm:$0xff] }
  0x42   : > { %345 = vst [vmem:[%s3179_s26 + $0x300] sm:$0xff] %v344_v32  ;;  %347 = vst [vmem:[%s3179_s26 + $0x308] sm:$0xff] %v346_v33  ;;  %v350_v35 = vld [vmem:[%s3174_s25 + $0x1218] sm:$0xff]  ;;  %v352_v36 = vld [vmem:[%s3174_s25 + $0x12c0] sm:$0xff] }
  0x43   : > { %349 = vst [vmem:[%s3179_s26 + $0x310] sm:$0xff] %v348_v34  ;;  %v354_v37 = vld [vmem:[%s3174_s25 + $0x12c8] sm:$0xff]  ;;  %351 = vst [vmem:[%s3179_s26 + $0x318] sm:$0xff] %v350_v35  ;;  %v356_v38 = vld [vmem:[%s3174_s25 + $0x12d0] sm:$0xff] }
  0x44   : > { %353 = vst [vmem:[%s3179_s26 + $0x320] sm:$0xff] %v352_v36  ;;  %355 = vst [vmem:[%s3179_s26 + $0x328] sm:$0xff] %v354_v37  ;;  %v358_v39 = vld [vmem:[%s3174_s25 + $0x12d8] sm:$0xff]  ;;  %v360_v40 = vld [vmem:[%s3174_s25 + $0x1380] sm:$0xff] }
  0x45   : > { %357 = vst [vmem:[%s3179_s26 + $0x330] sm:$0xff] %v356_v38  ;;  %359 = vst [vmem:[%s3179_s26 + $0x338] sm:$0xff] %v358_v39  ;;  %v362_v41 = vld [vmem:[%s3174_s25 + $0x1388] sm:$0xff]  ;;  %v364_v42 = vld [vmem:[%s3174_s25 + $0x1390] sm:$0xff] }
  0x46   : > { %361 = vst [vmem:[%s3179_s26 + $0x340] sm:$0xff] %v360_v40  ;;  %v366_v43 = vld [vmem:[%s3174_s25 + $0x1398] sm:$0xff]  ;;  %363 = vst [vmem:[%s3179_s26 + $0x348] sm:$0xff] %v362_v41  ;;  %v368_v44 = vld [vmem:[%s3174_s25 + $0x1440] sm:$0xff] }
  0x47   : > { %365 = vst [vmem:[%s3179_s26 + $0x350] sm:$0xff] %v364_v42  ;;  %367 = vst [vmem:[%s3179_s26 + $0x358] sm:$0xff] %v366_v43  ;;  %v370_v45 = vld [vmem:[%s3174_s25 + $0x1448] sm:$0xff]  ;;  %v372_v46 = vld [vmem:[%s3174_s25 + $0x1450] sm:$0xff] }
  0x48   : > { %369 = vst [vmem:[%s3179_s26 + $0x360] sm:$0xff] %v368_v44  ;;  %371 = vst [vmem:[%s3179_s26 + $0x368] sm:$0xff] %v370_v45  ;;  %v374_v47 = vld [vmem:[%s3174_s25 + $0x1458] sm:$0xff]  ;;  %v376_v48 = vld [vmem:[%s3174_s25 + $0x1500] sm:$0xff] }
  0x49   : > { %373 = vst [vmem:[%s3179_s26 + $0x370] sm:$0xff] %v372_v46  ;;  %v378_v49 = vld [vmem:[%s3174_s25 + $0x1508] sm:$0xff]  ;;  %375 = vst [vmem:[%s3179_s26 + $0x378] sm:$0xff] %v374_v47  ;;  %v380_v50 = vld [vmem:[%s3174_s25 + $0x1510] sm:$0xff] }
  0x4a   : > { %377 = vst [vmem:[%s3179_s26 + $0x380] sm:$0xff] %v376_v48  ;;  %379 = vst [vmem:[%s3179_s26 + $0x388] sm:$0xff] %v378_v49  ;;  %v382_v51 = vld [vmem:[%s3174_s25 + $0x1518] sm:$0xff]  ;;  %v384_v52 = vld [vmem:[%s3174_s25 + $0x15c0] sm:$0xff] }
  0x4b   : > { %381 = vst [vmem:[%s3179_s26 + $0x390] sm:$0xff] %v380_v50  ;;  %383 = vst [vmem:[%s3179_s26 + $0x398] sm:$0xff] %v382_v51  ;;  %v386_v53 = vld [vmem:[%s3174_s25 + $0x15c8] sm:$0xff]  ;;  %v388_v54 = vld [vmem:[%s3174_s25 + $0x15d0] sm:$0xff] }
  0x4c   : > { %385 = vst [vmem:[%s3179_s26 + $0x3a0] sm:$0xff] %v384_v52  ;;  %v390_v55 = vld [vmem:[%s3174_s25 + $0x15d8] sm:$0xff]  ;;  %387 = vst [vmem:[%s3179_s26 + $0x3a8] sm:$0xff] %v386_v53  ;;  %v392_v56 = vld [vmem:[%s3174_s25 + $0x1680] sm:$0xff] }
  0x4d   : > { %389 = vst [vmem:[%s3179_s26 + $0x3b0] sm:$0xff] %v388_v54  ;;  %391 = vst [vmem:[%s3179_s26 + $0x3b8] sm:$0xff] %v390_v55  ;;  %v394_v57 = vld [vmem:[%s3174_s25 + $0x1688] sm:$0xff]  ;;  %v396_v58 = vld [vmem:[%s3174_s25 + $0x1690] sm:$0xff] }
  0x4e   : > { %393 = vst [vmem:[%s3179_s26 + $0x3c0] sm:$0xff] %v392_v56  ;;  %395 = vst [vmem:[%s3179_s26 + $0x3c8] sm:$0xff] %v394_v57  ;;  %v398_v59 = vld [vmem:[%s3174_s25 + $0x1698] sm:$0xff]  ;;  %v400_v60 = vld [vmem:[%s3174_s25 + $0x1740] sm:$0xff] }
  0x4f   : > { %397 = vst [vmem:[%s3179_s26 + $0x3d0] sm:$0xff] %v396_v58  ;;  %v402_v61 = vld [vmem:[%s3174_s25 + $0x1748] sm:$0xff]  ;;  %399 = vst [vmem:[%s3179_s26 + $0x3d8] sm:$0xff] %v398_v59  ;;  %v404_v62 = vld [vmem:[%s3174_s25 + $0x1750] sm:$0xff] }
  0x50   : > { %401 = vst [vmem:[%s3179_s26 + $0x3e0] sm:$0xff] %v400_v60  ;;  %403 = vst [vmem:[%s3179_s26 + $0x3e8] sm:$0xff] %v402_v61  ;;  %v406_v63 = vld [vmem:[%s3174_s25 + $0x1758] sm:$0xff]  ;;  %v408_v0 = vld [vmem:[%s3174_s25 + $0x1800] sm:$0xff] }
  0x51   : > { %405 = vst [vmem:[%s3179_s26 + $0x3f0] sm:$0xff] %v404_v62  ;;  %407 = vst [vmem:[%s3179_s26 + $0x3f8] sm:$0xff] %v406_v63  ;;  %v410_v1 = vld [vmem:[%s3174_s25 + $0x1808] sm:$0xff]  ;;  %v412_v2 = vld [vmem:[%s3174_s25 + $0x1810] sm:$0xff] }
  0x52   : > { %409 = vst [vmem:[%s3179_s26 + $0x400] sm:$0xff] %v408_v0  ;;  %v414_v3 = vld [vmem:[%s3174_s25 + $0x1818] sm:$0xff]  ;;  %411 = vst [vmem:[%s3179_s26 + $0x408] sm:$0xff] %v410_v1  ;;  %v416_v4 = vld [vmem:[%s3174_s25 + $0x18c0] sm:$0xff] }
  0x53   : > { %413 = vst [vmem:[%s3179_s26 + $0x410] sm:$0xff] %v412_v2  ;;  %415 = vst [vmem:[%s3179_s26 + $0x418] sm:$0xff] %v414_v3  ;;  %v418_v5 = vld [vmem:[%s3174_s25 + $0x18c8] sm:$0xff]  ;;  %v420_v6 = vld [vmem:[%s3174_s25 + $0x18d0] sm:$0xff] }
  0x54   : > { %417 = vst [vmem:[%s3179_s26 + $0x420] sm:$0xff] %v416_v4  ;;  %419 = vst [vmem:[%s3179_s26 + $0x428] sm:$0xff] %v418_v5  ;;  %v422_v7 = vld [vmem:[%s3174_s25 + $0x18d8] sm:$0xff]  ;;  %v424_v8 = vld [vmem:[%s3174_s25 + $0x1980] sm:$0xff] }
  0x55   : > { %421 = vst [vmem:[%s3179_s26 + $0x430] sm:$0xff] %v420_v6  ;;  %v426_v9 = vld [vmem:[%s3174_s25 + $0x1988] sm:$0xff]  ;;  %423 = vst [vmem:[%s3179_s26 + $0x438] sm:$0xff] %v422_v7  ;;  %v428_v10 = vld [vmem:[%s3174_s25 + $0x1990] sm:$0xff] }
  0x56   : > { %425 = vst [vmem:[%s3179_s26 + $0x440] sm:$0xff] %v424_v8  ;;  %427 = vst [vmem:[%s3179_s26 + $0x448] sm:$0xff] %v426_v9  ;;  %v430_v11 = vld [vmem:[%s3174_s25 + $0x1998] sm:$0xff]  ;;  %v432_v12 = vld [vmem:[%s3174_s25 + $0x1a40] sm:$0xff] }
  0x57   : > { %429 = vst [vmem:[%s3179_s26 + $0x450] sm:$0xff] %v428_v10  ;;  %431 = vst [vmem:[%s3179_s26 + $0x458] sm:$0xff] %v430_v11  ;;  %v434_v13 = vld [vmem:[%s3174_s25 + $0x1a48] sm:$0xff]  ;;  %v436_v14 = vld [vmem:[%s3174_s25 + $0x1a50] sm:$0xff] }
  0x58   : > { %433 = vst [vmem:[%s3179_s26 + $0x460] sm:$0xff] %v432_v12  ;;  %v438_v15 = vld [vmem:[%s3174_s25 + $0x1a58] sm:$0xff]  ;;  %435 = vst [vmem:[%s3179_s26 + $0x468] sm:$0xff] %v434_v13  ;;  %v440_v16 = vld [vmem:[%s3174_s25 + $0x1b00] sm:$0xff] }
  0x59   : > { %437 = vst [vmem:[%s3179_s26 + $0x470] sm:$0xff] %v436_v14  ;;  %439 = vst [vmem:[%s3179_s26 + $0x478] sm:$0xff] %v438_v15  ;;  %v442_v17 = vld [vmem:[%s3174_s25 + $0x1b08] sm:$0xff]  ;;  %v444_v18 = vld [vmem:[%s3174_s25 + $0x1b10] sm:$0xff] }
  0x5a   : > { %441 = vst [vmem:[%s3179_s26 + $0x480] sm:$0xff] %v440_v16  ;;  %443 = vst [vmem:[%s3179_s26 + $0x488] sm:$0xff] %v442_v17  ;;  %v446_v19 = vld [vmem:[%s3174_s25 + $0x1b18] sm:$0xff]  ;;  %v448_v20 = vld [vmem:[%s3174_s25 + $0x1bc0] sm:$0xff] }
  0x5b   : > { %445 = vst [vmem:[%s3179_s26 + $0x490] sm:$0xff] %v444_v18  ;;  %v450_v21 = vld [vmem:[%s3174_s25 + $0x1bc8] sm:$0xff]  ;;  %447 = vst [vmem:[%s3179_s26 + $0x498] sm:$0xff] %v446_v19  ;;  %v452_v22 = vld [vmem:[%s3174_s25 + $0x1bd0] sm:$0xff] }
  0x5c   : > { %449 = vst [vmem:[%s3179_s26 + $0x4a0] sm:$0xff] %v448_v20  ;;  %451 = vst [vmem:[%s3179_s26 + $0x4a8] sm:$0xff] %v450_v21  ;;  %v454_v23 = vld [vmem:[%s3174_s25 + $0x1bd8] sm:$0xff]  ;;  %v456_v24 = vld [vmem:[%s3174_s25 + $0x1c80] sm:$0xff] }
  0x5d   : > { %453 = vst [vmem:[%s3179_s26 + $0x4b0] sm:$0xff] %v452_v22  ;;  %455 = vst [vmem:[%s3179_s26 + $0x4b8] sm:$0xff] %v454_v23  ;;  %v458_v25 = vld [vmem:[%s3174_s25 + $0x1c88] sm:$0xff]  ;;  %v460_v26 = vld [vmem:[%s3174_s25 + $0x1c90] sm:$0xff] }
  0x5e   : > { %457 = vst [vmem:[%s3179_s26 + $0x4c0] sm:$0xff] %v456_v24  ;;  %v462_v27 = vld [vmem:[%s3174_s25 + $0x1c98] sm:$0xff]  ;;  %459 = vst [vmem:[%s3179_s26 + $0x4c8] sm:$0xff] %v458_v25  ;;  %v464_v28 = vld [vmem:[%s3174_s25 + $0x1d40] sm:$0xff] }
  0x5f   : > { %461 = vst [vmem:[%s3179_s26 + $0x4d0] sm:$0xff] %v460_v26  ;;  %463 = vst [vmem:[%s3179_s26 + $0x4d8] sm:$0xff] %v462_v27  ;;  %v466_v29 = vld [vmem:[%s3174_s25 + $0x1d48] sm:$0xff]  ;;  %v468_v30 = vld [vmem:[%s3174_s25 + $0x1d50] sm:$0xff] }
  0x60   : > { %465 = vst [vmem:[%s3179_s26 + $0x4e0] sm:$0xff] %v464_v28  ;;  %467 = vst [vmem:[%s3179_s26 + $0x4e8] sm:$0xff] %v466_v29  ;;  %v470_v31 = vld [vmem:[%s3174_s25 + $0x1d58] sm:$0xff]  ;;  %v472_v32 = vld [vmem:[%s3174_s25 + $0x1e00] sm:$0xff] }
  0x61   : > { %469 = vst [vmem:[%s3179_s26 + $0x4f0] sm:$0xff] %v468_v30  ;;  %v474_v33 = vld [vmem:[%s3174_s25 + $0x1e08] sm:$0xff]  ;;  %471 = vst [vmem:[%s3179_s26 + $0x4f8] sm:$0xff] %v470_v31  ;;  %v476_v34 = vld [vmem:[%s3174_s25 + $0x1e10] sm:$0xff] }
  0x62   : > { %473 = vst [vmem:[%s3179_s26 + $0x500] sm:$0xff] %v472_v32  ;;  %475 = vst [vmem:[%s3179_s26 + $0x508] sm:$0xff] %v474_v33  ;;  %v478_v35 = vld [vmem:[%s3174_s25 + $0x1e18] sm:$0xff]  ;;  %v480_v36 = vld [vmem:[%s3174_s25 + $0x1ec0] sm:$0xff] }
  0x63   : > { %477 = vst [vmem:[%s3179_s26 + $0x510] sm:$0xff] %v476_v34  ;;  %479 = vst [vmem:[%s3179_s26 + $0x518] sm:$0xff] %v478_v35  ;;  %v482_v37 = vld [vmem:[%s3174_s25 + $0x1ec8] sm:$0xff]  ;;  %v484_v38 = vld [vmem:[%s3174_s25 + $0x1ed0] sm:$0xff] }
  0x64   : > { %481 = vst [vmem:[%s3179_s26 + $0x520] sm:$0xff] %v480_v36  ;;  %v486_v39 = vld [vmem:[%s3174_s25 + $0x1ed8] sm:$0xff]  ;;  %483 = vst [vmem:[%s3179_s26 + $0x528] sm:$0xff] %v482_v37  ;;  %v488_v40 = vld [vmem:[%s3174_s25 + $0x1f80] sm:$0xff] }
  0x65   : > { %485 = vst [vmem:[%s3179_s26 + $0x530] sm:$0xff] %v484_v38  ;;  %487 = vst [vmem:[%s3179_s26 + $0x538] sm:$0xff] %v486_v39  ;;  %v490_v41 = vld [vmem:[%s3174_s25 + $0x1f88] sm:$0xff]  ;;  %v492_v42 = vld [vmem:[%s3174_s25 + $0x1f90] sm:$0xff] }
  0x66   : > { %489 = vst [vmem:[%s3179_s26 + $0x540] sm:$0xff] %v488_v40  ;;  %491 = vst [vmem:[%s3179_s26 + $0x548] sm:$0xff] %v490_v41  ;;  %v494_v43 = vld [vmem:[%s3174_s25 + $0x1f98] sm:$0xff]  ;;  %v496_v44 = vld [vmem:[%s3174_s25 + $0x2040] sm:$0xff] }
  0x67   : > { %493 = vst [vmem:[%s3179_s26 + $0x550] sm:$0xff] %v492_v42  ;;  %v498_v45 = vld [vmem:[%s3174_s25 + $0x2048] sm:$0xff]  ;;  %495 = vst [vmem:[%s3179_s26 + $0x558] sm:$0xff] %v494_v43  ;;  %v500_v46 = vld [vmem:[%s3174_s25 + $0x2050] sm:$0xff] }
  0x68   : > { %497 = vst [vmem:[%s3179_s26 + $0x560] sm:$0xff] %v496_v44  ;;  %499 = vst [vmem:[%s3179_s26 + $0x568] sm:$0xff] %v498_v45  ;;  %v502_v47 = vld [vmem:[%s3174_s25 + $0x2058] sm:$0xff]  ;;  %v504_v48 = vld [vmem:[%s3174_s25 + $0x2100] sm:$0xff] }
  0x69   : > { %501 = vst [vmem:[%s3179_s26 + $0x570] sm:$0xff] %v500_v46  ;;  %503 = vst [vmem:[%s3179_s26 + $0x578] sm:$0xff] %v502_v47  ;;  %v506_v49 = vld [vmem:[%s3174_s25 + $0x2108] sm:$0xff]  ;;  %v508_v50 = vld [vmem:[%s3174_s25 + $0x2110] sm:$0xff] }
  0x6a   : > { %505 = vst [vmem:[%s3179_s26 + $0x580] sm:$0xff] %v504_v48  ;;  %v510_v51 = vld [vmem:[%s3174_s25 + $0x2118] sm:$0xff]  ;;  %507 = vst [vmem:[%s3179_s26 + $0x588] sm:$0xff] %v506_v49  ;;  %v512_v52 = vld [vmem:[%s3174_s25 + $0x21c0] sm:$0xff] }
  0x6b   : > { %509 = vst [vmem:[%s3179_s26 + $0x590] sm:$0xff] %v508_v50  ;;  %511 = vst [vmem:[%s3179_s26 + $0x598] sm:$0xff] %v510_v51  ;;  %v514_v53 = vld [vmem:[%s3174_s25 + $0x21c8] sm:$0xff]  ;;  %v516_v54 = vld [vmem:[%s3174_s25 + $0x21d0] sm:$0xff] }
  0x6c   : > { %513 = vst [vmem:[%s3179_s26 + $0x5a0] sm:$0xff] %v512_v52  ;;  %515 = vst [vmem:[%s3179_s26 + $0x5a8] sm:$0xff] %v514_v53  ;;  %v518_v55 = vld [vmem:[%s3174_s25 + $0x21d8] sm:$0xff]  ;;  %v520_v56 = vld [vmem:[%s3174_s25 + $0x2280] sm:$0xff] }
  0x6d   : > { %517 = vst [vmem:[%s3179_s26 + $0x5b0] sm:$0xff] %v516_v54  ;;  %v522_v57 = vld [vmem:[%s3174_s25 + $0x2288] sm:$0xff]  ;;  %519 = vst [vmem:[%s3179_s26 + $0x5b8] sm:$0xff] %v518_v55  ;;  %v524_v58 = vld [vmem:[%s3174_s25 + $0x2290] sm:$0xff] }
  0x6e   : > { %521 = vst [vmem:[%s3179_s26 + $0x5c0] sm:$0xff] %v520_v56  ;;  %523 = vst [vmem:[%s3179_s26 + $0x5c8] sm:$0xff] %v522_v57  ;;  %v526_v59 = vld [vmem:[%s3174_s25 + $0x2298] sm:$0xff]  ;;  %v528_v60 = vld [vmem:[%s3174_s25 + $0x2340] sm:$0xff] }
  0x6f   : > { %525 = vst [vmem:[%s3179_s26 + $0x5d0] sm:$0xff] %v524_v58  ;;  %527 = vst [vmem:[%s3179_s26 + $0x5d8] sm:$0xff] %v526_v59  ;;  %v530_v61 = vld [vmem:[%s3174_s25 + $0x2348] sm:$0xff]  ;;  %v532_v62 = vld [vmem:[%s3174_s25 + $0x2350] sm:$0xff] }
  0x70   : > { %529 = vst [vmem:[%s3179_s26 + $0x5e0] sm:$0xff] %v528_v60  ;;  %v534_v63 = vld [vmem:[%s3174_s25 + $0x2358] sm:$0xff]  ;;  %531 = vst [vmem:[%s3179_s26 + $0x5e8] sm:$0xff] %v530_v61  ;;  %v536_v0 = vld [vmem:[%s3174_s25 + $0x2400] sm:$0xff] }
  0x71   : > { %533 = vst [vmem:[%s3179_s26 + $0x5f0] sm:$0xff] %v532_v62  ;;  %535 = vst [vmem:[%s3179_s26 + $0x5f8] sm:$0xff] %v534_v63  ;;  %v538_v1 = vld [vmem:[%s3174_s25 + $0x2408] sm:$0xff]  ;;  %v540_v2 = vld [vmem:[%s3174_s25 + $0x2410] sm:$0xff] }
  0x72   : > { %537 = vst [vmem:[%s3179_s26 + $0x600] sm:$0xff] %v536_v0  ;;  %539 = vst [vmem:[%s3179_s26 + $0x608] sm:$0xff] %v538_v1  ;;  %v542_v3 = vld [vmem:[%s3174_s25 + $0x2418] sm:$0xff]  ;;  %v544_v4 = vld [vmem:[%s3174_s25 + $0x24c0] sm:$0xff] }
  0x73   : > { %541 = vst [vmem:[%s3179_s26 + $0x610] sm:$0xff] %v540_v2  ;;  %v546_v5 = vld [vmem:[%s3174_s25 + $0x24c8] sm:$0xff]  ;;  %543 = vst [vmem:[%s3179_s26 + $0x618] sm:$0xff] %v542_v3  ;;  %v548_v6 = vld [vmem:[%s3174_s25 + $0x24d0] sm:$0xff] }
  0x74   : > { %545 = vst [vmem:[%s3179_s26 + $0x620] sm:$0xff] %v544_v4  ;;  %547 = vst [vmem:[%s3179_s26 + $0x628] sm:$0xff] %v546_v5  ;;  %v550_v7 = vld [vmem:[%s3174_s25 + $0x24d8] sm:$0xff]  ;;  %v552_v8 = vld [vmem:[%s3174_s25 + $0x2580] sm:$0xff] }
  0x75   : > { %549 = vst [vmem:[%s3179_s26 + $0x630] sm:$0xff] %v548_v6  ;;  %551 = vst [vmem:[%s3179_s26 + $0x638] sm:$0xff] %v550_v7  ;;  %v554_v9 = vld [vmem:[%s3174_s25 + $0x2588] sm:$0xff]  ;;  %v556_v10 = vld [vmem:[%s3174_s25 + $0x2590] sm:$0xff] }
  0x76   : > { %553 = vst [vmem:[%s3179_s26 + $0x640] sm:$0xff] %v552_v8  ;;  %v558_v11 = vld [vmem:[%s3174_s25 + $0x2598] sm:$0xff]  ;;  %555 = vst [vmem:[%s3179_s26 + $0x648] sm:$0xff] %v554_v9  ;;  %v560_v12 = vld [vmem:[%s3174_s25 + $0x2640] sm:$0xff] }
  0x77   : > { %557 = vst [vmem:[%s3179_s26 + $0x650] sm:$0xff] %v556_v10  ;;  %559 = vst [vmem:[%s3179_s26 + $0x658] sm:$0xff] %v558_v11  ;;  %v562_v13 = vld [vmem:[%s3174_s25 + $0x2648] sm:$0xff]  ;;  %v564_v14 = vld [vmem:[%s3174_s25 + $0x2650] sm:$0xff] }
  0x78   : > { %561 = vst [vmem:[%s3179_s26 + $0x660] sm:$0xff] %v560_v12  ;;  %563 = vst [vmem:[%s3179_s26 + $0x668] sm:$0xff] %v562_v13  ;;  %v566_v15 = vld [vmem:[%s3174_s25 + $0x2658] sm:$0xff]  ;;  %v568_v16 = vld [vmem:[%s3174_s25 + $0x2700] sm:$0xff] }
  0x79   : > { %565 = vst [vmem:[%s3179_s26 + $0x670] sm:$0xff] %v564_v14  ;;  %v570_v17 = vld [vmem:[%s3174_s25 + $0x2708] sm:$0xff]  ;;  %567 = vst [vmem:[%s3179_s26 + $0x678] sm:$0xff] %v566_v15  ;;  %v572_v18 = vld [vmem:[%s3174_s25 + $0x2710] sm:$0xff] }
  0x7a   : > { %569 = vst [vmem:[%s3179_s26 + $0x680] sm:$0xff] %v568_v16  ;;  %571 = vst [vmem:[%s3179_s26 + $0x688] sm:$0xff] %v570_v17  ;;  %v574_v19 = vld [vmem:[%s3174_s25 + $0x2718] sm:$0xff]  ;;  %v576_v20 = vld [vmem:[%s3174_s25 + $0x27c0] sm:$0xff] }
  0x7b   : > { %573 = vst [vmem:[%s3179_s26 + $0x690] sm:$0xff] %v572_v18  ;;  %575 = vst [vmem:[%s3179_s26 + $0x698] sm:$0xff] %v574_v19  ;;  %v578_v21 = vld [vmem:[%s3174_s25 + $0x27c8] sm:$0xff]  ;;  %v580_v22 = vld [vmem:[%s3174_s25 + $0x27d0] sm:$0xff] }
  0x7c   : > { %577 = vst [vmem:[%s3179_s26 + $0x6a0] sm:$0xff] %v576_v20  ;;  %v582_v23 = vld [vmem:[%s3174_s25 + $0x27d8] sm:$0xff]  ;;  %579 = vst [vmem:[%s3179_s26 + $0x6a8] sm:$0xff] %v578_v21  ;;  %v584_v24 = vld [vmem:[%s3174_s25 + $0x2880] sm:$0xff] }
  0x7d   : > { %581 = vst [vmem:[%s3179_s26 + $0x6b0] sm:$0xff] %v580_v22  ;;  %583 = vst [vmem:[%s3179_s26 + $0x6b8] sm:$0xff] %v582_v23  ;;  %v586_v25 = vld [vmem:[%s3174_s25 + $0x2888] sm:$0xff]  ;;  %v588_v26 = vld [vmem:[%s3174_s25 + $0x2890] sm:$0xff] }
  0x7e   : > { %585 = vst [vmem:[%s3179_s26 + $0x6c0] sm:$0xff] %v584_v24  ;;  %587 = vst [vmem:[%s3179_s26 + $0x6c8] sm:$0xff] %v586_v25  ;;  %v590_v27 = vld [vmem:[%s3174_s25 + $0x2898] sm:$0xff]  ;;  %v592_v28 = vld [vmem:[%s3174_s25 + $0x2940] sm:$0xff] }
  0x7f   : > { %589 = vst [vmem:[%s3179_s26 + $0x6d0] sm:$0xff] %v588_v26  ;;  %v594_v29 = vld [vmem:[%s3174_s25 + $0x2948] sm:$0xff]  ;;  %591 = vst [vmem:[%s3179_s26 + $0x6d8] sm:$0xff] %v590_v27  ;;  %v596_v30 = vld [vmem:[%s3174_s25 + $0x2950] sm:$0xff] }
  0x80   : > { %593 = vst [vmem:[%s3179_s26 + $0x6e0] sm:$0xff] %v592_v28  ;;  %595 = vst [vmem:[%s3179_s26 + $0x6e8] sm:$0xff] %v594_v29  ;;  %v598_v31 = vld [vmem:[%s3174_s25 + $0x2958] sm:$0xff]  ;;  %v600_v32 = vld [vmem:[%s3174_s25 + $0x2a00] sm:$0xff] }
  0x81   : > { %597 = vst [vmem:[%s3179_s26 + $0x6f0] sm:$0xff] %v596_v30  ;;  %599 = vst [vmem:[%s3179_s26 + $0x6f8] sm:$0xff] %v598_v31  ;;  %v602_v33 = vld [vmem:[%s3174_s25 + $0x2a08] sm:$0xff]  ;;  %v604_v34 = vld [vmem:[%s3174_s25 + $0x2a10] sm:$0xff] }
  0x82   : > { %601 = vst [vmem:[%s3179_s26 + $0x700] sm:$0xff] %v600_v32  ;;  %v606_v35 = vld [vmem:[%s3174_s25 + $0x2a18] sm:$0xff]  ;;  %603 = vst [vmem:[%s3179_s26 + $0x708] sm:$0xff] %v602_v33  ;;  %v608_v36 = vld [vmem:[%s3174_s25 + $0x2ac0] sm:$0xff] }
  0x83   : > { %605 = vst [vmem:[%s3179_s26 + $0x710] sm:$0xff] %v604_v34  ;;  %607 = vst [vmem:[%s3179_s26 + $0x718] sm:$0xff] %v606_v35  ;;  %v610_v37 = vld [vmem:[%s3174_s25 + $0x2ac8] sm:$0xff]  ;;  %v612_v38 = vld [vmem:[%s3174_s25 + $0x2ad0] sm:$0xff] }
  0x84   : > { %609 = vst [vmem:[%s3179_s26 + $0x720] sm:$0xff] %v608_v36  ;;  %611 = vst [vmem:[%s3179_s26 + $0x728] sm:$0xff] %v610_v37  ;;  %v614_v39 = vld [vmem:[%s3174_s25 + $0x2ad8] sm:$0xff]  ;;  %v616_v40 = vld [vmem:[%s3174_s25 + $0x2b80] sm:$0xff] }
  0x85   : > { %613 = vst [vmem:[%s3179_s26 + $0x730] sm:$0xff] %v612_v38  ;;  %v618_v41 = vld [vmem:[%s3174_s25 + $0x2b88] sm:$0xff]  ;;  %615 = vst [vmem:[%s3179_s26 + $0x738] sm:$0xff] %v614_v39  ;;  %v620_v42 = vld [vmem:[%s3174_s25 + $0x2b90] sm:$0xff] }
  0x86   : > { %617 = vst [vmem:[%s3179_s26 + $0x740] sm:$0xff] %v616_v40  ;;  %619 = vst [vmem:[%s3179_s26 + $0x748] sm:$0xff] %v618_v41  ;;  %v622_v43 = vld [vmem:[%s3174_s25 + $0x2b98] sm:$0xff]  ;;  %v624_v44 = vld [vmem:[%s3174_s25 + $0x2c40] sm:$0xff] }
  0x87   : > { %621 = vst [vmem:[%s3179_s26 + $0x750] sm:$0xff] %v620_v42  ;;  %623 = vst [vmem:[%s3179_s26 + $0x758] sm:$0xff] %v622_v43  ;;  %v626_v45 = vld [vmem:[%s3174_s25 + $0x2c48] sm:$0xff]  ;;  %v628_v46 = vld [vmem:[%s3174_s25 + $0x2c50] sm:$0xff] }
  0x88   : > { %625 = vst [vmem:[%s3179_s26 + $0x760] sm:$0xff] %v624_v44  ;;  %v630_v47 = vld [vmem:[%s3174_s25 + $0x2c58] sm:$0xff]  ;;  %627 = vst [vmem:[%s3179_s26 + $0x768] sm:$0xff] %v626_v45  ;;  %v632_v48 = vld [vmem:[%s3174_s25 + $0x2d00] sm:$0xff] }
  0x89   : > { %629 = vst [vmem:[%s3179_s26 + $0x770] sm:$0xff] %v628_v46  ;;  %631 = vst [vmem:[%s3179_s26 + $0x778] sm:$0xff] %v630_v47  ;;  %v634_v49 = vld [vmem:[%s3174_s25 + $0x2d08] sm:$0xff]  ;;  %v636_v50 = vld [vmem:[%s3174_s25 + $0x2d10] sm:$0xff] }
  0x8a   : > { %633 = vst [vmem:[%s3179_s26 + $0x780] sm:$0xff] %v632_v48  ;;  %635 = vst [vmem:[%s3179_s26 + $0x788] sm:$0xff] %v634_v49  ;;  %v638_v51 = vld [vmem:[%s3174_s25 + $0x2d18] sm:$0xff]  ;;  %v640_v52 = vld [vmem:[%s3174_s25 + $0x2dc0] sm:$0xff] }
  0x8b   : > { %637 = vst [vmem:[%s3179_s26 + $0x790] sm:$0xff] %v636_v50  ;;  %v642_v53 = vld [vmem:[%s3174_s25 + $0x2dc8] sm:$0xff]  ;;  %639 = vst [vmem:[%s3179_s26 + $0x798] sm:$0xff] %v638_v51  ;;  %v644_v54 = vld [vmem:[%s3174_s25 + $0x2dd0] sm:$0xff] }
  0x8c   : > { %641 = vst [vmem:[%s3179_s26 + $0x7a0] sm:$0xff] %v640_v52  ;;  %643 = vst [vmem:[%s3179_s26 + $0x7a8] sm:$0xff] %v642_v53  ;;  %v646_v55 = vld [vmem:[%s3174_s25 + $0x2dd8] sm:$0xff]  ;;  %v648_v56 = vld [vmem:[%s3174_s25 + $0x2e80] sm:$0xff] }
  0x8d   : > { %645 = vst [vmem:[%s3179_s26 + $0x7b0] sm:$0xff] %v644_v54  ;;  %647 = vst [vmem:[%s3179_s26 + $0x7b8] sm:$0xff] %v646_v55  ;;  %v650_v57 = vld [vmem:[%s3174_s25 + $0x2e88] sm:$0xff]  ;;  %v652_v58 = vld [vmem:[%s3174_s25 + $0x2e90] sm:$0xff] }
  0x8e   : > { %649 = vst [vmem:[%s3179_s26 + $0x7c0] sm:$0xff] %v648_v56  ;;  %v654_v59 = vld [vmem:[%s3174_s25 + $0x2e98] sm:$0xff]  ;;  %651 = vst [vmem:[%s3179_s26 + $0x7c8] sm:$0xff] %v650_v57  ;;  %v656_v60 = vld [vmem:[%s3174_s25 + $0x2f40] sm:$0xff] }
  0x8f   : > { %653 = vst [vmem:[%s3179_s26 + $0x7d0] sm:$0xff] %v652_v58  ;;  %655 = vst [vmem:[%s3179_s26 + $0x7d8] sm:$0xff] %v654_v59  ;;  %v658_v61 = vld [vmem:[%s3174_s25 + $0x2f48] sm:$0xff]  ;;  %v660_v62 = vld [vmem:[%s3174_s25 + $0x2f50] sm:$0xff] }
  0x90   : > { %657 = vst [vmem:[%s3179_s26 + $0x7e0] sm:$0xff] %v656_v60  ;;  %659 = vst [vmem:[%s3179_s26 + $0x7e8] sm:$0xff] %v658_v61  ;;  %v662_v63 = vld [vmem:[%s3174_s25 + $0x2f58] sm:$0xff] }
  0x91   : > { %661 = vst [vmem:[%s3179_s26 + $0x7f0] sm:$0xff] %v660_v62  ;;  %663 = vst [vmem:[%s3179_s26 + $0x7f8] sm:$0xff] %v662_v63 }
  0x92 PF: > { %p2783_p5 = scmp.ge.s32.totalorder %s3117_s14, 1  ;;  %p676_p6 = scmp.lt.s32.totalorder %s3117_s14, 7 }
  0x94   : > { %p677_p7 = pnand %p2783_p5, %p676_p6 }
  0x95   : > { %s683_s27 = sand.u32 (!%p677_p7), 1, %s3109_s12   ;;  %v722_v0 = vlaneseq (!%p677_p7)  ;;  %v3696_v1 = vld [vmem:[%s4033_s0] sm:$0xf] (!%p677_p7)  ;;  %s2785_s5 = sshll.u32 (!%p677_p7), %s2776_s15, 3 }
  0x96   : > { %680 = sbr.rel (%p677_p7) target bundleno = 638 (0x27e), region = 51  ;;  %s2784_s28 = sshll.u32 (!%p677_p7), %s683_s27, 11 }
  0x97   : > { %v3698_v2 = vshrl.u32 (!%p677_p7), %v722_v0, 7  ;;  %s3700_s4 = scalar_lea.vmem (!%p677_p7), [#allocation2], %s2784_s28  ;;  %p711_p8 = scmp.lt.s32.totalorder (!%p677_p7), %s2785_s5, 47 }
  0x98   : > { %v746_v3 = vld [vmem:[%s3700_s4] sm:$0xff] (!%p677_p7)  ;;  %v747_v5 = vld [vmem:[%s3700_s4 + $0x8] sm:$0xff] (!%p677_p7) }
  0x99   : > { %v750_v4 = vld [vmem:[%s3700_s4 + $0x20] sm:$0xff] (!%p677_p7)  ;;  %v751_v7 = vld [vmem:[%s3700_s4 + $0x28] sm:$0xff] (!%p677_p7)  ;;  %v728_v11 = vsub.s32 (!%p677_p7), 1, %v3698_v2 }
  0x9a   : > { %v2788_v6 = vcombine.high (!%p677_p7), %v746_v3, %v750_v4  ;;  %v2787_v8 = vcombine.low (!%p677_p7), %v746_v3, %v750_v4  ;;  %v754_v9 = vld [vmem:[%s3700_s4 + $0x40] sm:$0xff] (!%p677_p7)  ;;  %v2790_v12 = vcombine.high (!%p677_p7), %v747_v5, %v751_v7  ;;  %v2789_v13 = vcombine.low (!%p677_p7), %v747_v5, %v751_v7  ;;  %v755_v15 = vld [vmem:[%s3700_s4 + $0x48] sm:$0xff] (!%p677_p7) }
  0x9b   : > { %v758_v10 = vld [vmem:[%s3700_s4 + $0x60] sm:$0xff] (!%p677_p7)  ;;  %v759_v16 = vld [vmem:[%s3700_s4 + $0x68] sm:$0xff] (!%p677_p7)  ;;  %v729_v22 = vrot.slane (!%p677_p7), %v3696_v1, %v728_v11 }
  0x9c   : > { %v2796_v14 = vcombine.high (!%p677_p7), %v754_v9, %v758_v10  ;;  %v762_v17 = vld [vmem:[%s3700_s4 + $0x80] sm:$0xff] (!%p677_p7)  ;;  %2324 = vmatprep.subr.bf16.mxu0 (!%p677_p7), %v2788_v6  ;;  %v2798_v18 = vcombine.high (!%p677_p7), %v755_v15, %v759_v16  ;;  %v763_v20 = vld [vmem:[%s3700_s4 + $0x88] sm:$0xff] (!%p677_p7)  ;;  %2406 = vmatprep.subr.bf16.mxu1 (!%p677_p7), %v2790_v12  ;;  %v2795_v23 = vcombine.low (!%p677_p7), %v754_v9, %v758_v10 }
  0x9d   : > { %v766_v19 = vld [vmem:[%s3700_s4 + $0xa0] sm:$0xff]  ;;  %v767_v21 = vld [vmem:[%s3700_s4 + $0xa8] sm:$0xff]  ;;  %2325 = vmatpush1.bf16.msra.mxu0 %v2787_v8  ;;  %2407 = vmatpush1.bf16.msra.mxu1 %v2789_v13  ;;  %v2797_v24 = vcombine.low %v755_v15, %v759_v16  ;;  %v3722_v31 = vpack.c.bf16 %v729_v22, %v729_v22  ;;  %s4041_s5 = smov (!%p711_p8, %s2785_s5), 47 }
  0x9e   : > { %2326 = vmatprep.subr.bf16.mxu0 %v2796_v14  ;;  %v2804_v25 = vcombine.high %v762_v17, %v766_v19  ;;  %2408 = vmatprep.subr.bf16.mxu1 %v2798_v18  ;;  %v2806_v26 = vcombine.high %v763_v20, %v767_v21  ;;  %v770_v27 = vld [vmem:[%s3700_s4 + $0xc0] sm:$0xff]  ;;  %v771_v29 = vld [vmem:[%s3700_s4 + $0xc8] sm:$0xff]  ;;  %v2803_v32 = vcombine.low %v762_v17, %v766_v19  ;;  %s713_s8 = scalar_lea.vmem %s4035_s2, %s4041_s5  ;;  %s718_s11 = scalar_lea.vmem %s4036_s3, %s4041_s5 }
  0x9f   : > { %v774_v28 = vld [vmem:[%s3700_s4 + $0xe0] sm:$0xff]  ;;  %v775_v30 = vld [vmem:[%s3700_s4 + $0xe8] sm:$0xff]  ;;  %v2805_v33 = vcombine.low %v763_v20, %v767_v21  ;;  %2356 = vmatprep.mubr.bf16.mxu0 %v3722_v31  ;;  %2438 = vmatprep.mubr.bf16.mxu1 %v3722_v31 }
  0xa0   : > { %v2812_v34 = vcombine.high %v770_v27, %v774_v28  ;;  %v2814_v35 = vcombine.high %v771_v29, %v775_v30  ;;  %v778_v36 = vld [vmem:[%s3700_s4 + $0x100] sm:$0xff]  ;;  %v779_v38 = vld [vmem:[%s3700_s4 + $0x108] sm:$0xff]  ;;  %v2811_v40 = vcombine.low %v770_v27, %v774_v28  ;;  %v2813_v41 = vcombine.low %v771_v29, %v775_v30 }
  0xa1   : > { %2327 = vmatpush1.bf16.msra.mxu0 %v2795_v23  ;;  %2409 = vmatpush1.bf16.msra.mxu1 %v2797_v24  ;;  %v782_v37 = vld [vmem:[%s3700_s4 + $0x120] sm:$0xff]  ;;  %v783_v39 = vld [vmem:[%s3700_s4 + $0x128] sm:$0xff] }
  0xa2   : > { %2328 = vmatprep.subr.bf16.mxu0 %v2804_v25  ;;  %2410 = vmatprep.subr.bf16.mxu1 %v2806_v26  ;;  %v2820_v42 = vcombine.high %v778_v36, %v782_v37  ;;  %v2822_v43 = vcombine.high %v779_v38, %v783_v39  ;;  %v786_v44 = vld [vmem:[%s3700_s4 + $0x140] sm:$0xff]  ;;  %v787_v46 = vld [vmem:[%s3700_s4 + $0x148] sm:$0xff]  ;;  %v2819_v48 = vcombine.low %v778_v36, %v782_v37 }
  0xa3   : > { %v790_v45 = vld [vmem:[%s3700_s4 + $0x160] sm:$0xff]  ;;  %v791_v47 = vld [vmem:[%s3700_s4 + $0x168] sm:$0xff]  ;;  %v2821_v49 = vcombine.low %v779_v38, %v783_v39 }
  0xa4   : > { %v2828_v50 = vcombine.high %v786_v44, %v790_v45  ;;  %v2830_v51 = vcombine.high %v787_v46, %v791_v47  ;;  %v794_v52 = vld [vmem:[%s3700_s4 + $0x180] sm:$0xff]  ;;  %v795_v54 = vld [vmem:[%s3700_s4 + $0x188] sm:$0xff]  ;;  %v2827_v56 = vcombine.low %v786_v44, %v790_v45  ;;  %v2829_v57 = vcombine.low %v787_v46, %v791_v47 }
  0xa5   : > { %2329 = vmatpush1.bf16.msra.mxu0 %v2803_v32  ;;  %2411 = vmatpush1.bf16.msra.mxu1 %v2805_v33  ;;  %v798_v53 = vld [vmem:[%s3700_s4 + $0x1a0] sm:$0xff]  ;;  %v799_v55 = vld [vmem:[%s3700_s4 + $0x1a8] sm:$0xff] }
  0xa6   : > { %2330 = vmatprep.subr.bf16.mxu0 %v2812_v34  ;;  %2412 = vmatprep.subr.bf16.mxu1 %v2814_v35  ;;  %v2836_v58 = vcombine.high %v794_v52, %v798_v53  ;;  %v2838_v59 = vcombine.high %v795_v54, %v799_v55  ;;  %v802_v60 = vld [vmem:[%s3700_s4 + $0x1c0] sm:$0xff]  ;;  %v803_v62 = vld [vmem:[%s3700_s4 + $0x1c8] sm:$0xff]  ;;  %v2835_v0 = vcombine.low %v794_v52, %v798_v53 }
  0xa7   : > { %v806_v61 = vld [vmem:[%s3700_s4 + $0x1e0] sm:$0xff]  ;;  %v807_v63 = vld [vmem:[%s3700_s4 + $0x1e8] sm:$0xff]  ;;  %v2837_v3 = vcombine.low %v795_v54, %v799_v55 }
  0xa8   : > { %v2844_v4 = vcombine.high %v802_v60, %v806_v61  ;;  %v2846_v5 = vcombine.high %v803_v62, %v807_v63  ;;  %v810_v6 = vld [vmem:[%s3700_s4 + $0x200] sm:$0xff]  ;;  %v811_v8 = vld [vmem:[%s3700_s4 + $0x208] sm:$0xff]  ;;  %v2843_v10 = vcombine.low %v802_v60, %v806_v61  ;;  %v2845_v12 = vcombine.low %v803_v62, %v807_v63 }
  0xa9   : > { %2331 = vmatpush1.bf16.msra.mxu0 %v2811_v40  ;;  %2413 = vmatpush1.bf16.msra.mxu1 %v2813_v41  ;;  %v814_v7 = vld [vmem:[%s3700_s4 + $0x220] sm:$0xff]  ;;  %v815_v9 = vld [vmem:[%s3700_s4 + $0x228] sm:$0xff] }
  0xaa   : > { %2332 = vmatprep.subr.bf16.mxu0 %v2820_v42  ;;  %2414 = vmatprep.subr.bf16.mxu1 %v2822_v43  ;;  %v2852_v13 = vcombine.high %v810_v6, %v814_v7  ;;  %v2854_v14 = vcombine.high %v811_v8, %v815_v9  ;;  %v818_v15 = vld [vmem:[%s3700_s4 + $0x240] sm:$0xff]  ;;  %v819_v17 = vld [vmem:[%s3700_s4 + $0x248] sm:$0xff]  ;;  %v2851_v19 = vcombine.low %v810_v6, %v814_v7  ;;  %v724_v6 = vsub.s32 0, %v3698_v2 }
  0xab   : > { %v822_v16 = vld [vmem:[%s3700_s4 + $0x260] sm:$0xff]  ;;  %v823_v18 = vld [vmem:[%s3700_s4 + $0x268] sm:$0xff]  ;;  %v2853_v20 = vcombine.low %v811_v8, %v815_v9 }
  0xac   : > { %v2860_v21 = vcombine.high %v818_v15, %v822_v16  ;;  %v2862_v22 = vcombine.high %v819_v17, %v823_v18  ;;  %v826_v23 = vld [vmem:[%s3700_s4 + $0x280] sm:$0xff]  ;;  %v827_v25 = vld [vmem:[%s3700_s4 + $0x288] sm:$0xff]  ;;  %v2859_v27 = vcombine.low %v818_v15, %v822_v16  ;;  %v2861_v28 = vcombine.low %v819_v17, %v823_v18 }
  0xad   : > { %2333 = vmatpush1.bf16.msra.mxu0 %v2819_v48  ;;  %2415 = vmatpush1.bf16.msra.mxu1 %v2821_v49  ;;  %v830_v24 = vld [vmem:[%s3700_s4 + $0x2a0] sm:$0xff]  ;;  %v831_v26 = vld [vmem:[%s3700_s4 + $0x2a8] sm:$0xff]  ;;  %v725_v17 = vrot.slane %v3696_v1, %v724_v6 }
  0xae   : > { %2334 = vmatprep.subr.bf16.mxu0 %v2828_v50  ;;  %2416 = vmatprep.subr.bf16.mxu1 %v2830_v51  ;;  %v2868_v29 = vcombine.high %v826_v23, %v830_v24  ;;  %v2870_v30 = vcombine.high %v827_v25, %v831_v26  ;;  %v834_v32 = vld [vmem:[%s3700_s4 + $0x2c0] sm:$0xff]  ;;  %v835_v34 = vld [vmem:[%s3700_s4 + $0x2c8] sm:$0xff]  ;;  %v2867_v36 = vcombine.low %v826_v23, %v830_v24 }
  0xaf   : > { %v838_v33 = vld [vmem:[%s3700_s4 + $0x2e0] sm:$0xff]  ;;  %v839_v35 = vld [vmem:[%s3700_s4 + $0x2e8] sm:$0xff]  ;;  %v2869_v37 = vcombine.low %v827_v25, %v831_v26  ;;  %v3788_v25 = vpack.c.bf16 %v725_v17, %v725_v17 }
  0xb0   : > { %v2876_v38 = vcombine.high %v834_v32, %v838_v33  ;;  %v2878_v39 = vcombine.high %v835_v34, %v839_v35  ;;  %v842_v40 = vld [vmem:[%s3700_s4 + $0x300] sm:$0xff]  ;;  %v843_v42 = vld [vmem:[%s3700_s4 + $0x308] sm:$0xff]  ;;  %v2875_v44 = vcombine.low %v834_v32, %v838_v33  ;;  %v2877_v45 = vcombine.low %v835_v34, %v839_v35 }
  0xb1   : > { %2335 = vmatpush1.bf16.msra.mxu0 %v2827_v56  ;;  %2417 = vmatpush1.bf16.msra.mxu1 %v2829_v57  ;;  %v846_v41 = vld [vmem:[%s3700_s4 + $0x320] sm:$0xff]  ;;  %v847_v43 = vld [vmem:[%s3700_s4 + $0x328] sm:$0xff] }
  0xb2   : > { %2336 = vmatprep.subr.bf16.mxu0 %v2836_v58  ;;  %2418 = vmatprep.subr.bf16.mxu1 %v2838_v59  ;;  %v2884_v46 = vcombine.high %v842_v40, %v846_v41  ;;  %v2886_v47 = vcombine.high %v843_v42, %v847_v43  ;;  %v850_v48 = vld [vmem:[%s3700_s4 + $0x340] sm:$0xff]  ;;  %v851_v50 = vld [vmem:[%s3700_s4 + $0x348] sm:$0xff]  ;;  %v2883_v52 = vcombine.low %v842_v40, %v846_v41 }
  0xb3   : > { %v854_v49 = vld [vmem:[%s3700_s4 + $0x360] sm:$0xff]  ;;  %v855_v51 = vld [vmem:[%s3700_s4 + $0x368] sm:$0xff]  ;;  %v2885_v53 = vcombine.low %v843_v42, %v847_v43 }
  0xb4   : > { %v2892_v54 = vcombine.high %v850_v48, %v854_v49  ;;  %v2894_v55 = vcombine.high %v851_v50, %v855_v51  ;;  %v858_v56 = vld [vmem:[%s3700_s4 + $0x380] sm:$0xff]  ;;  %v859_v58 = vld [vmem:[%s3700_s4 + $0x388] sm:$0xff]  ;;  %v2891_v60 = vcombine.low %v850_v48, %v854_v49  ;;  %v2893_v61 = vcombine.low %v851_v50, %v855_v51 }
  0xb5   : > { %2337 = vmatpush1.bf16.msra.mxu0 %v2835_v0  ;;  %2419 = vmatpush1.bf16.msra.mxu1 %v2837_v3  ;;  %v862_v57 = vld [vmem:[%s3700_s4 + $0x3a0] sm:$0xff]  ;;  %v863_v59 = vld [vmem:[%s3700_s4 + $0x3a8] sm:$0xff] }
  0xb6   : > { %2338 = vmatprep.subr.bf16.mxu0 %v2844_v4  ;;  %2420 = vmatprep.subr.bf16.mxu1 %v2846_v5  ;;  %v2900_v62 = vcombine.high %v858_v56, %v862_v57  ;;  %v2902_v63 = vcombine.high %v859_v58, %v863_v59  ;;  %v866_v0 = vld [vmem:[%s3700_s4 + $0x3c0] sm:$0xff]  ;;  %v867_v4 = vld [vmem:[%s3700_s4 + $0x3c8] sm:$0xff]  ;;  %v2899_v7 = vcombine.low %v858_v56, %v862_v57 }
  0xb7   : > { %v870_v3 = vld [vmem:[%s3700_s4 + $0x3e0] sm:$0xff]  ;;  %v871_v5 = vld [vmem:[%s3700_s4 + $0x3e8] sm:$0xff]  ;;  %v2901_v8 = vcombine.low %v859_v58, %v863_v59 }
  0xb8   : > { %v2908_v9 = vcombine.high %v866_v0, %v870_v3  ;;  %v875_v15 = vld [vmem:[%s3700_s4 + $0x408] sm:$0xff]  ;;  %v2907_v18 = vcombine.low %v866_v0, %v870_v3  ;;  %v886_v23 = vld [vmem:[%s3700_s4 + $0x460] sm:$0xff] }
  0xb9   : > { %2339 = vmatpush1.bf16.msra.mxu0 %v2843_v10  ;;  %2421 = vmatpush1.bf16.msra.mxu1 %v2845_v12  ;;  %v2910_v10 = vcombine.high %v867_v4, %v871_v5  ;;  %v874_v12 = vld [vmem:[%s3700_s4 + $0x400] sm:$0xff]  ;;  %v879_v16 = vld [vmem:[%s3700_s4 + $0x428] sm:$0xff] }
  0xba   : > { %2340 = vmatprep.subr.bf16.mxu0 %v2852_v13  ;;  %2422 = vmatprep.subr.bf16.mxu1 %v2854_v14  ;;  %v878_v13 = vld [vmem:[%s3700_s4 + $0x420] sm:$0xff]  ;;  %v736_v14 = vsub.s32 3, %v3698_v2  ;;  %v883_v26 = vld [vmem:[%s3700_s4 + $0x448] sm:$0xff] }
  0xbb   : > { %v890_v33 = vld [vmem:[%s3700_s4 + $0x480] sm:$0xff]  ;;  %v931_v17 = vld [vmem:[%s3700_s4 + $0x5c8] sm:$0xff] }
  0xbc   : > { %v737_v24 = vrot.slane %v3696_v1, %v736_v14  ;;  %v894_v34 = vld [vmem:[%s3700_s4 + $0x4a0] sm:$0xff] }
  0xbd   : > { %2341 = vmatpush1.bf16.msra.mxu0 %v2851_v19  ;;  %2423 = vmatpush1.bf16.msra.mxu1 %v2853_v20  ;;  %v2909_v19 = vcombine.low %v867_v4, %v871_v5  ;;  %v2916_v20 = vcombine.high %v874_v12, %v878_v13  ;;  %v2932_v40 = vcombine.high %v890_v33, %v894_v34  ;;  %v898_v42 = vld [vmem:[%s3700_s4 + $0x4c0] sm:$0xff] }
  0xbe   : > { %2342 = vmatprep.subr.bf16.mxu0 %v2860_v21  ;;  %2424 = vmatprep.subr.bf16.mxu1 %v2862_v22  ;;  %v2918_v21 = vcombine.high %v875_v15, %v879_v16  ;;  %v882_v22 = vld [vmem:[%s3700_s4 + $0x440] sm:$0xff]  ;;  %v3794_v35 = vpack.c.bf16 %v737_v24, %v737_v24 }
  0xbf   : > { %v902_v43 = vld [vmem:[%s3700_s4 + $0x4e0] sm:$0xff] }
  0xc0   : > { %v2940_v48 = vcombine.high %v898_v42, %v902_v43  ;;  %v906_v50 = vld [vmem:[%s3700_s4 + $0x500] sm:$0xff] }
  0xc1   : > { %2343 = vmatpush1.bf16.msra.mxu0 %v2859_v27  ;;  %2425 = vmatpush1.bf16.msra.mxu1 %v2861_v28  ;;  %v887_v27 = vld [vmem:[%s3700_s4 + $0x468] sm:$0xff]  ;;  %v2915_v28 = vcombine.low %v874_v12, %v878_v13  ;;  %v910_v51 = vld [vmem:[%s3700_s4 + $0x520] sm:$0xff] }
  0xc2   : > { %2344 = vmatprep.subr.bf16.mxu0 %v2868_v29  ;;  %2426 = vmatprep.subr.bf16.mxu1 %v2870_v30  ;;  %v2917_v29 = vcombine.low %v875_v15, %v879_v16  ;;  %v2924_v30 = vcombine.high %v882_v22, %v886_v23  ;;  %v2926_v32 = vcombine.high %v883_v26, %v887_v27  ;;  %v914_v58 = vld [vmem:[%s3700_s4 + $0x540] sm:$0xff] }
  0xc3   : > { %v2948_v56 = vcombine.high %v906_v50, %v910_v51  ;;  %v918_v59 = vld [vmem:[%s3700_s4 + $0x560] sm:$0xff] }
  0xc4   : > { %v2956_v0 = vcombine.high %v914_v58, %v918_v59  ;;  %v922_v4 = vld [vmem:[%s3700_s4 + $0x580] sm:$0xff] }
  0xc5   : > { %2345 = vmatpush1.bf16.msra.mxu0 %v2867_v36  ;;  %2427 = vmatpush1.bf16.msra.mxu1 %v2869_v37  ;;  %v891_v36 = vld [vmem:[%s3700_s4 + $0x488] sm:$0xff]  ;;  %v926_v5 = vld [vmem:[%s3700_s4 + $0x5a0] sm:$0xff] }
  0xc6   : > { %2346 = vmatprep.subr.bf16.mxu0 %v2876_v38  ;;  %2428 = vmatprep.subr.bf16.mxu1 %v2878_v39  ;;  %v895_v37 = vld [vmem:[%s3700_s4 + $0x4a8] sm:$0xff]  ;;  %v2923_v38 = vcombine.low %v882_v22, %v886_v23  ;;  %v2925_v39 = vcombine.low %v883_v26, %v887_v27  ;;  %v2964_v12 = vcombine.high %v922_v4, %v926_v5  ;;  %v930_v15 = vld [vmem:[%s3700_s4 + $0x5c0] sm:$0xff] }
  0xc7   : > { %v2934_v41 = vcombine.high %v891_v36, %v895_v37  ;;  %v934_v16 = vld [vmem:[%s3700_s4 + $0x5e0] sm:$0xff]  ;;  %v939_v26 = vld [vmem:[%s3700_s4 + $0x608] sm:$0xff] }
  0xc8   : > { %v938_v23 = vld [vmem:[%s3700_s4 + $0x600] sm:$0xff]  ;;  %v943_v27 = vld [vmem:[%s3700_s4 + $0x628] sm:$0xff] }
  0xc9   : > { %2347 = vmatpush1.bf16.msra.mxu0 %v2875_v44  ;;  %2429 = vmatpush1.bf16.msra.mxu1 %v2877_v45  ;;  %v899_v44 = vld [vmem:[%s3700_s4 + $0x4c8] sm:$0xff]  ;;  %v942_v24 = vld [vmem:[%s3700_s4 + $0x620] sm:$0xff] }
  0xca   : > { %2348 = vmatprep.subr.bf16.mxu0 %v2884_v46  ;;  %2430 = vmatprep.subr.bf16.mxu1 %v2886_v47  ;;  %v903_v45 = vld [vmem:[%s3700_s4 + $0x4e8] sm:$0xff]  ;;  %v2931_v46 = vcombine.low %v890_v33, %v894_v34  ;;  %v2933_v47 = vcombine.low %v891_v36, %v895_v37  ;;  %v946_v33 = vld [vmem:[%s3700_s4 + $0x640] sm:$0xff] }
  0xcb   : > { %v2942_v49 = vcombine.high %v899_v44, %v903_v45  ;;  %v950_v34 = vld [vmem:[%s3700_s4 + $0x660] sm:$0xff]  ;;  %v947_v36 = vld [vmem:[%s3700_s4 + $0x648] sm:$0xff] }
  0xcc   : > { %v951_v37 = vld [vmem:[%s3700_s4 + $0x668] sm:$0xff] }
  0xcd   : > { %2349 = vmatpush1.bf16.msra.mxu0 %v2883_v52  ;;  %2431 = vmatpush1.bf16.msra.mxu1 %v2885_v53  ;;  %v907_v52 = vld [vmem:[%s3700_s4 + $0x508] sm:$0xff] }
  0xce   : > { %2350 = vmatprep.subr.bf16.mxu0 %v2892_v54  ;;  %2432 = vmatprep.subr.bf16.mxu1 %v2894_v55  ;;  %v911_v53 = vld [vmem:[%s3700_s4 + $0x528] sm:$0xff]  ;;  %v2939_v54 = vcombine.low %v898_v42, %v902_v43  ;;  %v2941_v55 = vcombine.low %v899_v44, %v903_v45  ;;  %v954_v42 = vld [vmem:[%s3700_s4 + $0x680] sm:$0xff] }
  0xcf   : > { %v2950_v57 = vcombine.high %v907_v52, %v911_v53  ;;  %v958_v43 = vld [vmem:[%s3700_s4 + $0x6a0] sm:$0xff]  ;;  %v955_v44 = vld [vmem:[%s3700_s4 + $0x688] sm:$0xff] }
  0xd0   : > { %v959_v45 = vld [vmem:[%s3700_s4 + $0x6a8] sm:$0xff] }
  0xd1   : > { %2351 = vmatpush1.bf16.msra.mxu0 %v2891_v60  ;;  %2433 = vmatpush1.bf16.msra.mxu1 %v2893_v61  ;;  %v915_v60 = vld [vmem:[%s3700_s4 + $0x548] sm:$0xff] }
  0xd2   : > { %2352 = vmatprep.subr.bf16.mxu0 %v2900_v62  ;;  %2434 = vmatprep.subr.bf16.mxu1 %v2902_v63  ;;  %v919_v61 = vld [vmem:[%s3700_s4 + $0x568] sm:$0xff]  ;;  %v2947_v62 = vcombine.low %v906_v50, %v910_v51  ;;  %v2949_v63 = vcombine.low %v907_v52, %v911_v53  ;;  %v962_v50 = vld [vmem:[%s3700_s4 + $0x6c0] sm:$0xff] }
  0xd3   : > { %v2958_v3 = vcombine.high %v915_v60, %v919_v61  ;;  %v966_v51 = vld [vmem:[%s3700_s4 + $0x6e0] sm:$0xff]  ;;  %v963_v52 = vld [vmem:[%s3700_s4 + $0x6c8] sm:$0xff] }
  0xd4   : > { %v967_v53 = vld [vmem:[%s3700_s4 + $0x6e8] sm:$0xff] }
  0xd5   : > { %2353 = vmatpush1.bf16.msra.mxu0 %v2899_v7  ;;  %2435 = vmatpush1.bf16.msra.mxu1 %v2901_v8  ;;  %v923_v7 = vld [vmem:[%s3700_s4 + $0x588] sm:$0xff] }
  0xd6   : > { %2354 = vmatprep.subr.bf16.mxu0 %v2908_v9  ;;  %2436 = vmatprep.subr.bf16.mxu1 %v2910_v10  ;;  %v927_v8 = vld [vmem:[%s3700_s4 + $0x5a8] sm:$0xff]  ;;  %v2955_v9 = vcombine.low %v914_v58, %v918_v59  ;;  %v2957_v10 = vcombine.low %v915_v60, %v919_v61  ;;  %v970_v58 = vld [vmem:[%s3700_s4 + $0x700] sm:$0xff] }
  0xd7   : > { %v2966_v13 = vcombine.high %v923_v7, %v927_v8  ;;  %v974_v59 = vld [vmem:[%s3700_s4 + $0x720] sm:$0xff]  ;;  %v971_v60 = vld [vmem:[%s3700_s4 + $0x708] sm:$0xff] }
  0xd8   : > { %v975_v61 = vld [vmem:[%s3700_s4 + $0x728] sm:$0xff] }
  0xd9   : > { %2355 = vmatpush1.bf16.msra.mxu0 %v2907_v18  ;;  %2437 = vmatpush1.bf16.msra.mxu1 %v2909_v19  ;;  %v935_v18 = vld [vmem:[%s3700_s4 + $0x5e8] sm:$0xff]  ;;  %v2963_v19 = vcombine.low %v922_v4, %v926_v5  ;;  %v978_v4 = vld [vmem:[%s3700_s4 + $0x740] sm:$0xff] }
  0xda   : > { %2365 = vmatprep.subr.bf16.mxu0 %v2916_v20  ;;  %2447 = vmatprep.subr.bf16.mxu1 %v2918_v21  ;;  %v2965_v20 = vcombine.low %v923_v7, %v927_v8  ;;  %v2972_v21 = vcombine.high %v930_v15, %v934_v16  ;;  %v2974_v22 = vcombine.high %v931_v17, %v935_v18  ;;  %v982_v5 = vld [vmem:[%s3700_s4 + $0x760] sm:$0xff]  ;;  %v979_v7 = vld [vmem:[%s3700_s4 + $0x748] sm:$0xff] }
  0xdb   : > { %v983_v8 = vld [vmem:[%s3700_s4 + $0x768] sm:$0xff] }
  0xdc   : > { %2357 = vmatmul.mubr.bf16.vlgmr.msra.gmra.mrb[0].mxu0 %v3788_v25  ;;  %2439 = vmatmul.mubr.bf16.vlgmr.msra.gmra.mrb[0].mxu1 %v3788_v25 }
  0xdd   : > { %2366 = vmatpush1.bf16.msra.mxu0 %v2915_v28  ;;  %2448 = vmatpush1.bf16.msra.mxu1 %v2917_v29  ;;  %v2971_v28 = vcombine.low %v930_v15, %v934_v16  ;;  %v2973_v29 = vcombine.low %v931_v17, %v935_v18  ;;  %v986_v15 = vld [vmem:[%s3700_s4 + $0x780] sm:$0xff]  ;;  %v987_v17 = vld [vmem:[%s3700_s4 + $0x788] sm:$0xff] }
  0xde   : > { %2367 = vmatprep.subr.bf16.mxu0 %v2924_v30  ;;  %2449 = vmatprep.subr.bf16.mxu1 %v2926_v32  ;;  %v2980_v30 = vcombine.high %v938_v23, %v942_v24  ;;  %v2982_v32 = vcombine.high %v939_v26, %v943_v27  ;;  %v990_v16 = vld [vmem:[%s3700_s4 + $0x7a0] sm:$0xff]  ;;  %v991_v18 = vld [vmem:[%s3700_s4 + $0x7a8] sm:$0xff] }
  0xdf   : > { %2397 = vmatprep.mubr.bf16.mxu0 %v3794_v35  ;;  %2479 = vmatprep.mubr.bf16.mxu1 %v3794_v35 }
  0xe1   : > { %2368 = vmatpush1.bf16.msra.mxu0 %v2923_v38  ;;  %2450 = vmatpush1.bf16.msra.mxu1 %v2925_v39  ;;  %v2979_v38 = vcombine.low %v938_v23, %v942_v24  ;;  %v2981_v39 = vcombine.low %v939_v26, %v943_v27  ;;  %v994_v23 = vld [vmem:[%s3700_s4 + $0x7c0] sm:$0xff]  ;;  %v995_v26 = vld [vmem:[%s3700_s4 + $0x7c8] sm:$0xff] }
  0xe2   : > { %2369 = vmatprep.subr.bf16.mxu0 %v2932_v40  ;;  %2451 = vmatprep.subr.bf16.mxu1 %v2934_v41  ;;  %v2988_v40 = vcombine.high %v946_v33, %v950_v34  ;;  %v2990_v41 = vcombine.high %v947_v36, %v951_v37  ;;  %v998_v24 = vld [vmem:[%s3700_s4 + $0x7e0] sm:$0xff]  ;;  %v999_v27 = vld [vmem:[%s3700_s4 + $0x7e8] sm:$0xff] }
  0xe5   : > { %2370 = vmatpush1.bf16.msra.mxu0 %v2931_v46  ;;  %2452 = vmatpush1.bf16.msra.mxu1 %v2933_v47  ;;  %v2987_v46 = vcombine.low %v946_v33, %v950_v34  ;;  %v2989_v47 = vcombine.low %v947_v36, %v951_v37  ;;  %v3038_v33 = vcombine.high %v995_v26, %v999_v27  ;;  %v748_v34 = vld [vmem:[%s3700_s4 + $0x10] sm:$0xff] }
  0xe6   : > { %2371 = vmatprep.subr.bf16.mxu0 %v2940_v48  ;;  %2453 = vmatprep.subr.bf16.mxu1 %v2942_v49  ;;  %v2996_v48 = vcombine.high %v954_v42, %v958_v43  ;;  %v2998_v49 = vcombine.high %v955_v44, %v959_v45  ;;  %v752_v36 = vld [vmem:[%s3700_s4 + $0x30] sm:$0xff] }
  0xe9   : > { %2372 = vmatpush1.bf16.msra.mxu0 %v2939_v54  ;;  %2454 = vmatpush1.bf16.msra.mxu1 %v2941_v55  ;;  %v2995_v54 = vcombine.low %v954_v42, %v958_v43  ;;  %v2997_v55 = vcombine.low %v955_v44, %v959_v45  ;;  %v2792_v42 = vcombine.high %v748_v34, %v752_v36  ;;  %v756_v44 = vld [vmem:[%s3700_s4 + $0x50] sm:$0xff] }
  0xea   : > { %2373 = vmatprep.subr.bf16.mxu0 %v2948_v56  ;;  %2455 = vmatprep.subr.bf16.mxu1 %v2950_v57  ;;  %v3004_v56 = vcombine.high %v962_v50, %v966_v51  ;;  %v3006_v57 = vcombine.high %v963_v52, %v967_v53  ;;  %v760_v45 = vld [vmem:[%s3700_s4 + $0x70] sm:$0xff] }
  0xed   : > { %2374 = vmatpush1.bf16.msra.mxu0 %v2947_v62  ;;  %2456 = vmatpush1.bf16.msra.mxu1 %v2949_v63  ;;  %v3003_v62 = vcombine.low %v962_v50, %v966_v51  ;;  %v3005_v63 = vcombine.low %v963_v52, %v967_v53  ;;  %v2800_v50 = vcombine.high %v756_v44, %v760_v45  ;;  %v764_v52 = vld [vmem:[%s3700_s4 + $0x90] sm:$0xff] }
  0xee   : > { %2375 = vmatprep.subr.bf16.mxu0 %v2956_v0  ;;  %2457 = vmatprep.subr.bf16.mxu1 %v2958_v3  ;;  %v3012_v0 = vcombine.high %v970_v58, %v974_v59  ;;  %v3014_v3 = vcombine.high %v971_v60, %v975_v61  ;;  %v768_v53 = vld [vmem:[%s3700_s4 + $0xb0] sm:$0xff] }
  0xf1   : > { %2376 = vmatpush1.bf16.msra.mxu0 %v2955_v9  ;;  %2458 = vmatpush1.bf16.msra.mxu1 %v2957_v10  ;;  %v3011_v9 = vcombine.low %v970_v58, %v974_v59  ;;  %v3013_v10 = vcombine.low %v971_v60, %v975_v61  ;;  %v2808_v58 = vcombine.high %v764_v52, %v768_v53  ;;  %v772_v60 = vld [vmem:[%s3700_s4 + $0xd0] sm:$0xff] }
  0xf2   : > { %2377 = vmatprep.subr.bf16.mxu0 %v2964_v12  ;;  %2459 = vmatprep.subr.bf16.mxu1 %v2966_v13  ;;  %v3020_v12 = vcombine.high %v978_v4, %v982_v5  ;;  %v3022_v13 = vcombine.high %v979_v7, %v983_v8  ;;  %v776_v61 = vld [vmem:[%s3700_s4 + $0xf0] sm:$0xff] }
  0xf5   : > { %2378 = vmatpush1.bf16.msra.mxu0 %v2963_v19  ;;  %2460 = vmatpush1.bf16.msra.mxu1 %v2965_v20  ;;  %v3019_v19 = vcombine.low %v978_v4, %v982_v5  ;;  %v3021_v20 = vcombine.low %v979_v7, %v983_v8  ;;  %v2816_v4 = vcombine.high %v772_v60, %v776_v61  ;;  %v780_v7 = vld [vmem:[%s3700_s4 + $0x110] sm:$0xff] }
  0xf6   : > { %2379 = vmatprep.subr.bf16.mxu0 %v2972_v21  ;;  %2461 = vmatprep.subr.bf16.mxu1 %v2974_v22  ;;  %v3028_v21 = vcombine.high %v986_v15, %v990_v16  ;;  %v3030_v22 = vcombine.high %v987_v17, %v991_v18  ;;  %v784_v8 = vld [vmem:[%s3700_s4 + $0x130] sm:$0xff] }
  0xf9   : > { %2380 = vmatpush1.bf16.msra.mxu0 %v2971_v28  ;;  %2462 = vmatpush1.bf16.msra.mxu1 %v2973_v29  ;;  %v732_v28 = vsub.s32 2, %v3698_v2  ;;  %v3027_v29 = vcombine.low %v986_v15, %v990_v16  ;;  %v788_v16 = vld [vmem:[%s3700_s4 + $0x150] sm:$0xff] }
  0xfa   : > { %2381 = vmatprep.subr.bf16.mxu0 %v2980_v30  ;;  %2463 = vmatprep.subr.bf16.mxu1 %v2982_v32  ;;  %v3029_v30 = vcombine.low %v987_v17, %v991_v18  ;;  %v3036_v32 = vcombine.high %v994_v23, %v998_v24  ;;  %v792_v17 = vld [vmem:[%s3700_s4 + $0x170] sm:$0xff]  ;;  %v789_v18 = vld [vmem:[%s3700_s4 + $0x158] sm:$0xff] }
  0xfb   : > { %v733_v37 = vrot.slane %v3696_v1, %v732_v28  ;;  %v761_v1 = vld [vmem:[%s3700_s4 + $0x78] sm:$0xff] }
  0xfd   : > { %2382 = vmatpush1.bf16.msra.mxu0 %v2979_v38  ;;  %2464 = vmatpush1.bf16.msra.mxu1 %v2981_v39  ;;  %v749_v38 = vld [vmem:[%s3700_s4 + $0x18] sm:$0xff] }
  0xfe   : > { %2383 = vmatprep.subr.bf16.mxu0 %v2988_v40  ;;  %2465 = vmatprep.subr.bf16.mxu1 %v2990_v41  ;;  %v753_v39 = vld [vmem:[%s3700_s4 + $0x38] sm:$0xff]  ;;  %v3035_v40 = vcombine.low %v994_v23, %v998_v24  ;;  %v3037_v41 = vcombine.low %v995_v26, %v999_v27  ;;  %v796_v24 = vld [vmem:[%s3700_s4 + $0x190] sm:$0xff] }
  0xff   : > { %v2794_v43 = vcombine.high %v749_v38, %v753_v39  ;;  %v800_v26 = vld [vmem:[%s3700_s4 + $0x1b0] sm:$0xff]  ;;  %v797_v27 = vld [vmem:[%s3700_s4 + $0x198] sm:$0xff] }
 0x101   : > { %2384 = vmatpush1.bf16.msra.mxu0 %v2987_v46  ;;  %2466 = vmatpush1.bf16.msra.mxu1 %v2989_v47  ;;  %v3864_v46 = vpack.c.bf16 %v733_v37, %v733_v37  ;;  %v757_v47 = vld [vmem:[%s3700_s4 + $0x58] sm:$0xff]  ;;  %v808_v37 = vld [vmem:[%s3700_s4 + $0x1f0] sm:$0xff] }
 0x102   : > { %2385 = vmatprep.subr.bf16.mxu0 %v2996_v48  ;;  %2467 = vmatprep.subr.bf16.mxu1 %v2998_v49  ;;  %v2791_v48 = vcombine.low %v748_v34, %v752_v36  ;;  %v2793_v49 = vcombine.low %v749_v38, %v753_v39  ;;  %v2802_v51 = vcombine.high %v757_v47, %v761_v1  ;;  %v804_v36 = vld [vmem:[%s3700_s4 + $0x1d0] sm:$0xff]  ;;  %v805_v38 = vld [vmem:[%s3700_s4 + $0x1d8] sm:$0xff] }
 0x103   : > { %v809_v39 = vld [vmem:[%s3700_s4 + $0x1f8] sm:$0xff] }
 0x105   : > { %2386 = vmatpush1.bf16.msra.mxu0 %v2995_v54  ;;  %2468 = vmatpush1.bf16.msra.mxu1 %v2997_v55  ;;  %v765_v54 = vld [vmem:[%s3700_s4 + $0x98] sm:$0xff] }
 0x106   : > { %2387 = vmatprep.subr.bf16.mxu0 %v3004_v56  ;;  %2469 = vmatprep.subr.bf16.mxu1 %v3006_v57  ;;  %v769_v55 = vld [vmem:[%s3700_s4 + $0xb8] sm:$0xff]  ;;  %v2799_v56 = vcombine.low %v756_v44, %v760_v45  ;;  %v2801_v57 = vcombine.low %v757_v47, %v761_v1  ;;  %v812_v44 = vld [vmem:[%s3700_s4 + $0x210] sm:$0xff] }
 0x107   : > { %v2810_v59 = vcombine.high %v765_v54, %v769_v55  ;;  %v816_v45 = vld [vmem:[%s3700_s4 + $0x230] sm:$0xff]  ;;  %v813_v47 = vld [vmem:[%s3700_s4 + $0x218] sm:$0xff] }
 0x108   : > { %v817_v1 = vld [vmem:[%s3700_s4 + $0x238] sm:$0xff] }
 0x109   : > { %2388 = vmatpush1.bf16.msra.mxu0 %v3003_v62  ;;  %2470 = vmatpush1.bf16.msra.mxu1 %v3005_v63  ;;  %v773_v62 = vld [vmem:[%s3700_s4 + $0xd8] sm:$0xff] }
 0x10a   : > { %2389 = vmatprep.subr.bf16.mxu0 %v3012_v0  ;;  %2471 = vmatprep.subr.bf16.mxu1 %v3014_v3  ;;  %v777_v63 = vld [vmem:[%s3700_s4 + $0xf8] sm:$0xff]  ;;  %v2807_v0 = vcombine.low %v764_v52, %v768_v53  ;;  %v2809_v3 = vcombine.low %v765_v54, %v769_v55  ;;  %v820_v52 = vld [vmem:[%s3700_s4 + $0x250] sm:$0xff] }
 0x10b   : > { %v2818_v5 = vcombine.high %v773_v62, %v777_v63  ;;  %v824_v53 = vld [vmem:[%s3700_s4 + $0x270] sm:$0xff]  ;;  %v821_v54 = vld [vmem:[%s3700_s4 + $0x258] sm:$0xff] }
 0x10c   : > { %v825_v55 = vld [vmem:[%s3700_s4 + $0x278] sm:$0xff] }
 0x10d   : > { %2390 = vmatpush1.bf16.msra.mxu0 %v3011_v9  ;;  %2472 = vmatpush1.bf16.msra.mxu1 %v3013_v10  ;;  %v781_v9 = vld [vmem:[%s3700_s4 + $0x118] sm:$0xff] }
 0x10e   : > { %2391 = vmatprep.subr.bf16.mxu0 %v3020_v12  ;;  %2473 = vmatprep.subr.bf16.mxu1 %v3022_v13  ;;  %v785_v10 = vld [vmem:[%s3700_s4 + $0x138] sm:$0xff]  ;;  %v2815_v12 = vcombine.low %v772_v60, %v776_v61  ;;  %v2824_v13 = vcombine.high %v780_v7, %v784_v8  ;;  %v828_v60 = vld [vmem:[%s3700_s4 + $0x290] sm:$0xff] }
 0x10f   : > { %v2826_v15 = vcombine.high %v781_v9, %v785_v10  ;;  %v832_v61 = vld [vmem:[%s3700_s4 + $0x2b0] sm:$0xff] }
 0x111   : > { %2392 = vmatpush1.bf16.msra.mxu0 %v3019_v19  ;;  %2474 = vmatpush1.bf16.msra.mxu1 %v3021_v20  ;;  %v793_v19 = vld [vmem:[%s3700_s4 + $0x178] sm:$0xff]  ;;  %v2823_v20 = vcombine.low %v780_v7, %v784_v8  ;;  %v836_v7 = vld [vmem:[%s3700_s4 + $0x2d0] sm:$0xff] }
 0x112   : > { %2393 = vmatprep.subr.bf16.mxu0 %v3028_v21  ;;  %2475 = vmatprep.subr.bf16.mxu1 %v3030_v22  ;;  %v2825_v21 = vcombine.low %v781_v9, %v785_v10  ;;  %v2832_v22 = vcombine.high %v788_v16, %v792_v17  ;;  %v2834_v23 = vcombine.high %v789_v18, %v793_v19  ;;  %v840_v8 = vld [vmem:[%s3700_s4 + $0x2f0] sm:$0xff]  ;;  %v837_v9 = vld [vmem:[%s3700_s4 + $0x2d8] sm:$0xff] }
 0x113   : > { %v841_v10 = vld [vmem:[%s3700_s4 + $0x2f8] sm:$0xff] }
 0x115   : > { %2394 = vmatpush1.bf16.msra.mxu0 %v3027_v29  ;;  %2476 = vmatpush1.bf16.msra.mxu1 %v3029_v30  ;;  %v801_v29 = vld [vmem:[%s3700_s4 + $0x1b8] sm:$0xff]  ;;  %v2831_v30 = vcombine.low %v788_v16, %v792_v17  ;;  %v844_v16 = vld [vmem:[%s3700_s4 + $0x310] sm:$0xff] }
 0x116   : > { %2395 = vmatprep.subr.bf16.mxu0 %v3036_v32  ;;  %2477 = vmatprep.subr.bf16.mxu1 %v3038_v33  ;;  %v2833_v32 = vcombine.low %v789_v18, %v793_v19  ;;  %v2840_v33 = vcombine.high %v796_v24, %v800_v26  ;;  %v2842_v34 = vcombine.high %v797_v27, %v801_v29  ;;  %v848_v17 = vld [vmem:[%s3700_s4 + $0x330] sm:$0xff]  ;;  %v845_v18 = vld [vmem:[%s3700_s4 + $0x318] sm:$0xff] }
 0x117   : > { %v849_v19 = vld [vmem:[%s3700_s4 + $0x338] sm:$0xff] }
 0x119   : > { %2396 = vmatpush1.bf16.msra.mxu0 %v3035_v40  ;;  %2478 = vmatpush1.bf16.msra.mxu1 %v3037_v41  ;;  %v2839_v40 = vcombine.low %v796_v24, %v800_v26  ;;  %v2841_v41 = vcombine.low %v797_v27, %v801_v29  ;;  %v852_v24 = vld [vmem:[%s3700_s4 + $0x350] sm:$0xff]  ;;  %v853_v27 = vld [vmem:[%s3700_s4 + $0x358] sm:$0xff] }
 0x11a   : > { %2488 = vmatprep.subr.bf16.mxu0 %v2792_v42  ;;  %2570 = vmatprep.subr.bf16.mxu1 %v2794_v43  ;;  %v2848_v42 = vcombine.high %v804_v36, %v808_v37  ;;  %v2850_v43 = vcombine.high %v805_v38, %v809_v39  ;;  %v856_v26 = vld [vmem:[%s3700_s4 + $0x370] sm:$0xff]  ;;  %v857_v29 = vld [vmem:[%s3700_s4 + $0x378] sm:$0xff] }
 0x11c   : > { %2398 = vmatmul.mubr.bf16.vlgmr.msra.gmra.mrb[0].mxu0 %v3864_v46  ;;  %2480 = vmatmul.mubr.bf16.vlgmr.msra.gmra.mrb[0].mxu1 %v3864_v46 }
 0x11d   : > { %2489 = vmatpush1.bf16.msra.mxu0 %v2791_v48  ;;  %2571 = vmatpush1.bf16.msra.mxu1 %v2793_v49  ;;  %v2847_v48 = vcombine.low %v804_v36, %v808_v37  ;;  %v2849_v49 = vcombine.low %v805_v38, %v809_v39  ;;  %v860_v36 = vld [vmem:[%s3700_s4 + $0x390] sm:$0xff]  ;;  %v861_v38 = vld [vmem:[%s3700_s4 + $0x398] sm:$0xff] }
 0x11e   : > { %2490 = vmatprep.subr.bf16.mxu0 %v2800_v50  ;;  %2572 = vmatprep.subr.bf16.mxu1 %v2802_v51  ;;  %v2856_v50 = vcombine.high %v812_v44, %v816_v45  ;;  %v2858_v51 = vcombine.high %v813_v47, %v817_v1  ;;  %v864_v37 = vld [vmem:[%s3700_s4 + $0x3b0] sm:$0xff]  ;;  %v865_v39 = vld [vmem:[%s3700_s4 + $0x3b8] sm:$0xff] }
 0x11f   : > { %2520 = vmatprep.mubr.bf16.mxu0 %v3722_v31  ;;  %2602 = vmatprep.mubr.bf16.mxu1 %v3722_v31  ;;  %v2817_v31 = vcombine.low %v773_v62, %v777_v63  ;;  %v829_v62 = vld [vmem:[%s3700_s4 + $0x298] sm:$0xff] }
 0x120   : > { %v833_v63 = vld [vmem:[%s3700_s4 + $0x2b8] sm:$0xff] }
 0x121   : > { %2491 = vmatpush1.bf16.msra.mxu0 %v2799_v56  ;;  %2573 = vmatpush1.bf16.msra.mxu1 %v2801_v57  ;;  %v2855_v56 = vcombine.low %v812_v44, %v816_v45  ;;  %v2857_v57 = vcombine.low %v813_v47, %v817_v1  ;;  %v868_v44 = vld [vmem:[%s3700_s4 + $0x3d0] sm:$0xff]  ;;  %v869_v47 = vld [vmem:[%s3700_s4 + $0x3d8] sm:$0xff] }
 0x122   : > { %2492 = vmatprep.subr.bf16.mxu0 %v2808_v58  ;;  %2574 = vmatprep.subr.bf16.mxu1 %v2810_v59  ;;  %v2864_v58 = vcombine.high %v820_v52, %v824_v53  ;;  %v2866_v59 = vcombine.high %v821_v54, %v825_v55  ;;  %v872_v45 = vld [vmem:[%s3700_s4 + $0x3f0] sm:$0xff]  ;;  %v873_v1 = vld [vmem:[%s3700_s4 + $0x3f8] sm:$0xff] }
 0x125   : > { %2493 = vmatpush1.bf16.msra.mxu0 %v2807_v0  ;;  %2575 = vmatpush1.bf16.msra.mxu1 %v2809_v3  ;;  %v2863_v0 = vcombine.low %v820_v52, %v824_v53  ;;  %v2865_v3 = vcombine.low %v821_v54, %v825_v55  ;;  %v876_v52 = vld [vmem:[%s3700_s4 + $0x410] sm:$0xff]  ;;  %v877_v54 = vld [vmem:[%s3700_s4 + $0x418] sm:$0xff] }
 0x126   : > { %2494 = vmatprep.subr.bf16.mxu0 %v2816_v4  ;;  %2576 = vmatprep.subr.bf16.mxu1 %v2818_v5  ;;  %v2872_v4 = vcombine.high %v828_v60, %v832_v61  ;;  %v2874_v5 = vcombine.high %v829_v62, %v833_v63  ;;  %v880_v53 = vld [vmem:[%s3700_s4 + $0x430] sm:$0xff]  ;;  %v881_v55 = vld [vmem:[%s3700_s4 + $0x438] sm:$0xff] }
 0x129   : > { %2495 = vmatpush1.bf16.msra.mxu0 %v2815_v12  ;;  %2577 = vmatpush1.bf16.msra.mxu1 %v2817_v31  ;;  %v2871_v12 = vcombine.low %v828_v60, %v832_v61  ;;  %v2873_v31 = vcombine.low %v829_v62, %v833_v63  ;;  %v884_v60 = vld [vmem:[%s3700_s4 + $0x450] sm:$0xff]  ;;  %v885_v62 = vld [vmem:[%s3700_s4 + $0x458] sm:$0xff] }
 0x12a   : > { %2496 = vmatprep.subr.bf16.mxu0 %v2824_v13  ;;  %2578 = vmatprep.subr.bf16.mxu1 %v2826_v15  ;;  %v2880_v13 = vcombine.high %v836_v7, %v840_v8  ;;  %v2882_v15 = vcombine.high %v837_v9, %v841_v10  ;;  %v888_v61 = vld [vmem:[%s3700_s4 + $0x470] sm:$0xff]  ;;  %v889_v63 = vld [vmem:[%s3700_s4 + $0x478] sm:$0xff] }
 0x12d   : > { %2497 = vmatpush1.bf16.msra.mxu0 %v2823_v20  ;;  %2579 = vmatpush1.bf16.msra.mxu1 %v2825_v21  ;;  %v2879_v20 = vcombine.low %v836_v7, %v840_v8  ;;  %v2881_v21 = vcombine.low %v837_v9, %v841_v10  ;;  %v892_v7 = vld [vmem:[%s3700_s4 + $0x490] sm:$0xff]  ;;  %v893_v9 = vld [vmem:[%s3700_s4 + $0x498] sm:$0xff] }
 0x12e   : > { %2498 = vmatprep.subr.bf16.mxu0 %v2832_v22  ;;  %2580 = vmatprep.subr.bf16.mxu1 %v2834_v23  ;;  %v2888_v22 = vcombine.high %v844_v16, %v848_v17  ;;  %v2890_v23 = vcombine.high %v845_v18, %v849_v19  ;;  %v896_v8 = vld [vmem:[%s3700_s4 + $0x4b0] sm:$0xff]  ;;  %v897_v10 = vld [vmem:[%s3700_s4 + $0x4b8] sm:$0xff] }
 0x131   : > { %2499 = vmatpush1.bf16.msra.mxu0 %v2831_v30  ;;  %2581 = vmatpush1.bf16.msra.mxu1 %v2833_v32  ;;  %v2887_v30 = vcombine.low %v844_v16, %v848_v17  ;;  %v2889_v32 = vcombine.low %v845_v18, %v849_v19  ;;  %v900_v16 = vld [vmem:[%s3700_s4 + $0x4d0] sm:$0xff]  ;;  %v901_v18 = vld [vmem:[%s3700_s4 + $0x4d8] sm:$0xff] }
 0x132   : > { %2500 = vmatprep.subr.bf16.mxu0 %v2840_v33  ;;  %2582 = vmatprep.subr.bf16.mxu1 %v2842_v34  ;;  %v2896_v33 = vcombine.high %v852_v24, %v856_v26  ;;  %v2898_v34 = vcombine.high %v853_v27, %v857_v29  ;;  %v904_v17 = vld [vmem:[%s3700_s4 + $0x4f0] sm:$0xff]  ;;  %v905_v19 = vld [vmem:[%s3700_s4 + $0x4f8] sm:$0xff] }
 0x135   : > { %2501 = vmatpush1.bf16.msra.mxu0 %v2839_v40  ;;  %2583 = vmatpush1.bf16.msra.mxu1 %v2841_v41  ;;  %v2895_v40 = vcombine.low %v852_v24, %v856_v26  ;;  %v2897_v41 = vcombine.low %v853_v27, %v857_v29  ;;  %v912_v24 = vld [vmem:[%s3700_s4 + $0x530] sm:$0xff]  ;;  %v909_v26 = vld [vmem:[%s3700_s4 + $0x518] sm:$0xff]  ;;  %v2943_v29 = vcombine.low %v900_v16, %v904_v17 }
 0x136   : > { %2502 = vmatprep.subr.bf16.mxu0 %v2848_v42  ;;  %2584 = vmatprep.subr.bf16.mxu1 %v2850_v43  ;;  %v2904_v42 = vcombine.high %v860_v36, %v864_v37  ;;  %v2906_v43 = vcombine.high %v861_v38, %v865_v39  ;;  %v913_v27 = vld [vmem:[%s3700_s4 + $0x538] sm:$0xff] }
 0x139   : > { %2503 = vmatpush1.bf16.msra.mxu0 %v2847_v48  ;;  %2585 = vmatpush1.bf16.msra.mxu1 %v2849_v49  ;;  %v2903_v48 = vcombine.low %v860_v36, %v864_v37  ;;  %v2905_v49 = vcombine.low %v861_v38, %v865_v39  ;;  %v917_v36 = vld [vmem:[%s3700_s4 + $0x558] sm:$0xff]  ;;  %v2953_v39 = vcombine.low %v909_v26, %v913_v27 }
 0x13a   : > { %2504 = vmatprep.subr.bf16.mxu0 %v2856_v50  ;;  %2586 = vmatprep.subr.bf16.mxu1 %v2858_v51  ;;  %v2912_v50 = vcombine.high %v868_v44, %v872_v45  ;;  %v2914_v51 = vcombine.high %v869_v47, %v873_v1  ;;  %v921_v37 = vld [vmem:[%s3700_s4 + $0x578] sm:$0xff] }
 0x13d   : > { %2505 = vmatpush1.bf16.msra.mxu0 %v2855_v56  ;;  %2587 = vmatpush1.bf16.msra.mxu1 %v2857_v57  ;;  %v2911_v56 = vcombine.low %v868_v44, %v872_v45  ;;  %v2913_v57 = vcombine.low %v869_v47, %v873_v1  ;;  %v925_v44 = vld [vmem:[%s3700_s4 + $0x598] sm:$0xff]  ;;  %v2961_v1 = vcombine.low %v917_v36, %v921_v37 }
 0x13e   : > { %2506 = vmatprep.subr.bf16.mxu0 %v2864_v58  ;;  %2588 = vmatprep.subr.bf16.mxu1 %v2866_v59  ;;  %v2920_v58 = vcombine.high %v876_v52, %v880_v53  ;;  %v2922_v59 = vcombine.high %v877_v54, %v881_v55  ;;  %v929_v45 = vld [vmem:[%s3700_s4 + $0x5b8] sm:$0xff] }
 0x141   : > { %2507 = vmatpush1.bf16.msra.mxu0 %v2863_v0  ;;  %2589 = vmatpush1.bf16.msra.mxu1 %v2865_v3  ;;  %v2919_v0 = vcombine.low %v876_v52, %v880_v53  ;;  %v2921_v3 = vcombine.low %v877_v54, %v881_v55  ;;  %v933_v52 = vld [vmem:[%s3700_s4 + $0x5d8] sm:$0xff]  ;;  %v2969_v55 = vcombine.low %v925_v44, %v929_v45 }
 0x142   : > { %2508 = vmatprep.subr.bf16.mxu0 %v2872_v4  ;;  %2590 = vmatprep.subr.bf16.mxu1 %v2874_v5  ;;  %v2928_v4 = vcombine.high %v884_v60, %v888_v61  ;;  %v2930_v5 = vcombine.high %v885_v62, %v889_v63  ;;  %v937_v53 = vld [vmem:[%s3700_s4 + $0x5f8] sm:$0xff] }
 0x145   : > { %2509 = vmatpush1.bf16.msra.mxu0 %v2871_v12  ;;  %2591 = vmatpush1.bf16.msra.mxu1 %v2873_v31  ;;  %v2927_v12 = vcombine.low %v884_v60, %v888_v61  ;;  %v2929_v31 = vcombine.low %v885_v62, %v889_v63  ;;  %v941_v60 = vld [vmem:[%s3700_s4 + $0x618] sm:$0xff]  ;;  %v2977_v63 = vcombine.low %v933_v52, %v937_v53 }
 0x146   : > { %2510 = vmatprep.subr.bf16.mxu0 %v2880_v13  ;;  %2592 = vmatprep.subr.bf16.mxu1 %v2882_v15  ;;  %v2936_v13 = vcombine.high %v892_v7, %v896_v8  ;;  %v2938_v15 = vcombine.high %v893_v9, %v897_v10  ;;  %v945_v61 = vld [vmem:[%s3700_s4 + $0x638] sm:$0xff] }
 0x149   : > { %2511 = vmatpush1.bf16.msra.mxu0 %v2879_v20  ;;  %2593 = vmatpush1.bf16.msra.mxu1 %v2881_v21  ;;  %v2937_v20 = vcombine.low %v893_v9, %v897_v10  ;;  %v2944_v21 = vcombine.high %v900_v16, %v904_v17  ;;  %v2985_v10 = vcombine.low %v941_v60, %v945_v61  ;;  %v957_v16 = vld [vmem:[%s3700_s4 + $0x698] sm:$0xff] }
 0x14a   : > { %2512 = vmatprep.subr.bf16.mxu0 %v2888_v22  ;;  %2594 = vmatprep.subr.bf16.mxu1 %v2890_v23  ;;  %v2946_v22 = vcombine.high %v901_v18, %v905_v19  ;;  %v908_v23 = vld [vmem:[%s3700_s4 + $0x510] sm:$0xff]  ;;  %v961_v17 = vld [vmem:[%s3700_s4 + $0x6b8] sm:$0xff] }
 0x14b   : > { %v2951_v38 = vcombine.low %v908_v23, %v912_v24 }
 0x14d   : > { %2513 = vmatpush1.bf16.msra.mxu0 %v2887_v30  ;;  %2595 = vmatpush1.bf16.msra.mxu1 %v2889_v32  ;;  %v2952_v30 = vcombine.high %v908_v23, %v912_v24  ;;  %v2954_v32 = vcombine.high %v909_v26, %v913_v27  ;;  %v965_v23 = vld [vmem:[%s3700_s4 + $0x6d8] sm:$0xff]  ;;  %v3001_v27 = vcombine.low %v957_v16, %v961_v17 }
 0x14e   : > { %2514 = vmatprep.subr.bf16.mxu0 %v2896_v33  ;;  %2596 = vmatprep.subr.bf16.mxu1 %v2898_v34  ;;  %v916_v33 = vld [vmem:[%s3700_s4 + $0x550] sm:$0xff]  ;;  %v969_v24 = vld [vmem:[%s3700_s4 + $0x6f8] sm:$0xff] }
 0x14f   : > { %v920_v34 = vld [vmem:[%s3700_s4 + $0x570] sm:$0xff] }
 0x150   : > { %v2959_v47 = vcombine.low %v916_v33, %v920_v34 }
 0x151   : > { %2515 = vmatpush1.bf16.msra.mxu0 %v2895_v40  ;;  %2597 = vmatpush1.bf16.msra.mxu1 %v2897_v41  ;;  %v2960_v40 = vcombine.high %v916_v33, %v920_v34  ;;  %v2962_v41 = vcombine.high %v917_v36, %v921_v37  ;;  %v973_v33 = vld [vmem:[%s3700_s4 + $0x718] sm:$0xff]  ;;  %v3009_v37 = vcombine.low %v965_v23, %v969_v24 }
 0x152   : > { %2516 = vmatprep.subr.bf16.mxu0 %v2904_v42  ;;  %2598 = vmatprep.subr.bf16.mxu1 %v2906_v43  ;;  %v924_v42 = vld [vmem:[%s3700_s4 + $0x590] sm:$0xff]  ;;  %v977_v34 = vld [vmem:[%s3700_s4 + $0x738] sm:$0xff] }
 0x153   : > { %v928_v43 = vld [vmem:[%s3700_s4 + $0x5b0] sm:$0xff] }
 0x154   : > { %v2967_v54 = vcombine.low %v924_v42, %v928_v43 }
 0x155   : > { %2517 = vmatpush1.bf16.msra.mxu0 %v2903_v48  ;;  %2599 = vmatpush1.bf16.msra.mxu1 %v2905_v49  ;;  %v2968_v48 = vcombine.high %v924_v42, %v928_v43  ;;  %v2970_v49 = vcombine.high %v925_v44, %v929_v45  ;;  %v981_v42 = vld [vmem:[%s3700_s4 + $0x758] sm:$0xff]  ;;  %v3017_v45 = vcombine.low %v973_v33, %v977_v34 }
 0x156   : > { %2518 = vmatprep.subr.bf16.mxu0 %v2912_v50  ;;  %2600 = vmatprep.subr.bf16.mxu1 %v2914_v51  ;;  %v932_v50 = vld [vmem:[%s3700_s4 + $0x5d0] sm:$0xff]  ;;  %v985_v43 = vld [vmem:[%s3700_s4 + $0x778] sm:$0xff] }
 0x157   : > { %v936_v51 = vld [vmem:[%s3700_s4 + $0x5f0] sm:$0xff] }
 0x158   : > { %v2975_v62 = vcombine.low %v932_v50, %v936_v51 }
 0x159   : > { %2519 = vmatpush1.bf16.msra.mxu0 %v2911_v56  ;;  %2601 = vmatpush1.bf16.msra.mxu1 %v2913_v57  ;;  %v2976_v56 = vcombine.high %v932_v50, %v936_v51  ;;  %v2978_v57 = vcombine.high %v933_v52, %v937_v53  ;;  %v989_v50 = vld [vmem:[%s3700_s4 + $0x798] sm:$0xff]  ;;  %v3025_v53 = vcombine.low %v981_v42, %v985_v43 }
 0x15a   : > { %2529 = vmatprep.subr.bf16.mxu0 %v2920_v58  ;;  %2611 = vmatprep.subr.bf16.mxu1 %v2922_v59  ;;  %v940_v58 = vld [vmem:[%s3700_s4 + $0x610] sm:$0xff]  ;;  %v993_v51 = vld [vmem:[%s3700_s4 + $0x7b8] sm:$0xff] }
 0x15b   : > { %v944_v59 = vld [vmem:[%s3700_s4 + $0x630] sm:$0xff] }
 0x15c   : > { %2521 = vmatmul.mubr.bf16.vlgmr.msra.gmra.mrb[4].mxu0 %v3788_v25  ;;  %2603 = vmatmul.mubr.bf16.vlgmr.msra.gmra.mrb[4].mxu1 %v3788_v25  ;;  %v2935_v25 = vcombine.low %v892_v7, %v896_v8  ;;  %v949_v7 = vld [vmem:[%s3700_s4 + $0x658] sm:$0xff]  ;;  %v2983_v9 = vcombine.low %v940_v58, %v944_v59 }
 0x15d   : > { %2530 = vmatpush1.bf16.msra.mxu0 %v2919_v0  ;;  %2612 = vmatpush1.bf16.msra.mxu1 %v2921_v3  ;;  %v2984_v0 = vcombine.high %v940_v58, %v944_v59  ;;  %v2986_v3 = vcombine.high %v941_v60, %v945_v61  ;;  %v953_v8 = vld [vmem:[%s3700_s4 + $0x678] sm:$0xff]  ;;  %v3033_v61 = vcombine.low %v989_v50, %v993_v51 }
 0x15e   : > { %2531 = vmatprep.subr.bf16.mxu0 %v2928_v4  ;;  %2613 = vmatprep.subr.bf16.mxu1 %v2930_v5  ;;  %v948_v4 = vld [vmem:[%s3700_s4 + $0x650] sm:$0xff]  ;;  %v997_v58 = vld [vmem:[%s3700_s4 + $0x7d8] sm:$0xff] }
 0x15f   : > { %2561 = vmatprep.mubr.bf16.mxu0 %v3794_v35  ;;  %2643 = vmatprep.mubr.bf16.mxu1 %v3794_v35  ;;  %v2945_v35 = vcombine.low %v901_v18, %v905_v19  ;;  %v952_v5 = vld [vmem:[%s3700_s4 + $0x670] sm:$0xff]  ;;  %v2993_v19 = vcombine.low %v949_v7, %v953_v8  ;;  %v1001_v59 = vld [vmem:[%s3700_s4 + $0x7f8] sm:$0xff] }
 0x160   : > { %v2991_v18 = vcombine.low %v948_v4, %v952_v5 }
 0x161   : > { %2532 = vmatpush1.bf16.msra.mxu0 %v2927_v12  ;;  %2614 = vmatpush1.bf16.msra.mxu1 %v2929_v31  ;;  %v2992_v12 = vcombine.high %v948_v4, %v952_v5  ;;  %v2994_v31 = vcombine.high %v949_v7, %v953_v8  ;;  %v1002_v4 = vld [vmem:[%s713_s8] sm:$0xff]  ;;  %v3119_v5 = vmov 1966171168  }
 0x162   : > { %2533 = vmatprep.subr.bf16.mxu0 %v2936_v13  ;;  %2615 = vmatprep.subr.bf16.mxu1 %v2938_v15  ;;  %v956_v13 = vld [vmem:[%s3700_s4 + $0x690] sm:$0xff]  ;;  %v2665_v7 = vunpack.c.l.s4 %v3119_v5  ;;  %v2287_v8 = vrot.slane %v1002_v4, %v724_v6 }
 0x163   : > { %v960_v15 = vld [vmem:[%s3700_s4 + $0x6b0] sm:$0xff] }
 0x164   : > { %v2999_v26 = vcombine.low %v956_v13, %v960_v15 }
 0x165   : > { %2534 = vmatpush1.bf16.msra.mxu0 %v2935_v25  ;;  %2616 = vmatpush1.bf16.msra.mxu1 %v2937_v20  ;;  %v3000_v25 = vcombine.high %v956_v13, %v960_v15  ;;  %v3002_v20 = vcombine.high %v957_v16, %v961_v17 }
 0x166   : > { %2535 = vmatprep.subr.bf16.mxu0 %v2944_v21  ;;  %2617 = vmatprep.subr.bf16.mxu1 %v2946_v22  ;;  %v964_v21 = vld [vmem:[%s3700_s4 + $0x6d0] sm:$0xff] }
 0x167   : > { %v968_v22 = vld [vmem:[%s3700_s4 + $0x6f0] sm:$0xff] }
 0x168   : > { %v3007_v36 = vcombine.low %v964_v21, %v968_v22 }
 0x169   : > { %2536 = vmatpush1.bf16.msra.mxu0 %v2943_v29  ;;  %2618 = vmatpush1.bf16.msra.mxu1 %v2945_v35  ;;  %v3008_v29 = vcombine.high %v964_v21, %v968_v22  ;;  %v3010_v35 = vcombine.high %v965_v23, %v969_v24 }
 0x16a   : > { %2537 = vmatprep.subr.bf16.mxu0 %v2952_v30  ;;  %2619 = vmatprep.subr.bf16.mxu1 %v2954_v32  ;;  %v972_v30 = vld [vmem:[%s3700_s4 + $0x710] sm:$0xff] }
 0x16b   : > { %v976_v32 = vld [vmem:[%s3700_s4 + $0x730] sm:$0xff] }
 0x16c   : > { %v3015_v44 = vcombine.low %v972_v30, %v976_v32 }
 0x16d   : > { %2538 = vmatpush1.bf16.msra.mxu0 %v2951_v38  ;;  %2620 = vmatpush1.bf16.msra.mxu1 %v2953_v39  ;;  %v3016_v38 = vcombine.high %v972_v30, %v976_v32  ;;  %v3018_v39 = vcombine.high %v973_v33, %v977_v34  ;;  %v2314_v30 = vsub.s32 7, %v3698_v2 }
 0x16e   : > { %2539 = vmatprep.subr.bf16.mxu0 %v2960_v40  ;;  %2621 = vmatprep.subr.bf16.mxu1 %v2962_v41  ;;  %v980_v40 = vld [vmem:[%s3700_s4 + $0x750] sm:$0xff] }
 0x16f   : > { %v984_v41 = vld [vmem:[%s3700_s4 + $0x770] sm:$0xff] }
 0x170   : > { %v3023_v52 = vcombine.low %v980_v40, %v984_v41 }
 0x171   : > { %2540 = vmatpush1.bf16.msra.mxu0 %v2959_v47  ;;  %2622 = vmatpush1.bf16.msra.mxu1 %v2961_v1  ;;  %v3024_v47 = vcombine.high %v980_v40, %v984_v41  ;;  %v3026_v1 = vcombine.high %v981_v42, %v985_v43 }
 0x172   : > { %2541 = vmatprep.subr.bf16.mxu0 %v2968_v48  ;;  %2623 = vmatprep.subr.bf16.mxu1 %v2970_v49  ;;  %v988_v48 = vld [vmem:[%s3700_s4 + $0x790] sm:$0xff] }
 0x173   : > { %v992_v49 = vld [vmem:[%s3700_s4 + $0x7b0] sm:$0xff] }
 0x174   : > { %v3031_v60 = vcombine.low %v988_v48, %v992_v49 }
 0x175   : > { %2542 = vmatpush1.bf16.msra.mxu0 %v2967_v54  ;;  %2624 = vmatpush1.bf16.msra.mxu1 %v2969_v55  ;;  %v3032_v54 = vcombine.high %v988_v48, %v992_v49  ;;  %v3034_v55 = vcombine.high %v989_v50, %v993_v51 }
 0x176   : > { %2543 = vmatprep.subr.bf16.mxu0 %v2976_v56  ;;  %2625 = vmatprep.subr.bf16.mxu1 %v2978_v57  ;;  %v996_v56 = vld [vmem:[%s3700_s4 + $0x7d0] sm:$0xff] }
 0x177   : > { %v1000_v57 = vld [vmem:[%s3700_s4 + $0x7f0] sm:$0xff] }
 0x179   : > { %2544 = vmatpush1.bf16.msra.mxu0 %v2975_v62  ;;  %2626 = vmatpush1.bf16.msra.mxu1 %v2977_v63  ;;  %v3040_v62 = vcombine.high %v996_v56, %v1000_v57  ;;  %v3042_v63 = vcombine.high %v997_v58, %v1001_v59 }
 0x17a   : > { %2545 = vmatprep.subr.bf16.mxu0 %v2984_v0  ;;  %2627 = vmatprep.subr.bf16.mxu1 %v2986_v3  ;;  %v3039_v0 = vcombine.low %v996_v56, %v1000_v57  ;;  %v3041_v3 = vcombine.low %v997_v58, %v1001_v59 }
 0x17d   : > { %2546 = vmatpush1.bf16.msra.mxu0 %v2983_v9  ;;  %2628 = vmatpush1.bf16.msra.mxu1 %v2985_v10  ;;  %v2295_v9 = vrot.slane %v1002_v4, %v732_v28  ;;  %v2666_v10 = vunpack.c.0.s8 %v2665_v7 }
 0x17e   : > { %2547 = vmatprep.subr.bf16.mxu0 %v2992_v12  ;;  %2629 = vmatprep.subr.bf16.mxu1 %v2994_v31  ;;  %v2299_v12 = vrot.slane %v1002_v4, %v736_v14  ;;  %v2302_v14 = vsub.s32 4, %v3698_v2 }
 0x180   : > { %v2303_v32 = vrot.slane %v1002_v4, %v2302_v14 }
 0x181   : > { %2548 = vmatpush1.bf16.msra.mxu0 %v2991_v18  ;;  %2630 = vmatpush1.bf16.msra.mxu1 %v2993_v19  ;;  %v2669_v19 = vsub.s32 %v2666_v10, %v3698_v2 }
 0x182   : > { %2549 = vmatprep.subr.bf16.mxu0 %v3000_v25  ;;  %2631 = vmatprep.subr.bf16.mxu1 %v3002_v20 }
 0x185   : > { %2550 = vmatpush1.bf16.msra.mxu0 %v2999_v26  ;;  %2632 = vmatpush1.bf16.msra.mxu1 %v3001_v27 }
 0x186   : > { %2551 = vmatprep.subr.bf16.mxu0 %v3008_v29  ;;  %2633 = vmatprep.subr.bf16.mxu1 %v3010_v35  ;;  %v2310_v29 = vsub.s32 6, %v3698_v2  ;;  %v2306_v35 = vsub.s32 5, %v3698_v2 }
 0x188   : > { %v2311_v33 = vrot.slane %v1002_v4, %v2310_v29  ;;  %v2307_v34 = vrot.slane %v1002_v4, %v2306_v35 }
 0x189   : > { %2552 = vmatpush1.bf16.msra.mxu0 %v3007_v36  ;;  %2634 = vmatpush1.bf16.msra.mxu1 %v3009_v37  ;;  %v2315_v36 = vrot.slane %v1002_v4, %v2314_v30 }
 0x18a   : > { %2553 = vmatprep.subr.bf16.mxu0 %v3016_v38  ;;  %2635 = vmatprep.subr.bf16.mxu1 %v3018_v39 }
 0x18d   : > { %2554 = vmatpush1.bf16.msra.mxu0 %v3015_v44  ;;  %2636 = vmatpush1.bf16.msra.mxu1 %v3017_v45 }
 0x18e   : > { %2555 = vmatprep.subr.bf16.mxu0 %v3024_v47  ;;  %2637 = vmatprep.subr.bf16.mxu1 %v3026_v1 }
 0x191   : > { %2556 = vmatpush1.bf16.msra.mxu0 %v3023_v52  ;;  %2638 = vmatpush1.bf16.msra.mxu1 %v3025_v53 }
 0x192   : > { %2557 = vmatprep.subr.bf16.mxu0 %v3032_v54  ;;  %2639 = vmatprep.subr.bf16.mxu1 %v3034_v55 }
 0x195   : > { %2558 = vmatpush1.bf16.msra.mxu0 %v3031_v60  ;;  %2640 = vmatpush1.bf16.msra.mxu1 %v3033_v61 }
 0x196   : > { %2559 = vmatprep.subr.bf16.mxu0 %v3040_v62  ;;  %2641 = vmatprep.subr.bf16.mxu1 %v3042_v63 }
 0x199   : > { %2560 = vmatpush1.bf16.msra.mxu0 %v3039_v0  ;;  %2642 = vmatpush1.bf16.msra.mxu1 %v3041_v3 }
 0x19c   : > { %2562 = vmatmul.mubr.bf16.vlgmr.msra.gmra.mrb[4].mxu0 %v3864_v46  ;;  %2644 = vmatmul.mubr.bf16.vlgmr.msra.gmra.mrb[4].mxu1 %v3864_v46  ;;  %v2291_v46 = vrot.slane %v1002_v4, %v728_v11 }
 0x1ef   : > { %v2399_v31 = vpop.f32.mrb[0].mxu0  ;;  %v2481_v15 = vpop.f32.mrb[0].mxu1 }
 0x1f0   : > { %v3046_v13 = vadd.f32 %v2399_v31, %v2287_v8  ;;  %v2401_v16 = vpop.f32.mrb[1].mxu0  ;;  %v3048_v17 = vadd.f32 %v2481_v15, %v2295_v9  ;;  %v2483_v25 = vpop.f32.mrb[1].mxu1 }
 0x1f1   : > { %v3047_v18 = vadd.f32 %v2401_v16, %v2291_v46  ;;  %v2403_v6 = vpop.f32.mrb[2].mxu0  ;;  %v3049_v20 = vadd.f32 %v2483_v25, %v2299_v12  ;;  %v2485_v21 = vpop.f32.mrb[2].mxu1 }
 0x1f2   : > { %v2404_v28 = vpop.f32.mrb[3].mxu0  ;;  %v2486_v23 = vpop.f32.mrb[3].mxu1 }
 0x1f3   : > { %v2660_v22 = vcombine.low %v3046_v13, %v3047_v18  ;;  %v2661_v11 = vcombine.low %v3048_v17, %v3049_v20 }
 0x1f5   : > { %v2670_v24 = vrot.slane %v2660_v22, %v2669_v19  ;;  %v2677_v26 = vrot.slane %v2661_v11, %v2669_v19 }
 0x1f7   : > { %v2692_v27 = vcombine.low %v2670_v24, %v2677_v26 }
 0x1f9   : > { %v2700_v53 = vrot.slane %v2692_v27, %v2669_v19 }
 0x26f   : > { %v2563_v37 = vpop.f32.mrb[4].mxu0  ;;  %v2645_v39 = vpop.f32.mrb[4].mxu1 }
 0x270   : > { %v3050_v38 = vadd.f32 %v2563_v37, %v2303_v32  ;;  %v2565_v40 = vpop.f32.mrb[5].mxu0  ;;  %v3052_v41 = vadd.f32 %v2645_v39, %v2311_v33  ;;  %v2647_v43 = vpop.f32.mrb[5].mxu1 }
 0x271   : > { %v3051_v42 = vadd.f32 %v2565_v40, %v2307_v34  ;;  %v2567_v44 = vpop.f32.mrb[6].mxu0  ;;  %v3053_v45 = vadd.f32 %v2647_v43, %v2315_v36  ;;  %v2649_v47 = vpop.f32.mrb[6].mxu1 }
 0x272   : > { %v2568_v1 = vpop.f32.mrb[7].mxu0  ;;  %v2650_v49 = vpop.f32.mrb[7].mxu1 }
 0x273   : > { %v2662_v48 = vcombine.low %v3050_v38, %v3051_v42  ;;  %v2663_v50 = vcombine.low %v3052_v41, %v3053_v45 }
 0x275   : > { %v2684_v2 = vrot.slane %v2662_v48, %v2669_v19  ;;  %v2691_v51 = vrot.slane %v2663_v50, %v2669_v19 }
 0x277   : > { %v2693_v52 = vcombine.low %v2684_v2, %v2691_v51 }
 0x279   : > { %v2707_v54 = vrot.slane %v2693_v52, %v2669_v19 }
 0x27b   : > { %v2708_v55 = vcombine.low %v2700_v53, %v2707_v54 }
 0x27d   : > { %2710 = vst [vmem:[%s718_s11] sm:$0xff] %v2708_v55 }
 0x27e PF: > { %p10_p9 = scmp.ge.s32.totalorder %s3157_s16, 8   ;;  %s4037_s12 = smov %s3113_s13 }
 0x27f   : > { %s4038_s13 = smov %s3166_s19  ;;  %s4039_s14 = smov %s3157_s16 }
 0x280   :  { %12 = sbr.rel (!%p10_p9) target bundleno = 2 (0x2), region = 93 }

</bundles_post_ra>
